<compile_context>
chip_gen: v5e
topology: v5e:2x2
jax: 0.10.0
libtpu: 0.0.40
codegen_flags: <defaults>
</compile_context>

<pallas_src>
import functools
import math

import jax
import jax.numpy as jnp
from jax.experimental import pallas as pl
from jax.experimental.pallas import tpu as pltpu

NEG_INF = -1e9
_VMEM_LIMIT = 32 * 1024 * 1024  # safe on v5e/v6e/v7x at these shapes


# ----------------------------------------------------------------------------
# BlockSpec index-map helpers
# ----------------------------------------------------------------------------

def _const_map(ndim):
    """Constant index map: array fetched once, stays VMEM-resident over the grid."""
    return lambda l: (0,) * ndim


def _layer_map(ndim):
    """Index leading (layer) axis by the grid step; rest constant."""
    return lambda l: (l,) + (0,) * (ndim - 1)


# ----------------------------------------------------------------------------
# Fused whole-stack kernel: grid=(n_layers,), residual carried in VMEM scratch
# ----------------------------------------------------------------------------

def _dst_stack_kernel(states_ref, sbias_ref, *rest,
                      num_streams, stream_slots, n_heads, eps):
    # --- unpack refs (inputs..., output, scratch) ---
    stream_refs = rest[:2 * num_streams]
    tail = rest[2 * num_streams:]
    (ln_g_ref, ln_b_ref,
     swqkv_ref, sbqkv_ref, swo_ref, sbo_ref) = tail[:6]
    tail = tail[6:]
    if num_streams > 0:
        (cwq_ref, cbq_ref, cwkv_ref, cbkv_ref, cwo_ref, cbo_ref) = tail[:6]
        tail = tail[6:]
    (w1_ref, b1_ref, w2_ref, b2_ref, fg_ref, fb_ref, out_ref, resid_ref) = tail

    B, Tq, D = states_ref.shape
    H = n_heads
    dk = D // H
    layer = pl.program_id(0)

    # Initialize the resident residual stream on the first layer step.
    @pl.when(layer == 0)
    def _():
        resid_ref[...] = states_ref[...].astype(jnp.float32)

    x = resid_ref[...]                                      # (B, Tq, D) f32
    lg = ln_g_ref[0].astype(jnp.float32)                    # (5, D)
    lb = ln_b_ref[0].astype(jnp.float32)
    sbias = sbias_ref[...].astype(jnp.float32)              # (B, 1, Tq) additive bias

    def layernorm(x2d, g_row, b_row):
        """x2d: (N, D) f32; Annotated-Transformer LN (unbiased std, eps on std)."""
        mean = jnp.mean(x2d, axis=-1, keepdims=True)
        d = x2d - mean
        var = jnp.sum(d * d, axis=-1, keepdims=True) * jnp.float32(1.0 / (D - 1))
        inv = pl.reciprocal(jnp.sqrt(var) + eps, approx=False)
        return g_row * d * inv + b_row

    def mha(q, k, v, bias, wo, bo):
        """q: (B,Tq,D); k,v: (B,Tk,D); bias: (B,1,Tk) additive; wo: (D,D) bf16."""
        scale = jnp.float32(1.0 / math.sqrt(dk))
        ctx_heads = []
        for h in range(H):                                  # static unroll over heads
            lo = h * dk
            q_h = q[:, :, lo:lo + dk]
            k_h = k[:, :, lo:lo + dk]
            v_h = v[:, :, lo:lo + dk]
            s = jnp.einsum('bqd,bkd->bqk',
                           q_h.astype(jnp.bfloat16), k_h.astype(jnp.bfloat16),
                           preferred_element_type=jnp.float32) * scale + bias
            s = s - jnp.max(s, axis=-1, keepdims=True)
            p = jnp.exp(s)
            p = p * pl.reciprocal(jnp.sum(p, axis=-1, keepdims=True), approx=True)
            ctx_heads.append(
                jnp.einsum('bqk,bkd->bqd',
                           p.astype(jnp.bfloat16), v_h.astype(jnp.bfloat16),
                           preferred_element_type=jnp.float32))
        ctx = jnp.concatenate(ctx_heads, axis=-1).reshape(B * Tq, D)
        out = jnp.dot(ctx.astype(jnp.bfloat16), wo,
                      preferred_element_type=jnp.float32) + bo.astype(jnp.float32)
        return out.reshape(B, Tq, D)

    # ---- sublayer 0: masked self-attention (fused (D,3D) QKV projection) ----
    y = layernorm(x.reshape(B * Tq, D), lg[0:1, :], lb[0:1, :])
    qkv = jnp.dot(y.astype(jnp.bfloat16), swqkv_ref[0],
                  preferred_element_type=jnp.float32) + sbqkv_ref[0].astype(jnp.float32)
    q = qkv[:, :D].reshape(B, Tq, D)
    k = qkv[:, D:2 * D].reshape(B, Tq, D)
    v = qkv[:, 2 * D:].reshape(B, Tq, D)
    x = x + mha(q, k, v, sbias, swo_ref[0], sbo_ref[0])

    # ---- sublayers 1..S: cross-attention to each provided text stream ----
    for i in range(num_streams):
        slot = stream_slots[i]                              # original stream index
        txt = stream_refs[2 * i][...].astype(jnp.float32)   # (B, Tk, D)
        tbias = stream_refs[2 * i + 1][...].astype(jnp.float32)  # (B, 1, Tk)
        Tk = txt.shape[1]
        y = layernorm(x.reshape(B * Tq, D),
                      lg[slot + 1:slot + 2, :], lb[slot + 1:slot + 2, :])
        q = (jnp.dot(y.astype(jnp.bfloat16), cwq_ref[0, i],
                     preferred_element_type=jnp.float32)
             + cbq_ref[0, i].astype(jnp.float32)).reshape(B, Tq, D)
        kv = jnp.dot(txt.reshape(B * Tk, D).astype(jnp.bfloat16), cwkv_ref[0, i],
                     preferred_element_type=jnp.float32) + cbkv_ref[0, i].astype(jnp.float32)
        k = kv[:, :D].reshape(B, Tk, D)
        v = kv[:, D:].reshape(B, Tk, D)
        x = x + mha(q, k, v, tbias, cwo_ref[0, i], cbo_ref[0, i])

    # ---- last sublayer: position-wise feed-forward ----
    y = layernorm(x.reshape(B * Tq, D), lg[4:5, :], lb[4:5, :])
    hdn = jnp.dot(y.astype(jnp.bfloat16), w1_ref[0],
                  preferred_element_type=jnp.float32) + b1_ref[0].astype(jnp.float32)
    hdn = jnp.maximum(hdn, 0.0)
    o = jnp.dot(hdn.astype(jnp.bfloat16), w2_ref[0],
                preferred_element_type=jnp.float32) + b2_ref[0].astype(jnp.float32)
    x = x + o.reshape(B, Tq, D)

    resid_ref[...] = x                                      # carry to next layer step

    # ---- final LayerNorm fused into the last layer step ----
    @pl.when(layer == pl.num_programs(0) - 1)
    def _():
        xf = layernorm(x.reshape(B * Tq, D),
                       fg_ref[...].astype(jnp.float32),
                       fb_ref[...].astype(jnp.float32))
        out_ref[...] = xf.reshape(B, Tq, D).astype(out_ref.dtype)


# ----------------------------------------------------------------------------
# Wrapper: builds the single fused pallas_call
# ----------------------------------------------------------------------------

def dst_forward(params, states, states_mask,
                in_txt1=None, in_mask1=None,
                in_txt2=None, in_mask2=None,
                in_txt3=None, in_mask3=None):
    B, Tq, D = states.shape
    L = params["ln_g"].shape[0]
    H = params["n_heads"]
    assert D % H == 0

    def to_bias(mask):
        # Additive bias computed once in the wrapper (0 where attend, -1e9 where masked).
        return jnp.where(mask > 0, 0.0, NEG_INF).astype(jnp.float32)

    streams = []
    for slot, (t, m) in enumerate([(in_txt1, in_mask1),
                                   (in_txt2, in_mask2),
                                   (in_txt3, in_mask3)]):
        if t is None:
            continue
        if m is None:
            m = jnp.ones((t.shape[0], 1, t.shape[1]), jnp.float32)
        streams.append((slot, t, to_bias(m)))
    S = len(streams)
    slots = tuple(s for s, _, _ in streams)

    args = [states, to_bias(states_mask)]
    in_specs = [
        pl.BlockSpec((B, Tq, D), _const_map(3)),
        pl.BlockSpec((B, 1, Tq), _const_map(3)),
    ]
    for _, t, bias in streams:
        Tk = t.shape[1]
        args += [t, bias]
        in_specs += [
            pl.BlockSpec((B, Tk, D), _const_map(3)),
            pl.BlockSpec((B, 1, Tk), _const_map(3)),
        ]

    def gather(name):
        # Select cross-attention weights for the streams actually provided (static).
        arr = params[name]
        return jnp.stack([arr[:, s] for s in slots], axis=1)

    F = params["ffn_w1"].shape[-1]
    weights = [
        params["ln_g"], params["ln_b"],
        params["self_wqkv"], params["self_bqkv"], params["self_wo"], params["self_bo"],
    ]
    if S > 0:
        weights += [gather("cross_wq"), gather("cross_bq"),
                    gather("cross_wkv"), gather("cross_bkv"),
                    gather("cross_wo"), gather("cross_bo")]
    weights += [params["ffn_w1"], params["ffn_b1"], params["ffn_w2"], params["ffn_b2"]]

    for arr in weights:
        args.append(arr)
        # Block = one layer's slice; last two dims of the block equal the array's.
        in_specs.append(pl.BlockSpec((1,) + arr.shape[1:], _layer_map(arr.ndim)))

    for arr in (params["final_g"], params["final_b"]):   # layer-invariant
        args.append(arr)
        in_specs.append(pl.BlockSpec(arr.shape, _const_map(arr.ndim)))

    kernel = functools.partial(
        _dst_stack_kernel,
        num_streams=S, stream_slots=slots, n_heads=H, eps=1e-6)

    return pl.pallas_call(
        kernel,
        out_shape=jax.ShapeDtypeStruct((B, Tq, D), states.dtype),
        grid=(L,),
        in_specs=in_specs,
        out_specs=pl.BlockSpec((B, Tq, D), _const_map(3)),
        scratch_shapes=[pltpu.VMEM((B, Tq, D), jnp.float32)],  # residual stream
        compiler_params=pltpu.CompilerParams(
            dimension_semantics=("arbitrary",),     # layers are sequential
            vmem_limit_bytes=_VMEM_LIMIT),
    )(*args)


# ----------------------------------------------------------------------------
# Deterministic parameter init (weights bf16 for the MXU; biases & LN params f32)
# ----------------------------------------------------------------------------

def _uniform(key, shape, scale, dtype):
    return jax.random.uniform(key, shape, jnp.float32, -scale, scale).astype(dtype)


def init_dst_params(key, n_layers, d_model, n_heads, d_ff):
    L, D, F = n_layers, d_model, d_ff
    sD = 1.0 / math.sqrt(D)
    sF = 1.0 / math.sqrt(F)
    ks = jax.random.split(key, 14)
    return {
        "n_heads": n_heads,
        # 5 per-layer LayerNorms (self-attn, 3 cross-attn slots, FFN)
        "ln_g": jnp.ones((L, 5, D), jnp.float32),
        "ln_b": jnp.zeros((L, 5, D), jnp.float32),
        # self-attention: fused QKV projection
        "self_wqkv": _uniform(ks[0], (L, D, 3 * D), sD, jnp.bfloat16),
        "self_bqkv": _uniform(ks[1], (L, 1, 3 * D), sD, jnp.float32),
        "self_wo":   _uniform(ks[2], (L, D, D), sD, jnp.bfloat16),
        "self_bo":   _uniform(ks[3], (L, 1, D), sD, jnp.float32),
        # 3 cross-attention slots (fused KV projection)
        "cross_wq":  _uniform(ks[4], (L, 3, D, D), sD, jnp.bfloat16),
        "cross_bq":  _uniform(ks[5], (L, 3, 1, D), sD, jnp.float32),
        "cross_wkv": _uniform(ks[6], (L, 3, D, 2 * D), sD, jnp.bfloat16),
        "cross_bkv": _uniform(ks[7], (L, 3, 1, 2 * D), sD, jnp.float32),
        "cross_wo":  _uniform(ks[8], (L, 3, D, D), sD, jnp.bfloat16),
        "cross_bo":  _uniform(ks[9], (L, 3, 1, D), sD, jnp.float32),
        # position-wise FFN
        "ffn_w1": _uniform(ks[10], (L, D, F), sD, jnp.bfloat16),
        "ffn_b1": _uniform(ks[11], (L, 1, F), sD, jnp.float32),
        "ffn_w2": _uniform(ks[12], (L, F, D), sF, jnp.bfloat16),
        "ffn_b2": _uniform(ks[13], (L, 1, D), sF, jnp.float32),
        # final LayerNorm
        "final_g": jnp.ones((1, D), jnp.float32),
        "final_b": jnp.zeros((1, D), jnp.float32),
    }


# ----------------------------------------------------------------------------
# Main
# ----------------------------------------------------------------------------

if __name__ == "__main__":
    B, S_states, S_txt = 2, 8, 6
    d_model, n_heads, d_ff, n_layers = 32, 4, 64, 2

    root = jax.random.PRNGKey(0)
    k_params, k_s, k_t1, k_t2, k_t3 = jax.random.split(root, 5)

    params = init_dst_params(k_params, n_layers, d_model, n_heads, d_ff)

    states = jax.random.normal(k_s, (B, S_states, d_model), jnp.float32)
    in_txt1 = jax.random.normal(k_t1, (B, S_txt, d_model), jnp.float32)
    in_txt2 = jax.random.normal(k_t2, (B, S_txt, d_model), jnp.float32)
    in_txt3 = jax.random.normal(k_t3, (B, S_txt, d_model), jnp.float32)

    # padding masks: 1 = attend, 0 = masked
    states_mask = jnp.ones((B, 1, S_states), jnp.float32).at[1, 0, -1].set(0.0)
    in_mask1 = jnp.ones((B, 1, S_txt), jnp.float32).at[1, 0, -2:].set(0.0)
    in_mask2 = jnp.ones((B, 1, S_txt), jnp.float32)
    in_mask3 = jnp.ones((B, 1, S_txt), jnp.float32).at[0, 0, -1].set(0.0)

    out = dst_forward(params, states, states_mask,
                      in_txt1, in_mask1, in_txt2, in_mask2, in_txt3, in_mask3)
    out = jax.block_until_ready(out)
    assert out.shape == (B, S_states, d_model)
    assert bool(jnp.all(jnp.isfinite(out)))
    print("KERNEL_OK")
</pallas_src>

<mosaic_0001>
module attributes {stable_mosaic.version = 11 : i64} {
  func.func @_dst_stack_kernel(%arg0: i32, %arg1: memref<2x8x32xf32, #tpu.memory_space<vmem>>, %arg2: memref<2x1x8xf32, #tpu.memory_space<vmem>>, %arg3: memref<2x6x32xf32, #tpu.memory_space<vmem>>, %arg4: memref<2x1x6xf32, #tpu.memory_space<vmem>>, %arg5: memref<2x6x32xf32, #tpu.memory_space<vmem>>, %arg6: memref<2x1x6xf32, #tpu.memory_space<vmem>>, %arg7: memref<2x6x32xf32, #tpu.memory_space<vmem>>, %arg8: memref<2x1x6xf32, #tpu.memory_space<vmem>>, %arg9: memref<1x5x32xf32, #tpu.memory_space<vmem>>, %arg10: memref<1x5x32xf32, #tpu.memory_space<vmem>>, %arg11: memref<1x32x96xbf16, #tpu.memory_space<vmem>>, %arg12: memref<1x1x96xf32, #tpu.memory_space<vmem>>, %arg13: memref<1x32x32xbf16, #tpu.memory_space<vmem>>, %arg14: memref<1x1x32xf32, #tpu.memory_space<vmem>>, %arg15: memref<1x3x32x32xbf16, #tpu.memory_space<vmem>>, %arg16: memref<1x3x1x32xf32, #tpu.memory_space<vmem>>, %arg17: memref<1x3x32x64xbf16, #tpu.memory_space<vmem>>, %arg18: memref<1x3x1x64xf32, #tpu.memory_space<vmem>>, %arg19: memref<1x3x32x32xbf16, #tpu.memory_space<vmem>>, %arg20: memref<1x3x1x32xf32, #tpu.memory_space<vmem>>, %arg21: memref<1x32x64xbf16, #tpu.memory_space<vmem>>, %arg22: memref<1x1x64xf32, #tpu.memory_space<vmem>>, %arg23: memref<1x64x32xbf16, #tpu.memory_space<vmem>>, %arg24: memref<1x1x32xf32, #tpu.memory_space<vmem>>, %arg25: memref<1x32xf32, #tpu.memory_space<vmem>>, %arg26: memref<1x32xf32, #tpu.memory_space<vmem>>, %arg27: memref<2x8x32xf32, #tpu.memory_space<vmem>>, %arg28: memref<2x8x32xf32, #tpu.memory_space<vmem>>) attributes {dimension_semantics = [#tpu.dimension_semantics<arbitrary>], iteration_bounds = array<i64: 2>, scalar_prefetch = 0 : i64, scratch_operands = 1 : i64, tpu.core_type = #tpu.core_type<tc>, window_params = [{pipeline_mode = #tpu.pipeline_mode<synchronous>, transform_indices = @transform_0, window_bounds = array<i64: 2, 8, 32>}, {pipeline_mode = #tpu.pipeline_mode<synchronous>, transform_indices = @transform_1, window_bounds = array<i64: 2, 1, 8>}, {pipeline_mode = #tpu.pipeline_mode<synchronous>, transform_indices = @transform_2, window_bounds = array<i64: 2, 6, 32>}, {pipeline_mode = #tpu.pipeline_mode<synchronous>, transform_indices = @transform_3, window_bounds = array<i64: 2, 1, 6>}, {pipeline_mode = #tpu.pipeline_mode<synchronous>, transform_indices = @transform_4, window_bounds = array<i64: 2, 6, 32>}, {pipeline_mode = #tpu.pipeline_mode<synchronous>, transform_indices = @transform_5, window_bounds = array<i64: 2, 1, 6>}, {pipeline_mode = #tpu.pipeline_mode<synchronous>, transform_indices = @transform_6, window_bounds = array<i64: 2, 6, 32>}, {pipeline_mode = #tpu.pipeline_mode<synchronous>, transform_indices = @transform_7, window_bounds = array<i64: 2, 1, 6>}, {transform_indices = @transform_8, window_bounds = array<i64: 1, 5, 32>}, {transform_indices = @transform_9, window_bounds = array<i64: 1, 5, 32>}, {transform_indices = @transform_10, window_bounds = array<i64: 1, 32, 96>}, {transform_indices = @transform_11, window_bounds = array<i64: 1, 1, 96>}, {transform_indices = @transform_12, window_bounds = array<i64: 1, 32, 32>}, {transform_indices = @transform_13, window_bounds = array<i64: 1, 1, 32>}, {transform_indices = @transform_14, window_bounds = array<i64: 1, 3, 32, 32>}, {transform_indices = @transform_15, window_bounds = array<i64: 1, 3, 1, 32>}, {transform_indices = @transform_16, window_bounds = array<i64: 1, 3, 32, 64>}, {transform_indices = @transform_17, window_bounds = array<i64: 1, 3, 1, 64>}, {transform_indices = @transform_18, window_bounds = array<i64: 1, 3, 32, 32>}, {transform_indices = @transform_19, window_bounds = array<i64: 1, 3, 1, 32>}, {transform_indices = @transform_20, window_bounds = array<i64: 1, 32, 64>}, {transform_indices = @transform_21, window_bounds = array<i64: 1, 1, 64>}, {transform_indices = @transform_22, window_bounds = array<i64: 1, 64, 32>}, {transform_indices = @transform_23, window_bounds = array<i64: 1, 1, 32>}, {pipeline_mode = #tpu.pipeline_mode<synchronous>, transform_indices = @transform_24, window_bounds = array<i64: 1, 32>}, {pipeline_mode = #tpu.pipeline_mode<synchronous>, transform_indices = @transform_25, window_bounds = array<i64: 1, 32>}, {pipeline_mode = #tpu.pipeline_mode<synchronous>, transform_indices = @transform_26, window_bounds = array<i64: 2, 8, 32>}]} {
    %c0_i32 = arith.constant 0 : i32
    %0 = arith.cmpi eq, %arg0, %c0_i32 : i32
    %1 = arith.extui %0 : i1 to i32
    %c0_i32_0 = arith.constant 0 : i32
    %2 = arith.cmpi ne, %1, %c0_i32_0 : i32
    scf.if %2 {
      %c0_246 = arith.constant 0 : index
      %c0_247 = arith.constant 0 : index
      %c0_248 = arith.constant 0 : index
      %655 = vector.load %arg1[%c0_246, %c0_247, %c0_248] : memref<2x8x32xf32, #tpu.memory_space<vmem>>, vector<2x8x32xf32>
      %c0_249 = arith.constant 0 : index
      %c0_250 = arith.constant 0 : index
      %c0_251 = arith.constant 0 : index
      %656 = vector.load %arg28[%c0_249, %c0_250, %c0_251] : memref<2x8x32xf32, #tpu.memory_space<vmem>>, vector<2x8x32xf32>
      tpu.vector_store %arg28[%c0_249, %c0_250, %c0_251], %655 {strides = array<i32>} : memref<2x8x32xf32, #tpu.memory_space<vmem>>, vector<2x8x32xf32>,
    } else {
    }
    %c0 = arith.constant 0 : index
    %c0_1 = arith.constant 0 : index
    %c0_2 = arith.constant 0 : index
    %3 = vector.load %arg28[%c0, %c0_1, %c0_2] : memref<2x8x32xf32, #tpu.memory_space<vmem>>, vector<2x8x32xf32>
    %c0_3 = arith.constant 0 : index
    %c0_4 = arith.constant 0 : index
    %c0_5 = arith.constant 0 : index
    %4 = vector.load %arg9[%c0_3, %c0_4, %c0_5] : memref<1x5x32xf32, #tpu.memory_space<vmem>>, vector<1x5x32xf32>
    %5 = vector.shape_cast %4 : vector<1x5x32xf32> to vector<5x32xf32>
    %c0_6 = arith.constant 0 : index
    %c0_7 = arith.constant 0 : index
    %c0_8 = arith.constant 0 : index
    %6 = vector.load %arg10[%c0_6, %c0_7, %c0_8] : memref<1x5x32xf32, #tpu.memory_space<vmem>>, vector<1x5x32xf32>
    %7 = vector.shape_cast %6 : vector<1x5x32xf32> to vector<5x32xf32>
    %c0_9 = arith.constant 0 : index
    %c0_10 = arith.constant 0 : index
    %c0_11 = arith.constant 0 : index
    %8 = vector.load %arg2[%c0_9, %c0_10, %c0_11] : memref<2x1x8xf32, #tpu.memory_space<vmem>>, vector<2x1x8xf32>
    %9 = vector.shape_cast %3 : vector<2x8x32xf32> to vector<16x32xf32>
    %10 = vector.extract_strided_slice %5 {offsets = [0, 0], sizes = [1, 32], strides = [1, 1]} : vector<5x32xf32> to vector<1x32xf32>
    %11 = vector.extract_strided_slice %7 {offsets = [0, 0], sizes = [1, 32], strides = [1, 1]} : vector<5x32xf32> to vector<1x32xf32>
    %cst = arith.constant dense<0.000000e+00> : vector<16xf32>
    %12 = vector.multi_reduction <add>, %9, %cst [1] : vector<16x32xf32> to vector<16xf32>
    %13 = vector.shape_cast %12 : vector<16xf32> to vector<16x1xf32>
    %cst_12 = arith.constant 3.200000e+01 : f32
    %14 = vector.broadcast %cst_12 : f32 to vector<16x1xf32>
    %15 = arith.divf %13, %14 : vector<16x1xf32>
    %16 = vector.broadcast %15 : vector<16x1xf32> to vector<16x32xf32>
    %17 = arith.subf %9, %16 : vector<16x32xf32>
    %18 = arith.mulf %17, %17 : vector<16x32xf32>
    %cst_13 = arith.constant dense<0.000000e+00> : vector<16xf32>
    %19 = vector.multi_reduction <add>, %18, %cst_13 [1] : vector<16x32xf32> to vector<16xf32>
    %20 = vector.shape_cast %19 : vector<16xf32> to vector<16x1xf32>
    %cst_14 = arith.constant 0.0322580636 : f32
    %21 = vector.broadcast %cst_14 : f32 to vector<16x1xf32>
    %22 = arith.mulf %20, %21 : vector<16x1xf32>
    %23 = math.sqrt %22 : vector<16x1xf32>
    %cst_15 = arith.constant 9.99999997E-7 : f32
    %24 = vector.broadcast %cst_15 : f32 to vector<16x1xf32>
    %25 = arith.addf %23, %24 : vector<16x1xf32>
    %26 = tpu.reciprocal %25 : vector<16x1xf32> -> vector<16x1xf32>
    %27 = vector.broadcast %10 : vector<1x32xf32> to vector<16x32xf32>
    %28 = arith.mulf %27, %17 : vector<16x32xf32>
    %29 = vector.broadcast %26 : vector<16x1xf32> to vector<16x32xf32>
    %30 = arith.mulf %28, %29 : vector<16x32xf32>
    %31 = vector.broadcast %11 : vector<1x32xf32> to vector<16x32xf32>
    %32 = arith.addf %30, %31 : vector<16x32xf32>
    %33 = arith.truncf %32 : vector<16x32xf32> to vector<16x32xbf16>
    %c0_16 = arith.constant 0 : index
    %c0_17 = arith.constant 0 : index
    %c0_18 = arith.constant 0 : index
    %34 = vector.load %arg11[%c0_16, %c0_17, %c0_18] : memref<1x32x96xbf16, #tpu.memory_space<vmem>>, vector<1x32x96xbf16>
    %35 = vector.shape_cast %34 : vector<1x32x96xbf16> to vector<32x96xbf16>
    %cst_19 = arith.constant dense<0.000000e+00> : vector<16x96xf32>
    %36 = tpu.matmul %33, %35, %cst_19 {dimension_numbers = #tpu.dot_dimension_numbers<[1], [0], [0], [1], [0, 0, 1, 1], [], []>} : vector<16x32xbf16>, vector<32x96xbf16>, vector<16x96xf32> -> vector<16x96xf32>
    %c0_20 = arith.constant 0 : index
    %c0_21 = arith.constant 0 : index
    %c0_22 = arith.constant 0 : index
    %37 = vector.load %arg12[%c0_20, %c0_21, %c0_22] : memref<1x1x96xf32, #tpu.memory_space<vmem>>, vector<1x1x96xf32>
    %38 = vector.shape_cast %37 : vector<1x1x96xf32> to vector<1x96xf32>
    %39 = vector.broadcast %38 : vector<1x96xf32> to vector<16x96xf32>
    %40 = arith.addf %36, %39 : vector<16x96xf32>
    %41 = vector.extract_strided_slice %40 {offsets = [0, 0], sizes = [16, 32], strides = [1, 1]} : vector<16x96xf32> to vector<16x32xf32>
    %42 = vector.shape_cast %41 : vector<16x32xf32> to vector<2x8x32xf32>
    %43 = vector.extract_strided_slice %40 {offsets = [0, 32], sizes = [16, 32], strides = [1, 1]} : vector<16x96xf32> to vector<16x32xf32>
    %44 = vector.shape_cast %43 : vector<16x32xf32> to vector<2x8x32xf32>
    %45 = vector.extract_strided_slice %40 {offsets = [0, 64], sizes = [16, 32], strides = [1, 1]} : vector<16x96xf32> to vector<16x32xf32>
    %46 = vector.shape_cast %45 : vector<16x32xf32> to vector<2x8x32xf32>
    %c0_23 = arith.constant 0 : index
    %c0_24 = arith.constant 0 : index
    %c0_25 = arith.constant 0 : index
    %47 = vector.load %arg13[%c0_23, %c0_24, %c0_25] : memref<1x32x32xbf16, #tpu.memory_space<vmem>>, vector<1x32x32xbf16>
    %48 = vector.shape_cast %47 : vector<1x32x32xbf16> to vector<32x32xbf16>
    %c0_26 = arith.constant 0 : index
    %c0_27 = arith.constant 0 : index
    %c0_28 = arith.constant 0 : index
    %49 = vector.load %arg14[%c0_26, %c0_27, %c0_28] : memref<1x1x32xf32, #tpu.memory_space<vmem>>, vector<1x1x32xf32>
    %50 = vector.shape_cast %49 : vector<1x1x32xf32> to vector<1x32xf32>
    %51 = vector.extract_strided_slice %42 {offsets = [0, 0, 0], sizes = [2, 8, 8], strides = [1, 1, 1]} : vector<2x8x32xf32> to vector<2x8x8xf32>
    %52 = vector.extract_strided_slice %44 {offsets = [0, 0, 0], sizes = [2, 8, 8], strides = [1, 1, 1]} : vector<2x8x32xf32> to vector<2x8x8xf32>
    %53 = vector.extract_strided_slice %46 {offsets = [0, 0, 0], sizes = [2, 8, 8], strides = [1, 1, 1]} : vector<2x8x32xf32> to vector<2x8x8xf32>
    %54 = arith.truncf %51 : vector<2x8x8xf32> to vector<2x8x8xbf16>
    %55 = arith.truncf %52 : vector<2x8x8xf32> to vector<2x8x8xbf16>
    "tpu.trace_start"() <{level = 10 : i32, message = "bqd,bkd->bqk"}> : () -> ()
    %cst_29 = arith.constant dense<0.000000e+00> : vector<2x8x8xf32>
    %56 = tpu.matmul %54, %55, %cst_29 {dimension_numbers = #tpu.dot_dimension_numbers<[2], [2], [1], [1], [0, 0, 0, 1, 1, 1], [0], [0]>} : vector<2x8x8xbf16>, vector<2x8x8xbf16>, vector<2x8x8xf32> -> vector<2x8x8xf32>
    "tpu.trace_stop"() : () -> ()
    %cst_30 = arith.constant 0.353553385 : f32
    %57 = vector.broadcast %cst_30 : f32 to vector<2x8x8xf32>
    %58 = arith.mulf %56, %57 : vector<2x8x8xf32>
    %59 = vector.broadcast %8 : vector<2x1x8xf32> to vector<2x8x8xf32>
    %60 = arith.addf %58, %59 : vector<2x8x8xf32>
    %cst_31 = arith.constant dense<0xFF800000> : vector<2x8xf32>
    %61 = vector.multi_reduction <maximumf>, %60, %cst_31 [2] : vector<2x8x8xf32> to vector<2x8xf32>
    %62 = vector.shape_cast %61 : vector<2x8xf32> to vector<2x8x1xf32>
    %63 = vector.broadcast %62 : vector<2x8x1xf32> to vector<2x8x8xf32>
    %64 = arith.subf %60, %63 : vector<2x8x8xf32>
    %65 = math.exp %64 : vector<2x8x8xf32>
    %cst_32 = arith.constant dense<0.000000e+00> : vector<2x8xf32>
    %66 = vector.multi_reduction <add>, %65, %cst_32 [2] : vector<2x8x8xf32> to vector<2x8xf32>
    %67 = vector.shape_cast %66 : vector<2x8xf32> to vector<2x8x1xf32>
    %68 = tpu.reciprocal %67 {approx = true} : vector<2x8x1xf32> -> vector<2x8x1xf32>
    %69 = vector.broadcast %68 : vector<2x8x1xf32> to vector<2x8x8xf32>
    %70 = arith.mulf %65, %69 : vector<2x8x8xf32>
    %71 = arith.truncf %70 : vector<2x8x8xf32> to vector<2x8x8xbf16>
    %72 = arith.truncf %53 : vector<2x8x8xf32> to vector<2x8x8xbf16>
    "tpu.trace_start"() <{level = 10 : i32, message = "bqk,bkd->bqd"}> : () -> ()
    %cst_33 = arith.constant dense<0.000000e+00> : vector<2x8x8xf32>
    %73 = tpu.matmul %71, %72, %cst_33 {dimension_numbers = #tpu.dot_dimension_numbers<[2], [1], [1], [2], [0, 0, 0, 1, 1, 2], [0], [0]>} : vector<2x8x8xbf16>, vector<2x8x8xbf16>, vector<2x8x8xf32> -> vector<2x8x8xf32>
    "tpu.trace_stop"() : () -> ()
    %74 = vector.extract_strided_slice %42 {offsets = [0, 0, 8], sizes = [2, 8, 8], strides = [1, 1, 1]} : vector<2x8x32xf32> to vector<2x8x8xf32>
    %75 = vector.extract_strided_slice %44 {offsets = [0, 0, 8], sizes = [2, 8, 8], strides = [1, 1, 1]} : vector<2x8x32xf32> to vector<2x8x8xf32>
    %76 = vector.extract_strided_slice %46 {offsets = [0, 0, 8], sizes = [2, 8, 8], strides = [1, 1, 1]} : vector<2x8x32xf32> to vector<2x8x8xf32>
    %77 = arith.truncf %74 : vector<2x8x8xf32> to vector<2x8x8xbf16>
    %78 = arith.truncf %75 : vector<2x8x8xf32> to vector<2x8x8xbf16>
    "tpu.trace_start"() <{level = 10 : i32, message = "bqd,bkd->bqk"}> : () -> ()
    %cst_34 = arith.constant dense<0.000000e+00> : vector<2x8x8xf32>
    %79 = tpu.matmul %77, %78, %cst_34 {dimension_numbers = #tpu.dot_dimension_numbers<[2], [2], [1], [1], [0, 0, 0, 1, 1, 1], [0], [0]>} : vector<2x8x8xbf16>, vector<2x8x8xbf16>, vector<2x8x8xf32> -> vector<2x8x8xf32>
    "tpu.trace_stop"() : () -> ()
    %cst_35 = arith.constant 0.353553385 : f32
    %80 = vector.broadcast %cst_35 : f32 to vector<2x8x8xf32>
    %81 = arith.mulf %79, %80 : vector<2x8x8xf32>
    %82 = vector.broadcast %8 : vector<2x1x8xf32> to vector<2x8x8xf32>
    %83 = arith.addf %81, %82 : vector<2x8x8xf32>
    %cst_36 = arith.constant dense<0xFF800000> : vector<2x8xf32>
    %84 = vector.multi_reduction <maximumf>, %83, %cst_36 [2] : vector<2x8x8xf32> to vector<2x8xf32>
    %85 = vector.shape_cast %84 : vector<2x8xf32> to vector<2x8x1xf32>
    %86 = vector.broadcast %85 : vector<2x8x1xf32> to vector<2x8x8xf32>
    %87 = arith.subf %83, %86 : vector<2x8x8xf32>
    %88 = math.exp %87 : vector<2x8x8xf32>
    %cst_37 = arith.constant dense<0.000000e+00> : vector<2x8xf32>
    %89 = vector.multi_reduction <add>, %88, %cst_37 [2] : vector<2x8x8xf32> to vector<2x8xf32>
    %90 = vector.shape_cast %89 : vector<2x8xf32> to vector<2x8x1xf32>
    %91 = tpu.reciprocal %90 {approx = true} : vector<2x8x1xf32> -> vector<2x8x1xf32>
    %92 = vector.broadcast %91 : vector<2x8x1xf32> to vector<2x8x8xf32>
    %93 = arith.mulf %88, %92 : vector<2x8x8xf32>
    %94 = arith.truncf %93 : vector<2x8x8xf32> to vector<2x8x8xbf16>
    %95 = arith.truncf %76 : vector<2x8x8xf32> to vector<2x8x8xbf16>
    "tpu.trace_start"() <{level = 10 : i32, message = "bqk,bkd->bqd"}> : () -> ()
    %cst_38 = arith.constant dense<0.000000e+00> : vector<2x8x8xf32>
    %96 = tpu.matmul %94, %95, %cst_38 {dimension_numbers = #tpu.dot_dimension_numbers<[2], [1], [1], [2], [0, 0, 0, 1, 1, 2], [0], [0]>} : vector<2x8x8xbf16>, vector<2x8x8xbf16>, vector<2x8x8xf32> -> vector<2x8x8xf32>
    "tpu.trace_stop"() : () -> ()
    %97 = vector.extract_strided_slice %42 {offsets = [0, 0, 16], sizes = [2, 8, 8], strides = [1, 1, 1]} : vector<2x8x32xf32> to vector<2x8x8xf32>
    %98 = vector.extract_strided_slice %44 {offsets = [0, 0, 16], sizes = [2, 8, 8], strides = [1, 1, 1]} : vector<2x8x32xf32> to vector<2x8x8xf32>
    %99 = vector.extract_strided_slice %46 {offsets = [0, 0, 16], sizes = [2, 8, 8], strides = [1, 1, 1]} : vector<2x8x32xf32> to vector<2x8x8xf32>
    %100 = arith.truncf %97 : vector<2x8x8xf32> to vector<2x8x8xbf16>
    %101 = arith.truncf %98 : vector<2x8x8xf32> to vector<2x8x8xbf16>
    "tpu.trace_start"() <{level = 10 : i32, message = "bqd,bkd->bqk"}> : () -> ()
    %cst_39 = arith.constant dense<0.000000e+00> : vector<2x8x8xf32>
    %102 = tpu.matmul %100, %101, %cst_39 {dimension_numbers = #tpu.dot_dimension_numbers<[2], [2], [1], [1], [0, 0, 0, 1, 1, 1], [0], [0]>} : vector<2x8x8xbf16>, vector<2x8x8xbf16>, vector<2x8x8xf32> -> vector<2x8x8xf32>
    "tpu.trace_stop"() : () -> ()
    %cst_40 = arith.constant 0.353553385 : f32
    %103 = vector.broadcast %cst_40 : f32 to vector<2x8x8xf32>
    %104 = arith.mulf %102, %103 : vector<2x8x8xf32>
    %105 = vector.broadcast %8 : vector<2x1x8xf32> to vector<2x8x8xf32>
    %106 = arith.addf %104, %105 : vector<2x8x8xf32>
    %cst_41 = arith.constant dense<0xFF800000> : vector<2x8xf32>
    %107 = vector.multi_reduction <maximumf>, %106, %cst_41 [2] : vector<2x8x8xf32> to vector<2x8xf32>
    %108 = vector.shape_cast %107 : vector<2x8xf32> to vector<2x8x1xf32>
    %109 = vector.broadcast %108 : vector<2x8x1xf32> to vector<2x8x8xf32>
    %110 = arith.subf %106, %109 : vector<2x8x8xf32>
    %111 = math.exp %110 : vector<2x8x8xf32>
    %cst_42 = arith.constant dense<0.000000e+00> : vector<2x8xf32>
    %112 = vector.multi_reduction <add>, %111, %cst_42 [2] : vector<2x8x8xf32> to vector<2x8xf32>
    %113 = vector.shape_cast %112 : vector<2x8xf32> to vector<2x8x1xf32>
    %114 = tpu.reciprocal %113 {approx = true} : vector<2x8x1xf32> -> vector<2x8x1xf32>
    %115 = vector.broadcast %114 : vector<2x8x1xf32> to vector<2x8x8xf32>
    %116 = arith.mulf %111, %115 : vector<2x8x8xf32>
    %117 = arith.truncf %116 : vector<2x8x8xf32> to vector<2x8x8xbf16>
    %118 = arith.truncf %99 : vector<2x8x8xf32> to vector<2x8x8xbf16>
    "tpu.trace_start"() <{level = 10 : i32, message = "bqk,bkd->bqd"}> : () -> ()
    %cst_43 = arith.constant dense<0.000000e+00> : vector<2x8x8xf32>
    %119 = tpu.matmul %117, %118, %cst_43 {dimension_numbers = #tpu.dot_dimension_numbers<[2], [1], [1], [2], [0, 0, 0, 1, 1, 2], [0], [0]>} : vector<2x8x8xbf16>, vector<2x8x8xbf16>, vector<2x8x8xf32> -> vector<2x8x8xf32>
    "tpu.trace_stop"() : () -> ()
    %120 = vector.extract_strided_slice %42 {offsets = [0, 0, 24], sizes = [2, 8, 8], strides = [1, 1, 1]} : vector<2x8x32xf32> to vector<2x8x8xf32>
    %121 = vector.extract_strided_slice %44 {offsets = [0, 0, 24], sizes = [2, 8, 8], strides = [1, 1, 1]} : vector<2x8x32xf32> to vector<2x8x8xf32>
    %122 = vector.extract_strided_slice %46 {offsets = [0, 0, 24], sizes = [2, 8, 8], strides = [1, 1, 1]} : vector<2x8x32xf32> to vector<2x8x8xf32>
    %123 = arith.truncf %120 : vector<2x8x8xf32> to vector<2x8x8xbf16>
    %124 = arith.truncf %121 : vector<2x8x8xf32> to vector<2x8x8xbf16>
    "tpu.trace_start"() <{level = 10 : i32, message = "bqd,bkd->bqk"}> : () -> ()
    %cst_44 = arith.constant dense<0.000000e+00> : vector<2x8x8xf32>
    %125 = tpu.matmul %123, %124, %cst_44 {dimension_numbers = #tpu.dot_dimension_numbers<[2], [2], [1], [1], [0, 0, 0, 1, 1, 1], [0], [0]>} : vector<2x8x8xbf16>, vector<2x8x8xbf16>, vector<2x8x8xf32> -> vector<2x8x8xf32>
    "tpu.trace_stop"() : () -> ()
    %cst_45 = arith.constant 0.353553385 : f32
    %126 = vector.broadcast %cst_45 : f32 to vector<2x8x8xf32>
    %127 = arith.mulf %125, %126 : vector<2x8x8xf32>
    %128 = vector.broadcast %8 : vector<2x1x8xf32> to vector<2x8x8xf32>
    %129 = arith.addf %127, %128 : vector<2x8x8xf32>
    %cst_46 = arith.constant dense<0xFF800000> : vector<2x8xf32>
    %130 = vector.multi_reduction <maximumf>, %129, %cst_46 [2] : vector<2x8x8xf32> to vector<2x8xf32>
    %131 = vector.shape_cast %130 : vector<2x8xf32> to vector<2x8x1xf32>
    %132 = vector.broadcast %131 : vector<2x8x1xf32> to vector<2x8x8xf32>
    %133 = arith.subf %129, %132 : vector<2x8x8xf32>
    %134 = math.exp %133 : vector<2x8x8xf32>
    %cst_47 = arith.constant dense<0.000000e+00> : vector<2x8xf32>
    %135 = vector.multi_reduction <add>, %134, %cst_47 [2] : vector<2x8x8xf32> to vector<2x8xf32>
    %136 = vector.shape_cast %135 : vector<2x8xf32> to vector<2x8x1xf32>
    %137 = tpu.reciprocal %136 {approx = true} : vector<2x8x1xf32> -> vector<2x8x1xf32>
    %138 = vector.broadcast %137 : vector<2x8x1xf32> to vector<2x8x8xf32>
    %139 = arith.mulf %134, %138 : vector<2x8x8xf32>
    %140 = arith.truncf %139 : vector<2x8x8xf32> to vector<2x8x8xbf16>
    %141 = arith.truncf %122 : vector<2x8x8xf32> to vector<2x8x8xbf16>
    "tpu.trace_start"() <{level = 10 : i32, message = "bqk,bkd->bqd"}> : () -> ()
    %cst_48 = arith.constant dense<0.000000e+00> : vector<2x8x8xf32>
    %142 = tpu.matmul %140, %141, %cst_48 {dimension_numbers = #tpu.dot_dimension_numbers<[2], [1], [1], [2], [0, 0, 0, 1, 1, 2], [0], [0]>} : vector<2x8x8xbf16>, vector<2x8x8xbf16>, vector<2x8x8xf32> -> vector<2x8x8xf32>
    "tpu.trace_stop"() : () -> ()
    %143 = tpu.concatenate %73, %96, %119, %142 in 2 : vector<2x8x8xf32>, vector<2x8x8xf32>, vector<2x8x8xf32>, vector<2x8x8xf32> -> vector<2x8x32xf32>
    %144 = vector.shape_cast %143 : vector<2x8x32xf32> to vector<16x32xf32>
    %145 = arith.truncf %144 : vector<16x32xf32> to vector<16x32xbf16>
    %cst_49 = arith.constant dense<0.000000e+00> : vector<16x32xf32>
    %146 = tpu.matmul %145, %48, %cst_49 {dimension_numbers = #tpu.dot_dimension_numbers<[1], [0], [0], [1], [0, 0, 1, 1], [], []>} : vector<16x32xbf16>, vector<32x32xbf16>, vector<16x32xf32> -> vector<16x32xf32>
    %147 = vector.broadcast %50 : vector<1x32xf32> to vector<16x32xf32>
    %148 = arith.addf %146, %147 : vector<16x32xf32>
    %149 = vector.shape_cast %148 : vector<16x32xf32> to vector<2x8x32xf32>
    %150 = arith.addf %3, %149 : vector<2x8x32xf32>
    %c0_50 = arith.constant 0 : index
    %c0_51 = arith.constant 0 : index
    %c0_52 = arith.constant 0 : index
    %151 = vector.load %arg3[%c0_50, %c0_51, %c0_52] : memref<2x6x32xf32, #tpu.memory_space<vmem>>, vector<2x6x32xf32>
    %c0_53 = arith.constant 0 : index
    %c0_54 = arith.constant 0 : index
    %c0_55 = arith.constant 0 : index
    %152 = vector.load %arg4[%c0_53, %c0_54, %c0_55] : memref<2x1x6xf32, #tpu.memory_space<vmem>>, vector<2x1x6xf32>
    %153 = vector.shape_cast %150 : vector<2x8x32xf32> to vector<16x32xf32>
    %154 = vector.extract_strided_slice %5 {offsets = [1, 0], sizes = [1, 32], strides = [1, 1]} : vector<5x32xf32> to vector<1x32xf32>
    %155 = vector.extract_strided_slice %7 {offsets = [1, 0], sizes = [1, 32], strides = [1, 1]} : vector<5x32xf32> to vector<1x32xf32>
    %cst_56 = arith.constant dense<0.000000e+00> : vector<16xf32>
    %156 = vector.multi_reduction <add>, %153, %cst_56 [1] : vector<16x32xf32> to vector<16xf32>
    %157 = vector.shape_cast %156 : vector<16xf32> to vector<16x1xf32>
    %cst_57 = arith.constant 3.200000e+01 : f32
    %158 = vector.broadcast %cst_57 : f32 to vector<16x1xf32>
    %159 = arith.divf %157, %158 : vector<16x1xf32>
    %160 = vector.broadcast %159 : vector<16x1xf32> to vector<16x32xf32>
    %161 = arith.subf %153, %160 : vector<16x32xf32>
    %162 = arith.mulf %161, %161 : vector<16x32xf32>
    %cst_58 = arith.constant dense<0.000000e+00> : vector<16xf32>
    %163 = vector.multi_reduction <add>, %162, %cst_58 [1] : vector<16x32xf32> to vector<16xf32>
    %164 = vector.shape_cast %163 : vector<16xf32> to vector<16x1xf32>
    %cst_59 = arith.constant 0.0322580636 : f32
    %165 = vector.broadcast %cst_59 : f32 to vector<16x1xf32>
    %166 = arith.mulf %164, %165 : vector<16x1xf32>
    %167 = math.sqrt %166 : vector<16x1xf32>
    %cst_60 = arith.constant 9.99999997E-7 : f32
    %168 = vector.broadcast %cst_60 : f32 to vector<16x1xf32>
    %169 = arith.addf %167, %168 : vector<16x1xf32>
    %170 = tpu.reciprocal %169 : vector<16x1xf32> -> vector<16x1xf32>
    %171 = vector.broadcast %154 : vector<1x32xf32> to vector<16x32xf32>
    %172 = arith.mulf %171, %161 : vector<16x32xf32>
    %173 = vector.broadcast %170 : vector<16x1xf32> to vector<16x32xf32>
    %174 = arith.mulf %172, %173 : vector<16x32xf32>
    %175 = vector.broadcast %155 : vector<1x32xf32> to vector<16x32xf32>
    %176 = arith.addf %174, %175 : vector<16x32xf32>
    %177 = arith.truncf %176 : vector<16x32xf32> to vector<16x32xbf16>
    %c0_61 = arith.constant 0 : index
    %c0_62 = arith.constant 0 : index
    %c0_63 = arith.constant 0 : index
    %c0_64 = arith.constant 0 : index
    %178 = vector.load %arg15[%c0_61, %c0_62, %c0_63, %c0_64] : memref<1x3x32x32xbf16, #tpu.memory_space<vmem>>, vector<1x1x32x32xbf16>
    %179 = vector.shape_cast %178 : vector<1x1x32x32xbf16> to vector<32x32xbf16>
    %cst_65 = arith.constant dense<0.000000e+00> : vector<16x32xf32>
    %180 = tpu.matmul %177, %179, %cst_65 {dimension_numbers = #tpu.dot_dimension_numbers<[1], [0], [0], [1], [0, 0, 1, 1], [], []>} : vector<16x32xbf16>, vector<32x32xbf16>, vector<16x32xf32> -> vector<16x32xf32>
    %c0_66 = arith.constant 0 : index
    %c0_67 = arith.constant 0 : index
    %c0_68 = arith.constant 0 : index
    %c0_69 = arith.constant 0 : index
    %181 = vector.load %arg16[%c0_66, %c0_67, %c0_68, %c0_69] : memref<1x3x1x32xf32, #tpu.memory_space<vmem>>, vector<1x1x1x32xf32>
    %182 = vector.shape_cast %181 : vector<1x1x1x32xf32> to vector<1x32xf32>
    %183 = vector.broadcast %182 : vector<1x32xf32> to vector<16x32xf32>
    %184 = arith.addf %180, %183 : vector<16x32xf32>
    %185 = vector.shape_cast %184 : vector<16x32xf32> to vector<2x8x32xf32>
    %186 = vector.shape_cast %151 : vector<2x6x32xf32> to vector<12x32xf32>
    %187 = arith.truncf %186 : vector<12x32xf32> to vector<12x32xbf16>
    %c0_70 = arith.constant 0 : index
    %c0_71 = arith.constant 0 : index
    %c0_72 = arith.constant 0 : index
    %c0_73 = arith.constant 0 : index
    %188 = vector.load %arg17[%c0_70, %c0_71, %c0_72, %c0_73] : memref<1x3x32x64xbf16, #tpu.memory_space<vmem>>, vector<1x1x32x64xbf16>
    %189 = vector.shape_cast %188 : vector<1x1x32x64xbf16> to vector<32x64xbf16>
    %cst_74 = arith.constant dense<0.000000e+00> : vector<12x64xf32>
    %190 = tpu.matmul %187, %189, %cst_74 {dimension_numbers = #tpu.dot_dimension_numbers<[1], [0], [0], [1], [0, 0, 1, 1], [], []>} : vector<12x32xbf16>, vector<32x64xbf16>, vector<12x64xf32> -> vector<12x64xf32>
    %c0_75 = arith.constant 0 : index
    %c0_76 = arith.constant 0 : index
    %c0_77 = arith.constant 0 : index
    %c0_78 = arith.constant 0 : index
    %191 = vector.load %arg18[%c0_75, %c0_76, %c0_77, %c0_78] : memref<1x3x1x64xf32, #tpu.memory_space<vmem>>, vector<1x1x1x64xf32>
    %192 = vector.shape_cast %191 : vector<1x1x1x64xf32> to vector<1x64xf32>
    %193 = vector.broadcast %192 : vector<1x64xf32> to vector<12x64xf32>
    %194 = arith.addf %190, %193 : vector<12x64xf32>
    %195 = vector.extract_strided_slice %194 {offsets = [0, 0], sizes = [12, 32], strides = [1, 1]} : vector<12x64xf32> to vector<12x32xf32>
    %196 = vector.shape_cast %195 : vector<12x32xf32> to vector<2x6x32xf32>
    %197 = vector.extract_strided_slice %194 {offsets = [0, 32], sizes = [12, 32], strides = [1, 1]} : vector<12x64xf32> to vector<12x32xf32>
    %198 = vector.shape_cast %197 : vector<12x32xf32> to vector<2x6x32xf32>
    %c0_79 = arith.constant 0 : index
    %c0_80 = arith.constant 0 : index
    %c0_81 = arith.constant 0 : index
    %c0_82 = arith.constant 0 : index
    %199 = vector.load %arg19[%c0_79, %c0_80, %c0_81, %c0_82] : memref<1x3x32x32xbf16, #tpu.memory_space<vmem>>, vector<1x1x32x32xbf16>
    %200 = vector.shape_cast %199 : vector<1x1x32x32xbf16> to vector<32x32xbf16>
    %c0_83 = arith.constant 0 : index
    %c0_84 = arith.constant 0 : index
    %c0_85 = arith.constant 0 : index
    %c0_86 = arith.constant 0 : index
    %201 = vector.load %arg20[%c0_83, %c0_84, %c0_85, %c0_86] : memref<1x3x1x32xf32, #tpu.memory_space<vmem>>, vector<1x1x1x32xf32>
    %202 = vector.shape_cast %201 : vector<1x1x1x32xf32> to vector<1x32xf32>
    %203 = vector.extract_strided_slice %185 {offsets = [0, 0, 0], sizes = [2, 8, 8], strides = [1, 1, 1]} : vector<2x8x32xf32> to vector<2x8x8xf32>
    %204 = vector.extract_strided_slice %196 {offsets = [0, 0, 0], sizes = [2, 6, 8], strides = [1, 1, 1]} : vector<2x6x32xf32> to vector<2x6x8xf32>
    %205 = vector.extract_strided_slice %198 {offsets = [0, 0, 0], sizes = [2, 6, 8], strides = [1, 1, 1]} : vector<2x6x32xf32> to vector<2x6x8xf32>
    %206 = arith.truncf %203 : vector<2x8x8xf32> to vector<2x8x8xbf16>
    %207 = arith.truncf %204 : vector<2x6x8xf32> to vector<2x6x8xbf16>
    "tpu.trace_start"() <{level = 10 : i32, message = "bqd,bkd->bqk"}> : () -> ()
    %cst_87 = arith.constant dense<0.000000e+00> : vector<2x8x6xf32>
    %208 = tpu.matmul %206, %207, %cst_87 {dimension_numbers = #tpu.dot_dimension_numbers<[2], [2], [1], [1], [0, 0, 0, 1, 1, 1], [0], [0]>} : vector<2x8x8xbf16>, vector<2x6x8xbf16>, vector<2x8x6xf32> -> vector<2x8x6xf32>
    "tpu.trace_stop"() : () -> ()
    %cst_88 = arith.constant 0.353553385 : f32
    %209 = vector.broadcast %cst_88 : f32 to vector<2x8x6xf32>
    %210 = arith.mulf %208, %209 : vector<2x8x6xf32>
    %211 = vector.broadcast %152 : vector<2x1x6xf32> to vector<2x8x6xf32>
    %212 = arith.addf %210, %211 : vector<2x8x6xf32>
    %cst_89 = arith.constant dense<0xFF800000> : vector<2x8xf32>
    %213 = vector.multi_reduction <maximumf>, %212, %cst_89 [2] : vector<2x8x6xf32> to vector<2x8xf32>
    %214 = vector.shape_cast %213 : vector<2x8xf32> to vector<2x8x1xf32>
    %215 = vector.broadcast %214 : vector<2x8x1xf32> to vector<2x8x6xf32>
    %216 = arith.subf %212, %215 : vector<2x8x6xf32>
    %217 = math.exp %216 : vector<2x8x6xf32>
    %cst_90 = arith.constant dense<0.000000e+00> : vector<2x8xf32>
    %218 = vector.multi_reduction <add>, %217, %cst_90 [2] : vector<2x8x6xf32> to vector<2x8xf32>
    %219 = vector.shape_cast %218 : vector<2x8xf32> to vector<2x8x1xf32>
    %220 = tpu.reciprocal %219 {approx = true} : vector<2x8x1xf32> -> vector<2x8x1xf32>
    %221 = vector.broadcast %220 : vector<2x8x1xf32> to vector<2x8x6xf32>
    %222 = arith.mulf %217, %221 : vector<2x8x6xf32>
    %223 = arith.truncf %222 : vector<2x8x6xf32> to vector<2x8x6xbf16>
    %224 = arith.truncf %205 : vector<2x6x8xf32> to vector<2x6x8xbf16>
    "tpu.trace_start"() <{level = 10 : i32, message = "bqk,bkd->bqd"}> : () -> ()
    %cst_91 = arith.constant dense<0.000000e+00> : vector<2x8x8xf32>
    %225 = tpu.matmul %223, %224, %cst_91 {dimension_numbers = #tpu.dot_dimension_numbers<[2], [1], [1], [2], [0, 0, 0, 1, 1, 2], [0], [0]>} : vector<2x8x6xbf16>, vector<2x6x8xbf16>, vector<2x8x8xf32> -> vector<2x8x8xf32>
    "tpu.trace_stop"() : () -> ()
    %226 = vector.extract_strided_slice %185 {offsets = [0, 0, 8], sizes = [2, 8, 8], strides = [1, 1, 1]} : vector<2x8x32xf32> to vector<2x8x8xf32>
    %227 = vector.extract_strided_slice %196 {offsets = [0, 0, 8], sizes = [2, 6, 8], strides = [1, 1, 1]} : vector<2x6x32xf32> to vector<2x6x8xf32>
    %228 = vector.extract_strided_slice %198 {offsets = [0, 0, 8], sizes = [2, 6, 8], strides = [1, 1, 1]} : vector<2x6x32xf32> to vector<2x6x8xf32>
    %229 = arith.truncf %226 : vector<2x8x8xf32> to vector<2x8x8xbf16>
    %230 = arith.truncf %227 : vector<2x6x8xf32> to vector<2x6x8xbf16>
    "tpu.trace_start"() <{level = 10 : i32, message = "bqd,bkd->bqk"}> : () -> ()
    %cst_92 = arith.constant dense<0.000000e+00> : vector<2x8x6xf32>
    %231 = tpu.matmul %229, %230, %cst_92 {dimension_numbers = #tpu.dot_dimension_numbers<[2], [2], [1], [1], [0, 0, 0, 1, 1, 1], [0], [0]>} : vector<2x8x8xbf16>, vector<2x6x8xbf16>, vector<2x8x6xf32> -> vector<2x8x6xf32>
    "tpu.trace_stop"() : () -> ()
    %cst_93 = arith.constant 0.353553385 : f32
    %232 = vector.broadcast %cst_93 : f32 to vector<2x8x6xf32>
    %233 = arith.mulf %231, %232 : vector<2x8x6xf32>
    %234 = vector.broadcast %152 : vector<2x1x6xf32> to vector<2x8x6xf32>
    %235 = arith.addf %233, %234 : vector<2x8x6xf32>
    %cst_94 = arith.constant dense<0xFF800000> : vector<2x8xf32>
    %236 = vector.multi_reduction <maximumf>, %235, %cst_94 [2] : vector<2x8x6xf32> to vector<2x8xf32>
    %237 = vector.shape_cast %236 : vector<2x8xf32> to vector<2x8x1xf32>
    %238 = vector.broadcast %237 : vector<2x8x1xf32> to vector<2x8x6xf32>
    %239 = arith.subf %235, %238 : vector<2x8x6xf32>
    %240 = math.exp %239 : vector<2x8x6xf32>
    %cst_95 = arith.constant dense<0.000000e+00> : vector<2x8xf32>
    %241 = vector.multi_reduction <add>, %240, %cst_95 [2] : vector<2x8x6xf32> to vector<2x8xf32>
    %242 = vector.shape_cast %241 : vector<2x8xf32> to vector<2x8x1xf32>
    %243 = tpu.reciprocal %242 {approx = true} : vector<2x8x1xf32> -> vector<2x8x1xf32>
    %244 = vector.broadcast %243 : vector<2x8x1xf32> to vector<2x8x6xf32>
    %245 = arith.mulf %240, %244 : vector<2x8x6xf32>
    %246 = arith.truncf %245 : vector<2x8x6xf32> to vector<2x8x6xbf16>
    %247 = arith.truncf %228 : vector<2x6x8xf32> to vector<2x6x8xbf16>
    "tpu.trace_start"() <{level = 10 : i32, message = "bqk,bkd->bqd"}> : () -> ()
    %cst_96 = arith.constant dense<0.000000e+00> : vector<2x8x8xf32>
    %248 = tpu.matmul %246, %247, %cst_96 {dimension_numbers = #tpu.dot_dimension_numbers<[2], [1], [1], [2], [0, 0, 0, 1, 1, 2], [0], [0]>} : vector<2x8x6xbf16>, vector<2x6x8xbf16>, vector<2x8x8xf32> -> vector<2x8x8xf32>
    "tpu.trace_stop"() : () -> ()
    %249 = vector.extract_strided_slice %185 {offsets = [0, 0, 16], sizes = [2, 8, 8], strides = [1, 1, 1]} : vector<2x8x32xf32> to vector<2x8x8xf32>
    %250 = vector.extract_strided_slice %196 {offsets = [0, 0, 16], sizes = [2, 6, 8], strides = [1, 1, 1]} : vector<2x6x32xf32> to vector<2x6x8xf32>
    %251 = vector.extract_strided_slice %198 {offsets = [0, 0, 16], sizes = [2, 6, 8], strides = [1, 1, 1]} : vector<2x6x32xf32> to vector<2x6x8xf32>
    %252 = arith.truncf %249 : vector<2x8x8xf32> to vector<2x8x8xbf16>
    %253 = arith.truncf %250 : vector<2x6x8xf32> to vector<2x6x8xbf16>
    "tpu.trace_start"() <{level = 10 : i32, message = "bqd,bkd->bqk"}> : () -> ()
    %cst_97 = arith.constant dense<0.000000e+00> : vector<2x8x6xf32>
    %254 = tpu.matmul %252, %253, %cst_97 {dimension_numbers = #tpu.dot_dimension_numbers<[2], [2], [1], [1], [0, 0, 0, 1, 1, 1], [0], [0]>} : vector<2x8x8xbf16>, vector<2x6x8xbf16>, vector<2x8x6xf32> -> vector<2x8x6xf32>
    "tpu.trace_stop"() : () -> ()
    %cst_98 = arith.constant 0.353553385 : f32
    %255 = vector.broadcast %cst_98 : f32 to vector<2x8x6xf32>
    %256 = arith.mulf %254, %255 : vector<2x8x6xf32>
    %257 = vector.broadcast %152 : vector<2x1x6xf32> to vector<2x8x6xf32>
    %258 = arith.addf %256, %257 : vector<2x8x6xf32>
    %cst_99 = arith.constant dense<0xFF800000> : vector<2x8xf32>
    %259 = vector.multi_reduction <maximumf>, %258, %cst_99 [2] : vector<2x8x6xf32> to vector<2x8xf32>
    %260 = vector.shape_cast %259 : vector<2x8xf32> to vector<2x8x1xf32>
    %261 = vector.broadcast %260 : vector<2x8x1xf32> to vector<2x8x6xf32>
    %262 = arith.subf %258, %261 : vector<2x8x6xf32>
    %263 = math.exp %262 : vector<2x8x6xf32>
    %cst_100 = arith.constant dense<0.000000e+00> : vector<2x8xf32>
    %264 = vector.multi_reduction <add>, %263, %cst_100 [2] : vector<2x8x6xf32> to vector<2x8xf32>
    %265 = vector.shape_cast %264 : vector<2x8xf32> to vector<2x8x1xf32>
    %266 = tpu.reciprocal %265 {approx = true} : vector<2x8x1xf32> -> vector<2x8x1xf32>
    %267 = vector.broadcast %266 : vector<2x8x1xf32> to vector<2x8x6xf32>
    %268 = arith.mulf %263, %267 : vector<2x8x6xf32>
    %269 = arith.truncf %268 : vector<2x8x6xf32> to vector<2x8x6xbf16>
    %270 = arith.truncf %251 : vector<2x6x8xf32> to vector<2x6x8xbf16>
    "tpu.trace_start"() <{level = 10 : i32, message = "bqk,bkd->bqd"}> : () -> ()
    %cst_101 = arith.constant dense<0.000000e+00> : vector<2x8x8xf32>
    %271 = tpu.matmul %269, %270, %cst_101 {dimension_numbers = #tpu.dot_dimension_numbers<[2], [1], [1], [2], [0, 0, 0, 1, 1, 2], [0], [0]>} : vector<2x8x6xbf16>, vector<2x6x8xbf16>, vector<2x8x8xf32> -> vector<2x8x8xf32>
    "tpu.trace_stop"() : () -> ()
    %272 = vector.extract_strided_slice %185 {offsets = [0, 0, 24], sizes = [2, 8, 8], strides = [1, 1, 1]} : vector<2x8x32xf32> to vector<2x8x8xf32>
    %273 = vector.extract_strided_slice %196 {offsets = [0, 0, 24], sizes = [2, 6, 8], strides = [1, 1, 1]} : vector<2x6x32xf32> to vector<2x6x8xf32>
    %274 = vector.extract_strided_slice %198 {offsets = [0, 0, 24], sizes = [2, 6, 8], strides = [1, 1, 1]} : vector<2x6x32xf32> to vector<2x6x8xf32>
    %275 = arith.truncf %272 : vector<2x8x8xf32> to vector<2x8x8xbf16>
    %276 = arith.truncf %273 : vector<2x6x8xf32> to vector<2x6x8xbf16>
    "tpu.trace_start"() <{level = 10 : i32, message = "bqd,bkd->bqk"}> : () -> ()
    %cst_102 = arith.constant dense<0.000000e+00> : vector<2x8x6xf32>
    %277 = tpu.matmul %275, %276, %cst_102 {dimension_numbers = #tpu.dot_dimension_numbers<[2], [2], [1], [1], [0, 0, 0, 1, 1, 1], [0], [0]>} : vector<2x8x8xbf16>, vector<2x6x8xbf16>, vector<2x8x6xf32> -> vector<2x8x6xf32>
    "tpu.trace_stop"() : () -> ()
    %cst_103 = arith.constant 0.353553385 : f32
    %278 = vector.broadcast %cst_103 : f32 to vector<2x8x6xf32>
    %279 = arith.mulf %277, %278 : vector<2x8x6xf32>
    %280 = vector.broadcast %152 : vector<2x1x6xf32> to vector<2x8x6xf32>
    %281 = arith.addf %279, %280 : vector<2x8x6xf32>
    %cst_104 = arith.constant dense<0xFF800000> : vector<2x8xf32>
    %282 = vector.multi_reduction <maximumf>, %281, %cst_104 [2] : vector<2x8x6xf32> to vector<2x8xf32>
    %283 = vector.shape_cast %282 : vector<2x8xf32> to vector<2x8x1xf32>
    %284 = vector.broadcast %283 : vector<2x8x1xf32> to vector<2x8x6xf32>
    %285 = arith.subf %281, %284 : vector<2x8x6xf32>
    %286 = math.exp %285 : vector<2x8x6xf32>
    %cst_105 = arith.constant dense<0.000000e+00> : vector<2x8xf32>
    %287 = vector.multi_reduction <add>, %286, %cst_105 [2] : vector<2x8x6xf32> to vector<2x8xf32>
    %288 = vector.shape_cast %287 : vector<2x8xf32> to vector<2x8x1xf32>
    %289 = tpu.reciprocal %288 {approx = true} : vector<2x8x1xf32> -> vector<2x8x1xf32>
    %290 = vector.broadcast %289 : vector<2x8x1xf32> to vector<2x8x6xf32>
    %291 = arith.mulf %286, %290 : vector<2x8x6xf32>
    %292 = arith.truncf %291 : vector<2x8x6xf32> to vector<2x8x6xbf16>
    %293 = arith.truncf %274 : vector<2x6x8xf32> to vector<2x6x8xbf16>
    "tpu.trace_start"() <{level = 10 : i32, message = "bqk,bkd->bqd"}> : () -> ()
    %cst_106 = arith.constant dense<0.000000e+00> : vector<2x8x8xf32>
    %294 = tpu.matmul %292, %293, %cst_106 {dimension_numbers = #tpu.dot_dimension_numbers<[2], [1], [1], [2], [0, 0, 0, 1, 1, 2], [0], [0]>} : vector<2x8x6xbf16>, vector<2x6x8xbf16>, vector<2x8x8xf32> -> vector<2x8x8xf32>
    "tpu.trace_stop"() : () -> ()
    %295 = tpu.concatenate %225, %248, %271, %294 in 2 : vector<2x8x8xf32>, vector<2x8x8xf32>, vector<2x8x8xf32>, vector<2x8x8xf32> -> vector<2x8x32xf32>
    %296 = vector.shape_cast %295 : vector<2x8x32xf32> to vector<16x32xf32>
    %297 = arith.truncf %296 : vector<16x32xf32> to vector<16x32xbf16>
    %cst_107 = arith.constant dense<0.000000e+00> : vector<16x32xf32>
    %298 = tpu.matmul %297, %200, %cst_107 {dimension_numbers = #tpu.dot_dimension_numbers<[1], [0], [0], [1], [0, 0, 1, 1], [], []>} : vector<16x32xbf16>, vector<32x32xbf16>, vector<16x32xf32> -> vector<16x32xf32>
    %299 = vector.broadcast %202 : vector<1x32xf32> to vector<16x32xf32>
    %300 = arith.addf %298, %299 : vector<16x32xf32>
    %301 = vector.shape_cast %300 : vector<16x32xf32> to vector<2x8x32xf32>
    %302 = arith.addf %150, %301 : vector<2x8x32xf32>
    %c0_108 = arith.constant 0 : index
    %c0_109 = arith.constant 0 : index
    %c0_110 = arith.constant 0 : index
    %303 = vector.load %arg5[%c0_108, %c0_109, %c0_110] : memref<2x6x32xf32, #tpu.memory_space<vmem>>, vector<2x6x32xf32>
    %c0_111 = arith.constant 0 : index
    %c0_112 = arith.constant 0 : index
    %c0_113 = arith.constant 0 : index
    %304 = vector.load %arg6[%c0_111, %c0_112, %c0_113] : memref<2x1x6xf32, #tpu.memory_space<vmem>>, vector<2x1x6xf32>
    %305 = vector.shape_cast %302 : vector<2x8x32xf32> to vector<16x32xf32>
    %306 = vector.extract_strided_slice %5 {offsets = [2, 0], sizes = [1, 32], strides = [1, 1]} : vector<5x32xf32> to vector<1x32xf32>
    %307 = vector.extract_strided_slice %7 {offsets = [2, 0], sizes = [1, 32], strides = [1, 1]} : vector<5x32xf32> to vector<1x32xf32>
    %cst_114 = arith.constant dense<0.000000e+00> : vector<16xf32>
    %308 = vector.multi_reduction <add>, %305, %cst_114 [1] : vector<16x32xf32> to vector<16xf32>
    %309 = vector.shape_cast %308 : vector<16xf32> to vector<16x1xf32>
    %cst_115 = arith.constant 3.200000e+01 : f32
    %310 = vector.broadcast %cst_115 : f32 to vector<16x1xf32>
    %311 = arith.divf %309, %310 : vector<16x1xf32>
    %312 = vector.broadcast %311 : vector<16x1xf32> to vector<16x32xf32>
    %313 = arith.subf %305, %312 : vector<16x32xf32>
    %314 = arith.mulf %313, %313 : vector<16x32xf32>
    %cst_116 = arith.constant dense<0.000000e+00> : vector<16xf32>
    %315 = vector.multi_reduction <add>, %314, %cst_116 [1] : vector<16x32xf32> to vector<16xf32>
    %316 = vector.shape_cast %315 : vector<16xf32> to vector<16x1xf32>
    %cst_117 = arith.constant 0.0322580636 : f32
    %317 = vector.broadcast %cst_117 : f32 to vector<16x1xf32>
    %318 = arith.mulf %316, %317 : vector<16x1xf32>
    %319 = math.sqrt %318 : vector<16x1xf32>
    %cst_118 = arith.constant 9.99999997E-7 : f32
    %320 = vector.broadcast %cst_118 : f32 to vector<16x1xf32>
    %321 = arith.addf %319, %320 : vector<16x1xf32>
    %322 = tpu.reciprocal %321 : vector<16x1xf32> -> vector<16x1xf32>
    %323 = vector.broadcast %306 : vector<1x32xf32> to vector<16x32xf32>
    %324 = arith.mulf %323, %313 : vector<16x32xf32>
    %325 = vector.broadcast %322 : vector<16x1xf32> to vector<16x32xf32>
    %326 = arith.mulf %324, %325 : vector<16x32xf32>
    %327 = vector.broadcast %307 : vector<1x32xf32> to vector<16x32xf32>
    %328 = arith.addf %326, %327 : vector<16x32xf32>
    %329 = arith.truncf %328 : vector<16x32xf32> to vector<16x32xbf16>
    %c0_119 = arith.constant 0 : index
    %c1 = arith.constant 1 : index
    %c0_120 = arith.constant 0 : index
    %c0_121 = arith.constant 0 : index
    %330 = vector.load %arg15[%c0_119, %c1, %c0_120, %c0_121] : memref<1x3x32x32xbf16, #tpu.memory_space<vmem>>, vector<1x1x32x32xbf16>
    %331 = vector.shape_cast %330 : vector<1x1x32x32xbf16> to vector<32x32xbf16>
    %cst_122 = arith.constant dense<0.000000e+00> : vector<16x32xf32>
    %332 = tpu.matmul %329, %331, %cst_122 {dimension_numbers = #tpu.dot_dimension_numbers<[1], [0], [0], [1], [0, 0, 1, 1], [], []>} : vector<16x32xbf16>, vector<32x32xbf16>, vector<16x32xf32> -> vector<16x32xf32>
    %c0_123 = arith.constant 0 : index
    %c1_124 = arith.constant 1 : index
    %c0_125 = arith.constant 0 : index
    %c0_126 = arith.constant 0 : index
    %333 = vector.load %arg16[%c0_123, %c1_124, %c0_125, %c0_126] : memref<1x3x1x32xf32, #tpu.memory_space<vmem>>, vector<1x1x1x32xf32>
    %334 = vector.shape_cast %333 : vector<1x1x1x32xf32> to vector<1x32xf32>
    %335 = vector.broadcast %334 : vector<1x32xf32> to vector<16x32xf32>
    %336 = arith.addf %332, %335 : vector<16x32xf32>
    %337 = vector.shape_cast %336 : vector<16x32xf32> to vector<2x8x32xf32>
    %338 = vector.shape_cast %303 : vector<2x6x32xf32> to vector<12x32xf32>
    %339 = arith.truncf %338 : vector<12x32xf32> to vector<12x32xbf16>
    %c0_127 = arith.constant 0 : index
    %c1_128 = arith.constant 1 : index
    %c0_129 = arith.constant 0 : index
    %c0_130 = arith.constant 0 : index
    %340 = vector.load %arg17[%c0_127, %c1_128, %c0_129, %c0_130] : memref<1x3x32x64xbf16, #tpu.memory_space<vmem>>, vector<1x1x32x64xbf16>
    %341 = vector.shape_cast %340 : vector<1x1x32x64xbf16> to vector<32x64xbf16>
    %cst_131 = arith.constant dense<0.000000e+00> : vector<12x64xf32>
    %342 = tpu.matmul %339, %341, %cst_131 {dimension_numbers = #tpu.dot_dimension_numbers<[1], [0], [0], [1], [0, 0, 1, 1], [], []>} : vector<12x32xbf16>, vector<32x64xbf16>, vector<12x64xf32> -> vector<12x64xf32>
    %c0_132 = arith.constant 0 : index
    %c1_133 = arith.constant 1 : index
    %c0_134 = arith.constant 0 : index
    %c0_135 = arith.constant 0 : index
    %343 = vector.load %arg18[%c0_132, %c1_133, %c0_134, %c0_135] : memref<1x3x1x64xf32, #tpu.memory_space<vmem>>, vector<1x1x1x64xf32>
    %344 = vector.shape_cast %343 : vector<1x1x1x64xf32> to vector<1x64xf32>
    %345 = vector.broadcast %344 : vector<1x64xf32> to vector<12x64xf32>
    %346 = arith.addf %342, %345 : vector<12x64xf32>
    %347 = vector.extract_strided_slice %346 {offsets = [0, 0], sizes = [12, 32], strides = [1, 1]} : vector<12x64xf32> to vector<12x32xf32>
    %348 = vector.shape_cast %347 : vector<12x32xf32> to vector<2x6x32xf32>
    %349 = vector.extract_strided_slice %346 {offsets = [0, 32], sizes = [12, 32], strides = [1, 1]} : vector<12x64xf32> to vector<12x32xf32>
    %350 = vector.shape_cast %349 : vector<12x32xf32> to vector<2x6x32xf32>
    %c0_136 = arith.constant 0 : index
    %c1_137 = arith.constant 1 : index
    %c0_138 = arith.constant 0 : index
    %c0_139 = arith.constant 0 : index
    %351 = vector.load %arg19[%c0_136, %c1_137, %c0_138, %c0_139] : memref<1x3x32x32xbf16, #tpu.memory_space<vmem>>, vector<1x1x32x32xbf16>
    %352 = vector.shape_cast %351 : vector<1x1x32x32xbf16> to vector<32x32xbf16>
    %c0_140 = arith.constant 0 : index
    %c1_141 = arith.constant 1 : index
    %c0_142 = arith.constant 0 : index
    %c0_143 = arith.constant 0 : index
    %353 = vector.load %arg20[%c0_140, %c1_141, %c0_142, %c0_143] : memref<1x3x1x32xf32, #tpu.memory_space<vmem>>, vector<1x1x1x32xf32>
    %354 = vector.shape_cast %353 : vector<1x1x1x32xf32> to vector<1x32xf32>
    %355 = vector.extract_strided_slice %337 {offsets = [0, 0, 0], sizes = [2, 8, 8], strides = [1, 1, 1]} : vector<2x8x32xf32> to vector<2x8x8xf32>
    %356 = vector.extract_strided_slice %348 {offsets = [0, 0, 0], sizes = [2, 6, 8], strides = [1, 1, 1]} : vector<2x6x32xf32> to vector<2x6x8xf32>
    %357 = vector.extract_strided_slice %350 {offsets = [0, 0, 0], sizes = [2, 6, 8], strides = [1, 1, 1]} : vector<2x6x32xf32> to vector<2x6x8xf32>
    %358 = arith.truncf %355 : vector<2x8x8xf32> to vector<2x8x8xbf16>
    %359 = arith.truncf %356 : vector<2x6x8xf32> to vector<2x6x8xbf16>
    "tpu.trace_start"() <{level = 10 : i32, message = "bqd,bkd->bqk"}> : () -> ()
    %cst_144 = arith.constant dense<0.000000e+00> : vector<2x8x6xf32>
    %360 = tpu.matmul %358, %359, %cst_144 {dimension_numbers = #tpu.dot_dimension_numbers<[2], [2], [1], [1], [0, 0, 0, 1, 1, 1], [0], [0]>} : vector<2x8x8xbf16>, vector<2x6x8xbf16>, vector<2x8x6xf32> -> vector<2x8x6xf32>
    "tpu.trace_stop"() : () -> ()
    %cst_145 = arith.constant 0.353553385 : f32
    %361 = vector.broadcast %cst_145 : f32 to vector<2x8x6xf32>
    %362 = arith.mulf %360, %361 : vector<2x8x6xf32>
    %363 = vector.broadcast %304 : vector<2x1x6xf32> to vector<2x8x6xf32>
    %364 = arith.addf %362, %363 : vector<2x8x6xf32>
    %cst_146 = arith.constant dense<0xFF800000> : vector<2x8xf32>
    %365 = vector.multi_reduction <maximumf>, %364, %cst_146 [2] : vector<2x8x6xf32> to vector<2x8xf32>
    %366 = vector.shape_cast %365 : vector<2x8xf32> to vector<2x8x1xf32>
    %367 = vector.broadcast %366 : vector<2x8x1xf32> to vector<2x8x6xf32>
    %368 = arith.subf %364, %367 : vector<2x8x6xf32>
    %369 = math.exp %368 : vector<2x8x6xf32>
    %cst_147 = arith.constant dense<0.000000e+00> : vector<2x8xf32>
    %370 = vector.multi_reduction <add>, %369, %cst_147 [2] : vector<2x8x6xf32> to vector<2x8xf32>
    %371 = vector.shape_cast %370 : vector<2x8xf32> to vector<2x8x1xf32>
    %372 = tpu.reciprocal %371 {approx = true} : vector<2x8x1xf32> -> vector<2x8x1xf32>
    %373 = vector.broadcast %372 : vector<2x8x1xf32> to vector<2x8x6xf32>
    %374 = arith.mulf %369, %373 : vector<2x8x6xf32>
    %375 = arith.truncf %374 : vector<2x8x6xf32> to vector<2x8x6xbf16>
    %376 = arith.truncf %357 : vector<2x6x8xf32> to vector<2x6x8xbf16>
    "tpu.trace_start"() <{level = 10 : i32, message = "bqk,bkd->bqd"}> : () -> ()
    %cst_148 = arith.constant dense<0.000000e+00> : vector<2x8x8xf32>
    %377 = tpu.matmul %375, %376, %cst_148 {dimension_numbers = #tpu.dot_dimension_numbers<[2], [1], [1], [2], [0, 0, 0, 1, 1, 2], [0], [0]>} : vector<2x8x6xbf16>, vector<2x6x8xbf16>, vector<2x8x8xf32> -> vector<2x8x8xf32>
    "tpu.trace_stop"() : () -> ()
    %378 = vector.extract_strided_slice %337 {offsets = [0, 0, 8], sizes = [2, 8, 8], strides = [1, 1, 1]} : vector<2x8x32xf32> to vector<2x8x8xf32>
    %379 = vector.extract_strided_slice %348 {offsets = [0, 0, 8], sizes = [2, 6, 8], strides = [1, 1, 1]} : vector<2x6x32xf32> to vector<2x6x8xf32>
    %380 = vector.extract_strided_slice %350 {offsets = [0, 0, 8], sizes = [2, 6, 8], strides = [1, 1, 1]} : vector<2x6x32xf32> to vector<2x6x8xf32>
    %381 = arith.truncf %378 : vector<2x8x8xf32> to vector<2x8x8xbf16>
    %382 = arith.truncf %379 : vector<2x6x8xf32> to vector<2x6x8xbf16>
    "tpu.trace_start"() <{level = 10 : i32, message = "bqd,bkd->bqk"}> : () -> ()
    %cst_149 = arith.constant dense<0.000000e+00> : vector<2x8x6xf32>
    %383 = tpu.matmul %381, %382, %cst_149 {dimension_numbers = #tpu.dot_dimension_numbers<[2], [2], [1], [1], [0, 0, 0, 1, 1, 1], [0], [0]>} : vector<2x8x8xbf16>, vector<2x6x8xbf16>, vector<2x8x6xf32> -> vector<2x8x6xf32>
    "tpu.trace_stop"() : () -> ()
    %cst_150 = arith.constant 0.353553385 : f32
    %384 = vector.broadcast %cst_150 : f32 to vector<2x8x6xf32>
    %385 = arith.mulf %383, %384 : vector<2x8x6xf32>
    %386 = vector.broadcast %304 : vector<2x1x6xf32> to vector<2x8x6xf32>
    %387 = arith.addf %385, %386 : vector<2x8x6xf32>
    %cst_151 = arith.constant dense<0xFF800000> : vector<2x8xf32>
    %388 = vector.multi_reduction <maximumf>, %387, %cst_151 [2] : vector<2x8x6xf32> to vector<2x8xf32>
    %389 = vector.shape_cast %388 : vector<2x8xf32> to vector<2x8x1xf32>
    %390 = vector.broadcast %389 : vector<2x8x1xf32> to vector<2x8x6xf32>
    %391 = arith.subf %387, %390 : vector<2x8x6xf32>
    %392 = math.exp %391 : vector<2x8x6xf32>
    %cst_152 = arith.constant dense<0.000000e+00> : vector<2x8xf32>
    %393 = vector.multi_reduction <add>, %392, %cst_152 [2] : vector<2x8x6xf32> to vector<2x8xf32>
    %394 = vector.shape_cast %393 : vector<2x8xf32> to vector<2x8x1xf32>
    %395 = tpu.reciprocal %394 {approx = true} : vector<2x8x1xf32> -> vector<2x8x1xf32>
    %396 = vector.broadcast %395 : vector<2x8x1xf32> to vector<2x8x6xf32>
    %397 = arith.mulf %392, %396 : vector<2x8x6xf32>
    %398 = arith.truncf %397 : vector<2x8x6xf32> to vector<2x8x6xbf16>
    %399 = arith.truncf %380 : vector<2x6x8xf32> to vector<2x6x8xbf16>
    "tpu.trace_start"() <{level = 10 : i32, message = "bqk,bkd->bqd"}> : () -> ()
    %cst_153 = arith.constant dense<0.000000e+00> : vector<2x8x8xf32>
    %400 = tpu.matmul %398, %399, %cst_153 {dimension_numbers = #tpu.dot_dimension_numbers<[2], [1], [1], [2], [0, 0, 0, 1, 1, 2], [0], [0]>} : vector<2x8x6xbf16>, vector<2x6x8xbf16>, vector<2x8x8xf32> -> vector<2x8x8xf32>
    "tpu.trace_stop"() : () -> ()
    %401 = vector.extract_strided_slice %337 {offsets = [0, 0, 16], sizes = [2, 8, 8], strides = [1, 1, 1]} : vector<2x8x32xf32> to vector<2x8x8xf32>
    %402 = vector.extract_strided_slice %348 {offsets = [0, 0, 16], sizes = [2, 6, 8], strides = [1, 1, 1]} : vector<2x6x32xf32> to vector<2x6x8xf32>
    %403 = vector.extract_strided_slice %350 {offsets = [0, 0, 16], sizes = [2, 6, 8], strides = [1, 1, 1]} : vector<2x6x32xf32> to vector<2x6x8xf32>
    %404 = arith.truncf %401 : vector<2x8x8xf32> to vector<2x8x8xbf16>
    %405 = arith.truncf %402 : vector<2x6x8xf32> to vector<2x6x8xbf16>
    "tpu.trace_start"() <{level = 10 : i32, message = "bqd,bkd->bqk"}> : () -> ()
    %cst_154 = arith.constant dense<0.000000e+00> : vector<2x8x6xf32>
    %406 = tpu.matmul %404, %405, %cst_154 {dimension_numbers = #tpu.dot_dimension_numbers<[2], [2], [1], [1], [0, 0, 0, 1, 1, 1], [0], [0]>} : vector<2x8x8xbf16>, vector<2x6x8xbf16>, vector<2x8x6xf32> -> vector<2x8x6xf32>
    "tpu.trace_stop"() : () -> ()
    %cst_155 = arith.constant 0.353553385 : f32
    %407 = vector.broadcast %cst_155 : f32 to vector<2x8x6xf32>
    %408 = arith.mulf %406, %407 : vector<2x8x6xf32>
    %409 = vector.broadcast %304 : vector<2x1x6xf32> to vector<2x8x6xf32>
    %410 = arith.addf %408, %409 : vector<2x8x6xf32>
    %cst_156 = arith.constant dense<0xFF800000> : vector<2x8xf32>
    %411 = vector.multi_reduction <maximumf>, %410, %cst_156 [2] : vector<2x8x6xf32> to vector<2x8xf32>
    %412 = vector.shape_cast %411 : vector<2x8xf32> to vector<2x8x1xf32>
    %413 = vector.broadcast %412 : vector<2x8x1xf32> to vector<2x8x6xf32>
    %414 = arith.subf %410, %413 : vector<2x8x6xf32>
    %415 = math.exp %414 : vector<2x8x6xf32>
    %cst_157 = arith.constant dense<0.000000e+00> : vector<2x8xf32>
    %416 = vector.multi_reduction <add>, %415, %cst_157 [2] : vector<2x8x6xf32> to vector<2x8xf32>
    %417 = vector.shape_cast %416 : vector<2x8xf32> to vector<2x8x1xf32>
    %418 = tpu.reciprocal %417 {approx = true} : vector<2x8x1xf32> -> vector<2x8x1xf32>
    %419 = vector.broadcast %418 : vector<2x8x1xf32> to vector<2x8x6xf32>
    %420 = arith.mulf %415, %419 : vector<2x8x6xf32>
    %421 = arith.truncf %420 : vector<2x8x6xf32> to vector<2x8x6xbf16>
    %422 = arith.truncf %403 : vector<2x6x8xf32> to vector<2x6x8xbf16>
    "tpu.trace_start"() <{level = 10 : i32, message = "bqk,bkd->bqd"}> : () -> ()
    %cst_158 = arith.constant dense<0.000000e+00> : vector<2x8x8xf32>
    %423 = tpu.matmul %421, %422, %cst_158 {dimension_numbers = #tpu.dot_dimension_numbers<[2], [1], [1], [2], [0, 0, 0, 1, 1, 2], [0], [0]>} : vector<2x8x6xbf16>, vector<2x6x8xbf16>, vector<2x8x8xf32> -> vector<2x8x8xf32>
    "tpu.trace_stop"() : () -> ()
    %424 = vector.extract_strided_slice %337 {offsets = [0, 0, 24], sizes = [2, 8, 8], strides = [1, 1, 1]} : vector<2x8x32xf32> to vector<2x8x8xf32>
    %425 = vector.extract_strided_slice %348 {offsets = [0, 0, 24], sizes = [2, 6, 8], strides = [1, 1, 1]} : vector<2x6x32xf32> to vector<2x6x8xf32>
    %426 = vector.extract_strided_slice %350 {offsets = [0, 0, 24], sizes = [2, 6, 8], strides = [1, 1, 1]} : vector<2x6x32xf32> to vector<2x6x8xf32>
    %427 = arith.truncf %424 : vector<2x8x8xf32> to vector<2x8x8xbf16>
    %428 = arith.truncf %425 : vector<2x6x8xf32> to vector<2x6x8xbf16>
    "tpu.trace_start"() <{level = 10 : i32, message = "bqd,bkd->bqk"}> : () -> ()
    %cst_159 = arith.constant dense<0.000000e+00> : vector<2x8x6xf32>
    %429 = tpu.matmul %427, %428, %cst_159 {dimension_numbers = #tpu.dot_dimension_numbers<[2], [2], [1], [1], [0, 0, 0, 1, 1, 1], [0], [0]>} : vector<2x8x8xbf16>, vector<2x6x8xbf16>, vector<2x8x6xf32> -> vector<2x8x6xf32>
    "tpu.trace_stop"() : () -> ()
    %cst_160 = arith.constant 0.353553385 : f32
    %430 = vector.broadcast %cst_160 : f32 to vector<2x8x6xf32>
    %431 = arith.mulf %429, %430 : vector<2x8x6xf32>
    %432 = vector.broadcast %304 : vector<2x1x6xf32> to vector<2x8x6xf32>
    %433 = arith.addf %431, %432 : vector<2x8x6xf32>
    %cst_161 = arith.constant dense<0xFF800000> : vector<2x8xf32>
    %434 = vector.multi_reduction <maximumf>, %433, %cst_161 [2] : vector<2x8x6xf32> to vector<2x8xf32>
    %435 = vector.shape_cast %434 : vector<2x8xf32> to vector<2x8x1xf32>
    %436 = vector.broadcast %435 : vector<2x8x1xf32> to vector<2x8x6xf32>
    %437 = arith.subf %433, %436 : vector<2x8x6xf32>
    %438 = math.exp %437 : vector<2x8x6xf32>
    %cst_162 = arith.constant dense<0.000000e+00> : vector<2x8xf32>
    %439 = vector.multi_reduction <add>, %438, %cst_162 [2] : vector<2x8x6xf32> to vector<2x8xf32>
    %440 = vector.shape_cast %439 : vector<2x8xf32> to vector<2x8x1xf32>
    %441 = tpu.reciprocal %440 {approx = true} : vector<2x8x1xf32> -> vector<2x8x1xf32>
    %442 = vector.broadcast %441 : vector<2x8x1xf32> to vector<2x8x6xf32>
    %443 = arith.mulf %438, %442 : vector<2x8x6xf32>
    %444 = arith.truncf %443 : vector<2x8x6xf32> to vector<2x8x6xbf16>
    %445 = arith.truncf %426 : vector<2x6x8xf32> to vector<2x6x8xbf16>
    "tpu.trace_start"() <{level = 10 : i32, message = "bqk,bkd->bqd"}> : () -> ()
    %cst_163 = arith.constant dense<0.000000e+00> : vector<2x8x8xf32>
    %446 = tpu.matmul %444, %445, %cst_163 {dimension_numbers = #tpu.dot_dimension_numbers<[2], [1], [1], [2], [0, 0, 0, 1, 1, 2], [0], [0]>} : vector<2x8x6xbf16>, vector<2x6x8xbf16>, vector<2x8x8xf32> -> vector<2x8x8xf32>
    "tpu.trace_stop"() : () -> ()
    %447 = tpu.concatenate %377, %400, %423, %446 in 2 : vector<2x8x8xf32>, vector<2x8x8xf32>, vector<2x8x8xf32>, vector<2x8x8xf32> -> vector<2x8x32xf32>
    %448 = vector.shape_cast %447 : vector<2x8x32xf32> to vector<16x32xf32>
    %449 = arith.truncf %448 : vector<16x32xf32> to vector<16x32xbf16>
    %cst_164 = arith.constant dense<0.000000e+00> : vector<16x32xf32>
    %450 = tpu.matmul %449, %352, %cst_164 {dimension_numbers = #tpu.dot_dimension_numbers<[1], [0], [0], [1], [0, 0, 1, 1], [], []>} : vector<16x32xbf16>, vector<32x32xbf16>, vector<16x32xf32> -> vector<16x32xf32>
    %451 = vector.broadcast %354 : vector<1x32xf32> to vector<16x32xf32>
    %452 = arith.addf %450, %451 : vector<16x32xf32>
    %453 = vector.shape_cast %452 : vector<16x32xf32> to vector<2x8x32xf32>
    %454 = arith.addf %302, %453 : vector<2x8x32xf32>
    %c0_165 = arith.constant 0 : index
    %c0_166 = arith.constant 0 : index
    %c0_167 = arith.constant 0 : index
    %455 = vector.load %arg7[%c0_165, %c0_166, %c0_167] : memref<2x6x32xf32, #tpu.memory_space<vmem>>, vector<2x6x32xf32>
    %c0_168 = arith.constant 0 : index
    %c0_169 = arith.constant 0 : index
    %c0_170 = arith.constant 0 : index
    %456 = vector.load %arg8[%c0_168, %c0_169, %c0_170] : memref<2x1x6xf32, #tpu.memory_space<vmem>>, vector<2x1x6xf32>
    %457 = vector.shape_cast %454 : vector<2x8x32xf32> to vector<16x32xf32>
    %458 = vector.extract_strided_slice %5 {offsets = [3, 0], sizes = [1, 32], strides = [1, 1]} : vector<5x32xf32> to vector<1x32xf32>
    %459 = vector.extract_strided_slice %7 {offsets = [3, 0], sizes = [1, 32], strides = [1, 1]} : vector<5x32xf32> to vector<1x32xf32>
    %cst_171 = arith.constant dense<0.000000e+00> : vector<16xf32>
    %460 = vector.multi_reduction <add>, %457, %cst_171 [1] : vector<16x32xf32> to vector<16xf32>
    %461 = vector.shape_cast %460 : vector<16xf32> to vector<16x1xf32>
    %cst_172 = arith.constant 3.200000e+01 : f32
    %462 = vector.broadcast %cst_172 : f32 to vector<16x1xf32>
    %463 = arith.divf %461, %462 : vector<16x1xf32>
    %464 = vector.broadcast %463 : vector<16x1xf32> to vector<16x32xf32>
    %465 = arith.subf %457, %464 : vector<16x32xf32>
    %466 = arith.mulf %465, %465 : vector<16x32xf32>
    %cst_173 = arith.constant dense<0.000000e+00> : vector<16xf32>
    %467 = vector.multi_reduction <add>, %466, %cst_173 [1] : vector<16x32xf32> to vector<16xf32>
    %468 = vector.shape_cast %467 : vector<16xf32> to vector<16x1xf32>
    %cst_174 = arith.constant 0.0322580636 : f32
    %469 = vector.broadcast %cst_174 : f32 to vector<16x1xf32>
    %470 = arith.mulf %468, %469 : vector<16x1xf32>
    %471 = math.sqrt %470 : vector<16x1xf32>
    %cst_175 = arith.constant 9.99999997E-7 : f32
    %472 = vector.broadcast %cst_175 : f32 to vector<16x1xf32>
    %473 = arith.addf %471, %472 : vector<16x1xf32>
    %474 = tpu.reciprocal %473 : vector<16x1xf32> -> vector<16x1xf32>
    %475 = vector.broadcast %458 : vector<1x32xf32> to vector<16x32xf32>
    %476 = arith.mulf %475, %465 : vector<16x32xf32>
    %477 = vector.broadcast %474 : vector<16x1xf32> to vector<16x32xf32>
    %478 = arith.mulf %476, %477 : vector<16x32xf32>
    %479 = vector.broadcast %459 : vector<1x32xf32> to vector<16x32xf32>
    %480 = arith.addf %478, %479 : vector<16x32xf32>
    %481 = arith.truncf %480 : vector<16x32xf32> to vector<16x32xbf16>
    %c0_176 = arith.constant 0 : index
    %c2 = arith.constant 2 : index
    %c0_177 = arith.constant 0 : index
    %c0_178 = arith.constant 0 : index
    %482 = vector.load %arg15[%c0_176, %c2, %c0_177, %c0_178] : memref<1x3x32x32xbf16, #tpu.memory_space<vmem>>, vector<1x1x32x32xbf16>
    %483 = vector.shape_cast %482 : vector<1x1x32x32xbf16> to vector<32x32xbf16>
    %cst_179 = arith.constant dense<0.000000e+00> : vector<16x32xf32>
    %484 = tpu.matmul %481, %483, %cst_179 {dimension_numbers = #tpu.dot_dimension_numbers<[1], [0], [0], [1], [0, 0, 1, 1], [], []>} : vector<16x32xbf16>, vector<32x32xbf16>, vector<16x32xf32> -> vector<16x32xf32>
    %c0_180 = arith.constant 0 : index
    %c2_181 = arith.constant 2 : index
    %c0_182 = arith.constant 0 : index
    %c0_183 = arith.constant 0 : index
    %485 = vector.load %arg16[%c0_180, %c2_181, %c0_182, %c0_183] : memref<1x3x1x32xf32, #tpu.memory_space<vmem>>, vector<1x1x1x32xf32>
    %486 = vector.shape_cast %485 : vector<1x1x1x32xf32> to vector<1x32xf32>
    %487 = vector.broadcast %486 : vector<1x32xf32> to vector<16x32xf32>
    %488 = arith.addf %484, %487 : vector<16x32xf32>
    %489 = vector.shape_cast %488 : vector<16x32xf32> to vector<2x8x32xf32>
    %490 = vector.shape_cast %455 : vector<2x6x32xf32> to vector<12x32xf32>
    %491 = arith.truncf %490 : vector<12x32xf32> to vector<12x32xbf16>
    %c0_184 = arith.constant 0 : index
    %c2_185 = arith.constant 2 : index
    %c0_186 = arith.constant 0 : index
    %c0_187 = arith.constant 0 : index
    %492 = vector.load %arg17[%c0_184, %c2_185, %c0_186, %c0_187] : memref<1x3x32x64xbf16, #tpu.memory_space<vmem>>, vector<1x1x32x64xbf16>
    %493 = vector.shape_cast %492 : vector<1x1x32x64xbf16> to vector<32x64xbf16>
    %cst_188 = arith.constant dense<0.000000e+00> : vector<12x64xf32>
    %494 = tpu.matmul %491, %493, %cst_188 {dimension_numbers = #tpu.dot_dimension_numbers<[1], [0], [0], [1], [0, 0, 1, 1], [], []>} : vector<12x32xbf16>, vector<32x64xbf16>, vector<12x64xf32> -> vector<12x64xf32>
    %c0_189 = arith.constant 0 : index
    %c2_190 = arith.constant 2 : index
    %c0_191 = arith.constant 0 : index
    %c0_192 = arith.constant 0 : index
    %495 = vector.load %arg18[%c0_189, %c2_190, %c0_191, %c0_192] : memref<1x3x1x64xf32, #tpu.memory_space<vmem>>, vector<1x1x1x64xf32>
    %496 = vector.shape_cast %495 : vector<1x1x1x64xf32> to vector<1x64xf32>
    %497 = vector.broadcast %496 : vector<1x64xf32> to vector<12x64xf32>
    %498 = arith.addf %494, %497 : vector<12x64xf32>
    %499 = vector.extract_strided_slice %498 {offsets = [0, 0], sizes = [12, 32], strides = [1, 1]} : vector<12x64xf32> to vector<12x32xf32>
    %500 = vector.shape_cast %499 : vector<12x32xf32> to vector<2x6x32xf32>
    %501 = vector.extract_strided_slice %498 {offsets = [0, 32], sizes = [12, 32], strides = [1, 1]} : vector<12x64xf32> to vector<12x32xf32>
    %502 = vector.shape_cast %501 : vector<12x32xf32> to vector<2x6x32xf32>
    %c0_193 = arith.constant 0 : index
    %c2_194 = arith.constant 2 : index
    %c0_195 = arith.constant 0 : index
    %c0_196 = arith.constant 0 : index
    %503 = vector.load %arg19[%c0_193, %c2_194, %c0_195, %c0_196] : memref<1x3x32x32xbf16, #tpu.memory_space<vmem>>, vector<1x1x32x32xbf16>
    %504 = vector.shape_cast %503 : vector<1x1x32x32xbf16> to vector<32x32xbf16>
    %c0_197 = arith.constant 0 : index
    %c2_198 = arith.constant 2 : index
    %c0_199 = arith.constant 0 : index
    %c0_200 = arith.constant 0 : index
    %505 = vector.load %arg20[%c0_197, %c2_198, %c0_199, %c0_200] : memref<1x3x1x32xf32, #tpu.memory_space<vmem>>, vector<1x1x1x32xf32>
    %506 = vector.shape_cast %505 : vector<1x1x1x32xf32> to vector<1x32xf32>
    %507 = vector.extract_strided_slice %489 {offsets = [0, 0, 0], sizes = [2, 8, 8], strides = [1, 1, 1]} : vector<2x8x32xf32> to vector<2x8x8xf32>
    %508 = vector.extract_strided_slice %500 {offsets = [0, 0, 0], sizes = [2, 6, 8], strides = [1, 1, 1]} : vector<2x6x32xf32> to vector<2x6x8xf32>
    %509 = vector.extract_strided_slice %502 {offsets = [0, 0, 0], sizes = [2, 6, 8], strides = [1, 1, 1]} : vector<2x6x32xf32> to vector<2x6x8xf32>
    %510 = arith.truncf %507 : vector<2x8x8xf32> to vector<2x8x8xbf16>
    %511 = arith.truncf %508 : vector<2x6x8xf32> to vector<2x6x8xbf16>
    "tpu.trace_start"() <{level = 10 : i32, message = "bqd,bkd->bqk"}> : () -> ()
    %cst_201 = arith.constant dense<0.000000e+00> : vector<2x8x6xf32>
    %512 = tpu.matmul %510, %511, %cst_201 {dimension_numbers = #tpu.dot_dimension_numbers<[2], [2], [1], [1], [0, 0, 0, 1, 1, 1], [0], [0]>} : vector<2x8x8xbf16>, vector<2x6x8xbf16>, vector<2x8x6xf32> -> vector<2x8x6xf32>
    "tpu.trace_stop"() : () -> ()
    %cst_202 = arith.constant 0.353553385 : f32
    %513 = vector.broadcast %cst_202 : f32 to vector<2x8x6xf32>
    %514 = arith.mulf %512, %513 : vector<2x8x6xf32>
    %515 = vector.broadcast %456 : vector<2x1x6xf32> to vector<2x8x6xf32>
    %516 = arith.addf %514, %515 : vector<2x8x6xf32>
    %cst_203 = arith.constant dense<0xFF800000> : vector<2x8xf32>
    %517 = vector.multi_reduction <maximumf>, %516, %cst_203 [2] : vector<2x8x6xf32> to vector<2x8xf32>
    %518 = vector.shape_cast %517 : vector<2x8xf32> to vector<2x8x1xf32>
    %519 = vector.broadcast %518 : vector<2x8x1xf32> to vector<2x8x6xf32>
    %520 = arith.subf %516, %519 : vector<2x8x6xf32>
    %521 = math.exp %520 : vector<2x8x6xf32>
    %cst_204 = arith.constant dense<0.000000e+00> : vector<2x8xf32>
    %522 = vector.multi_reduction <add>, %521, %cst_204 [2] : vector<2x8x6xf32> to vector<2x8xf32>
    %523 = vector.shape_cast %522 : vector<2x8xf32> to vector<2x8x1xf32>
    %524 = tpu.reciprocal %523 {approx = true} : vector<2x8x1xf32> -> vector<2x8x1xf32>
    %525 = vector.broadcast %524 : vector<2x8x1xf32> to vector<2x8x6xf32>
    %526 = arith.mulf %521, %525 : vector<2x8x6xf32>
    %527 = arith.truncf %526 : vector<2x8x6xf32> to vector<2x8x6xbf16>
    %528 = arith.truncf %509 : vector<2x6x8xf32> to vector<2x6x8xbf16>
    "tpu.trace_start"() <{level = 10 : i32, message = "bqk,bkd->bqd"}> : () -> ()
    %cst_205 = arith.constant dense<0.000000e+00> : vector<2x8x8xf32>
    %529 = tpu.matmul %527, %528, %cst_205 {dimension_numbers = #tpu.dot_dimension_numbers<[2], [1], [1], [2], [0, 0, 0, 1, 1, 2], [0], [0]>} : vector<2x8x6xbf16>, vector<2x6x8xbf16>, vector<2x8x8xf32> -> vector<2x8x8xf32>
    "tpu.trace_stop"() : () -> ()
    %530 = vector.extract_strided_slice %489 {offsets = [0, 0, 8], sizes = [2, 8, 8], strides = [1, 1, 1]} : vector<2x8x32xf32> to vector<2x8x8xf32>
    %531 = vector.extract_strided_slice %500 {offsets = [0, 0, 8], sizes = [2, 6, 8], strides = [1, 1, 1]} : vector<2x6x32xf32> to vector<2x6x8xf32>
    %532 = vector.extract_strided_slice %502 {offsets = [0, 0, 8], sizes = [2, 6, 8], strides = [1, 1, 1]} : vector<2x6x32xf32> to vector<2x6x8xf32>
    %533 = arith.truncf %530 : vector<2x8x8xf32> to vector<2x8x8xbf16>
    %534 = arith.truncf %531 : vector<2x6x8xf32> to vector<2x6x8xbf16>
    "tpu.trace_start"() <{level = 10 : i32, message = "bqd,bkd->bqk"}> : () -> ()
    %cst_206 = arith.constant dense<0.000000e+00> : vector<2x8x6xf32>
    %535 = tpu.matmul %533, %534, %cst_206 {dimension_numbers = #tpu.dot_dimension_numbers<[2], [2], [1], [1], [0, 0, 0, 1, 1, 1], [0], [0]>} : vector<2x8x8xbf16>, vector<2x6x8xbf16>, vector<2x8x6xf32> -> vector<2x8x6xf32>
    "tpu.trace_stop"() : () -> ()
    %cst_207 = arith.constant 0.353553385 : f32
    %536 = vector.broadcast %cst_207 : f32 to vector<2x8x6xf32>
    %537 = arith.mulf %535, %536 : vector<2x8x6xf32>
    %538 = vector.broadcast %456 : vector<2x1x6xf32> to vector<2x8x6xf32>
    %539 = arith.addf %537, %538 : vector<2x8x6xf32>
    %cst_208 = arith.constant dense<0xFF800000> : vector<2x8xf32>
    %540 = vector.multi_reduction <maximumf>, %539, %cst_208 [2] : vector<2x8x6xf32> to vector<2x8xf32>
    %541 = vector.shape_cast %540 : vector<2x8xf32> to vector<2x8x1xf32>
    %542 = vector.broadcast %541 : vector<2x8x1xf32> to vector<2x8x6xf32>
    %543 = arith.subf %539, %542 : vector<2x8x6xf32>
    %544 = math.exp %543 : vector<2x8x6xf32>
    %cst_209 = arith.constant dense<0.000000e+00> : vector<2x8xf32>
    %545 = vector.multi_reduction <add>, %544, %cst_209 [2] : vector<2x8x6xf32> to vector<2x8xf32>
    %546 = vector.shape_cast %545 : vector<2x8xf32> to vector<2x8x1xf32>
    %547 = tpu.reciprocal %546 {approx = true} : vector<2x8x1xf32> -> vector<2x8x1xf32>
    %548 = vector.broadcast %547 : vector<2x8x1xf32> to vector<2x8x6xf32>
    %549 = arith.mulf %544, %548 : vector<2x8x6xf32>
    %550 = arith.truncf %549 : vector<2x8x6xf32> to vector<2x8x6xbf16>
    %551 = arith.truncf %532 : vector<2x6x8xf32> to vector<2x6x8xbf16>
    "tpu.trace_start"() <{level = 10 : i32, message = "bqk,bkd->bqd"}> : () -> ()
    %cst_210 = arith.constant dense<0.000000e+00> : vector<2x8x8xf32>
    %552 = tpu.matmul %550, %551, %cst_210 {dimension_numbers = #tpu.dot_dimension_numbers<[2], [1], [1], [2], [0, 0, 0, 1, 1, 2], [0], [0]>} : vector<2x8x6xbf16>, vector<2x6x8xbf16>, vector<2x8x8xf32> -> vector<2x8x8xf32>
    "tpu.trace_stop"() : () -> ()
    %553 = vector.extract_strided_slice %489 {offsets = [0, 0, 16], sizes = [2, 8, 8], strides = [1, 1, 1]} : vector<2x8x32xf32> to vector<2x8x8xf32>
    %554 = vector.extract_strided_slice %500 {offsets = [0, 0, 16], sizes = [2, 6, 8], strides = [1, 1, 1]} : vector<2x6x32xf32> to vector<2x6x8xf32>
    %555 = vector.extract_strided_slice %502 {offsets = [0, 0, 16], sizes = [2, 6, 8], strides = [1, 1, 1]} : vector<2x6x32xf32> to vector<2x6x8xf32>
    %556 = arith.truncf %553 : vector<2x8x8xf32> to vector<2x8x8xbf16>
    %557 = arith.truncf %554 : vector<2x6x8xf32> to vector<2x6x8xbf16>
    "tpu.trace_start"() <{level = 10 : i32, message = "bqd,bkd->bqk"}> : () -> ()
    %cst_211 = arith.constant dense<0.000000e+00> : vector<2x8x6xf32>
    %558 = tpu.matmul %556, %557, %cst_211 {dimension_numbers = #tpu.dot_dimension_numbers<[2], [2], [1], [1], [0, 0, 0, 1, 1, 1], [0], [0]>} : vector<2x8x8xbf16>, vector<2x6x8xbf16>, vector<2x8x6xf32> -> vector<2x8x6xf32>
    "tpu.trace_stop"() : () -> ()
    %cst_212 = arith.constant 0.353553385 : f32
    %559 = vector.broadcast %cst_212 : f32 to vector<2x8x6xf32>
    %560 = arith.mulf %558, %559 : vector<2x8x6xf32>
    %561 = vector.broadcast %456 : vector<2x1x6xf32> to vector<2x8x6xf32>
    %562 = arith.addf %560, %561 : vector<2x8x6xf32>
    %cst_213 = arith.constant dense<0xFF800000> : vector<2x8xf32>
    %563 = vector.multi_reduction <maximumf>, %562, %cst_213 [2] : vector<2x8x6xf32> to vector<2x8xf32>
    %564 = vector.shape_cast %563 : vector<2x8xf32> to vector<2x8x1xf32>
    %565 = vector.broadcast %564 : vector<2x8x1xf32> to vector<2x8x6xf32>
    %566 = arith.subf %562, %565 : vector<2x8x6xf32>
    %567 = math.exp %566 : vector<2x8x6xf32>
    %cst_214 = arith.constant dense<0.000000e+00> : vector<2x8xf32>
    %568 = vector.multi_reduction <add>, %567, %cst_214 [2] : vector<2x8x6xf32> to vector<2x8xf32>
    %569 = vector.shape_cast %568 : vector<2x8xf32> to vector<2x8x1xf32>
    %570 = tpu.reciprocal %569 {approx = true} : vector<2x8x1xf32> -> vector<2x8x1xf32>
    %571 = vector.broadcast %570 : vector<2x8x1xf32> to vector<2x8x6xf32>
    %572 = arith.mulf %567, %571 : vector<2x8x6xf32>
    %573 = arith.truncf %572 : vector<2x8x6xf32> to vector<2x8x6xbf16>
    %574 = arith.truncf %555 : vector<2x6x8xf32> to vector<2x6x8xbf16>
    "tpu.trace_start"() <{level = 10 : i32, message = "bqk,bkd->bqd"}> : () -> ()
    %cst_215 = arith.constant dense<0.000000e+00> : vector<2x8x8xf32>
    %575 = tpu.matmul %573, %574, %cst_215 {dimension_numbers = #tpu.dot_dimension_numbers<[2], [1], [1], [2], [0, 0, 0, 1, 1, 2], [0], [0]>} : vector<2x8x6xbf16>, vector<2x6x8xbf16>, vector<2x8x8xf32> -> vector<2x8x8xf32>
    "tpu.trace_stop"() : () -> ()
    %576 = vector.extract_strided_slice %489 {offsets = [0, 0, 24], sizes = [2, 8, 8], strides = [1, 1, 1]} : vector<2x8x32xf32> to vector<2x8x8xf32>
    %577 = vector.extract_strided_slice %500 {offsets = [0, 0, 24], sizes = [2, 6, 8], strides = [1, 1, 1]} : vector<2x6x32xf32> to vector<2x6x8xf32>
    %578 = vector.extract_strided_slice %502 {offsets = [0, 0, 24], sizes = [2, 6, 8], strides = [1, 1, 1]} : vector<2x6x32xf32> to vector<2x6x8xf32>
    %579 = arith.truncf %576 : vector<2x8x8xf32> to vector<2x8x8xbf16>
    %580 = arith.truncf %577 : vector<2x6x8xf32> to vector<2x6x8xbf16>
    "tpu.trace_start"() <{level = 10 : i32, message = "bqd,bkd->bqk"}> : () -> ()
    %cst_216 = arith.constant dense<0.000000e+00> : vector<2x8x6xf32>
    %581 = tpu.matmul %579, %580, %cst_216 {dimension_numbers = #tpu.dot_dimension_numbers<[2], [2], [1], [1], [0, 0, 0, 1, 1, 1], [0], [0]>} : vector<2x8x8xbf16>, vector<2x6x8xbf16>, vector<2x8x6xf32> -> vector<2x8x6xf32>
    "tpu.trace_stop"() : () -> ()
    %cst_217 = arith.constant 0.353553385 : f32
    %582 = vector.broadcast %cst_217 : f32 to vector<2x8x6xf32>
    %583 = arith.mulf %581, %582 : vector<2x8x6xf32>
    %584 = vector.broadcast %456 : vector<2x1x6xf32> to vector<2x8x6xf32>
    %585 = arith.addf %583, %584 : vector<2x8x6xf32>
    %cst_218 = arith.constant dense<0xFF800000> : vector<2x8xf32>
    %586 = vector.multi_reduction <maximumf>, %585, %cst_218 [2] : vector<2x8x6xf32> to vector<2x8xf32>
    %587 = vector.shape_cast %586 : vector<2x8xf32> to vector<2x8x1xf32>
    %588 = vector.broadcast %587 : vector<2x8x1xf32> to vector<2x8x6xf32>
    %589 = arith.subf %585, %588 : vector<2x8x6xf32>
    %590 = math.exp %589 : vector<2x8x6xf32>
    %cst_219 = arith.constant dense<0.000000e+00> : vector<2x8xf32>
    %591 = vector.multi_reduction <add>, %590, %cst_219 [2] : vector<2x8x6xf32> to vector<2x8xf32>
    %592 = vector.shape_cast %591 : vector<2x8xf32> to vector<2x8x1xf32>
    %593 = tpu.reciprocal %592 {approx = true} : vector<2x8x1xf32> -> vector<2x8x1xf32>
    %594 = vector.broadcast %593 : vector<2x8x1xf32> to vector<2x8x6xf32>
    %595 = arith.mulf %590, %594 : vector<2x8x6xf32>
    %596 = arith.truncf %595 : vector<2x8x6xf32> to vector<2x8x6xbf16>
    %597 = arith.truncf %578 : vector<2x6x8xf32> to vector<2x6x8xbf16>
    "tpu.trace_start"() <{level = 10 : i32, message = "bqk,bkd->bqd"}> : () -> ()
    %cst_220 = arith.constant dense<0.000000e+00> : vector<2x8x8xf32>
    %598 = tpu.matmul %596, %597, %cst_220 {dimension_numbers = #tpu.dot_dimension_numbers<[2], [1], [1], [2], [0, 0, 0, 1, 1, 2], [0], [0]>} : vector<2x8x6xbf16>, vector<2x6x8xbf16>, vector<2x8x8xf32> -> vector<2x8x8xf32>
    "tpu.trace_stop"() : () -> ()
    %599 = tpu.concatenate %529, %552, %575, %598 in 2 : vector<2x8x8xf32>, vector<2x8x8xf32>, vector<2x8x8xf32>, vector<2x8x8xf32> -> vector<2x8x32xf32>
    %600 = vector.shape_cast %599 : vector<2x8x32xf32> to vector<16x32xf32>
    %601 = arith.truncf %600 : vector<16x32xf32> to vector<16x32xbf16>
    %cst_221 = arith.constant dense<0.000000e+00> : vector<16x32xf32>
    %602 = tpu.matmul %601, %504, %cst_221 {dimension_numbers = #tpu.dot_dimension_numbers<[1], [0], [0], [1], [0, 0, 1, 1], [], []>} : vector<16x32xbf16>, vector<32x32xbf16>, vector<16x32xf32> -> vector<16x32xf32>
    %603 = vector.broadcast %506 : vector<1x32xf32> to vector<16x32xf32>
    %604 = arith.addf %602, %603 : vector<16x32xf32>
    %605 = vector.shape_cast %604 : vector<16x32xf32> to vector<2x8x32xf32>
    %606 = arith.addf %454, %605 : vector<2x8x32xf32>
    %607 = vector.shape_cast %606 : vector<2x8x32xf32> to vector<16x32xf32>
    %608 = vector.extract_strided_slice %5 {offsets = [4, 0], sizes = [1, 32], strides = [1, 1]} : vector<5x32xf32> to vector<1x32xf32>
    %609 = vector.extract_strided_slice %7 {offsets = [4, 0], sizes = [1, 32], strides = [1, 1]} : vector<5x32xf32> to vector<1x32xf32>
    %cst_222 = arith.constant dense<0.000000e+00> : vector<16xf32>
    %610 = vector.multi_reduction <add>, %607, %cst_222 [1] : vector<16x32xf32> to vector<16xf32>
    %611 = vector.shape_cast %610 : vector<16xf32> to vector<16x1xf32>
    %cst_223 = arith.constant 3.200000e+01 : f32
    %612 = vector.broadcast %cst_223 : f32 to vector<16x1xf32>
    %613 = arith.divf %611, %612 : vector<16x1xf32>
    %614 = vector.broadcast %613 : vector<16x1xf32> to vector<16x32xf32>
    %615 = arith.subf %607, %614 : vector<16x32xf32>
    %616 = arith.mulf %615, %615 : vector<16x32xf32>
    %cst_224 = arith.constant dense<0.000000e+00> : vector<16xf32>
    %617 = vector.multi_reduction <add>, %616, %cst_224 [1] : vector<16x32xf32> to vector<16xf32>
    %618 = vector.shape_cast %617 : vector<16xf32> to vector<16x1xf32>
    %cst_225 = arith.constant 0.0322580636 : f32
    %619 = vector.broadcast %cst_225 : f32 to vector<16x1xf32>
    %620 = arith.mulf %618, %619 : vector<16x1xf32>
    %621 = math.sqrt %620 : vector<16x1xf32>
    %cst_226 = arith.constant 9.99999997E-7 : f32
    %622 = vector.broadcast %cst_226 : f32 to vector<16x1xf32>
    %623 = arith.addf %621, %622 : vector<16x1xf32>
    %624 = tpu.reciprocal %623 : vector<16x1xf32> -> vector<16x1xf32>
    %625 = vector.broadcast %608 : vector<1x32xf32> to vector<16x32xf32>
    %626 = arith.mulf %625, %615 : vector<16x32xf32>
    %627 = vector.broadcast %624 : vector<16x1xf32> to vector<16x32xf32>
    %628 = arith.mulf %626, %627 : vector<16x32xf32>
    %629 = vector.broadcast %609 : vector<1x32xf32> to vector<16x32xf32>
    %630 = arith.addf %628, %629 : vector<16x32xf32>
    %631 = arith.truncf %630 : vector<16x32xf32> to vector<16x32xbf16>
    %c0_227 = arith.constant 0 : index
    %c0_228 = arith.constant 0 : index
    %c0_229 = arith.constant 0 : index
    %632 = vector.load %arg21[%c0_227, %c0_228, %c0_229] : memref<1x32x64xbf16, #tpu.memory_space<vmem>>, vector<1x32x64xbf16>
    %633 = vector.shape_cast %632 : vector<1x32x64xbf16> to vector<32x64xbf16>
    %cst_230 = arith.constant dense<0.000000e+00> : vector<16x64xf32>
    %634 = tpu.matmul %631, %633, %cst_230 {dimension_numbers = #tpu.dot_dimension_numbers<[1], [0], [0], [1], [0, 0, 1, 1], [], []>} : vector<16x32xbf16>, vector<32x64xbf16>, vector<16x64xf32> -> vector<16x64xf32>
    %c0_231 = arith.constant 0 : index
    %c0_232 = arith.constant 0 : index
    %c0_233 = arith.constant 0 : index
    %635 = vector.load %arg22[%c0_231, %c0_232, %c0_233] : memref<1x1x64xf32, #tpu.memory_space<vmem>>, vector<1x1x64xf32>
    %636 = vector.shape_cast %635 : vector<1x1x64xf32> to vector<1x64xf32>
    %637 = vector.broadcast %636 : vector<1x64xf32> to vector<16x64xf32>
    %638 = arith.addf %634, %637 : vector<16x64xf32>
    %cst_234 = arith.constant 0.000000e+00 : f32
    %639 = vector.broadcast %cst_234 : f32 to vector<16x64xf32>
    %640 = arith.maximumf %638, %639 : vector<16x64xf32>
    %641 = arith.truncf %640 : vector<16x64xf32> to vector<16x64xbf16>
    %c0_235 = arith.constant 0 : index
    %c0_236 = arith.constant 0 : index
    %c0_237 = arith.constant 0 : index
    %642 = vector.load %arg23[%c0_235, %c0_236, %c0_237] : memref<1x64x32xbf16, #tpu.memory_space<vmem>>, vector<1x64x32xbf16>
    %643 = vector.shape_cast %642 : vector<1x64x32xbf16> to vector<64x32xbf16>
    %cst_238 = arith.constant dense<0.000000e+00> : vector<16x32xf32>
    %644 = tpu.matmul %641, %643, %cst_238 {dimension_numbers = #tpu.dot_dimension_numbers<[1], [0], [0], [1], [0, 0, 1, 1], [], []>} : vector<16x64xbf16>, vector<64x32xbf16>, vector<16x32xf32> -> vector<16x32xf32>
    %c0_239 = arith.constant 0 : index
    %c0_240 = arith.constant 0 : index
    %c0_241 = arith.constant 0 : index
    %645 = vector.load %arg24[%c0_239, %c0_240, %c0_241] : memref<1x1x32xf32, #tpu.memory_space<vmem>>, vector<1x1x32xf32>
    %646 = vector.shape_cast %645 : vector<1x1x32xf32> to vector<1x32xf32>
    %647 = vector.broadcast %646 : vector<1x32xf32> to vector<16x32xf32>
    %648 = arith.addf %644, %647 : vector<16x32xf32>
    %649 = vector.shape_cast %648 : vector<16x32xf32> to vector<2x8x32xf32>
    %650 = arith.addf %606, %649 : vector<2x8x32xf32>
    %c0_242 = arith.constant 0 : index
    %c0_243 = arith.constant 0 : index
    %c0_244 = arith.constant 0 : index
    %651 = vector.load %arg28[%c0_242, %c0_243, %c0_244] : memref<2x8x32xf32, #tpu.memory_space<vmem>>, vector<2x8x32xf32>
    tpu.vector_store %arg28[%c0_242, %c0_243, %c0_244], %650 {strides = array<i32>} : memref<2x8x32xf32, #tpu.memory_space<vmem>>, vector<2x8x32xf32>,
    %c1_i32 = arith.constant 1 : i32
    %652 = arith.cmpi eq, %arg0, %c1_i32 : i32
    %653 = arith.extui %652 : i1 to i32
    %c0_i32_245 = arith.constant 0 : i32
    %654 = arith.cmpi ne, %653, %c0_i32_245 : i32
    scf.if %654 {
      %655 = vector.shape_cast %650 : vector<2x8x32xf32> to vector<16x32xf32>
      %c0_246 = arith.constant 0 : index
      %c0_247 = arith.constant 0 : index
      %656 = vector.load %arg25[%c0_246, %c0_247] : memref<1x32xf32, #tpu.memory_space<vmem>>, vector<1x32xf32>
      %c0_248 = arith.constant 0 : index
      %c0_249 = arith.constant 0 : index
      %657 = vector.load %arg26[%c0_248, %c0_249] : memref<1x32xf32, #tpu.memory_space<vmem>>, vector<1x32xf32>
      %cst_250 = arith.constant dense<0.000000e+00> : vector<16xf32>
      %658 = vector.multi_reduction <add>, %655, %cst_250 [1] : vector<16x32xf32> to vector<16xf32>
      %659 = vector.shape_cast %658 : vector<16xf32> to vector<16x1xf32>
      %cst_251 = arith.constant 3.200000e+01 : f32
      %660 = vector.broadcast %cst_251 : f32 to vector<16x1xf32>
      %661 = arith.divf %659, %660 : vector<16x1xf32>
      %662 = vector.broadcast %661 : vector<16x1xf32> to vector<16x32xf32>
      %663 = arith.subf %655, %662 : vector<16x32xf32>
      %664 = arith.mulf %663, %663 : vector<16x32xf32>
      %cst_252 = arith.constant dense<0.000000e+00> : vector<16xf32>
      %665 = vector.multi_reduction <add>, %664, %cst_252 [1] : vector<16x32xf32> to vector<16xf32>
      %666 = vector.shape_cast %665 : vector<16xf32> to vector<16x1xf32>
      %cst_253 = arith.constant 0.0322580636 : f32
      %667 = vector.broadcast %cst_253 : f32 to vector<16x1xf32>
      %668 = arith.mulf %666, %667 : vector<16x1xf32>
      %669 = math.sqrt %668 : vector<16x1xf32>
      %cst_254 = arith.constant 9.99999997E-7 : f32
      %670 = vector.broadcast %cst_254 : f32 to vector<16x1xf32>
      %671 = arith.addf %669, %670 : vector<16x1xf32>
      %672 = tpu.reciprocal %671 : vector<16x1xf32> -> vector<16x1xf32>
      %673 = vector.broadcast %656 : vector<1x32xf32> to vector<16x32xf32>
      %674 = arith.mulf %673, %663 : vector<16x32xf32>
      %675 = vector.broadcast %672 : vector<16x1xf32> to vector<16x32xf32>
      %676 = arith.mulf %674, %675 : vector<16x32xf32>
      %677 = vector.broadcast %657 : vector<1x32xf32> to vector<16x32xf32>
      %678 = arith.addf %676, %677 : vector<16x32xf32>
      %679 = vector.shape_cast %678 : vector<16x32xf32> to vector<2x8x32xf32>
      %c0_255 = arith.constant 0 : index
      %c0_256 = arith.constant 0 : index
      %c0_257 = arith.constant 0 : index
      %680 = vector.load %arg27[%c0_255, %c0_256, %c0_257] : memref<2x8x32xf32, #tpu.memory_space<vmem>>, vector<2x8x32xf32>
      tpu.vector_store %arg27[%c0_255, %c0_256, %c0_257], %679 {strides = array<i32>} : memref<2x8x32xf32, #tpu.memory_space<vmem>>, vector<2x8x32xf32>,
    } else {
    }
    return
  }
  func.func @transform_0(%arg0: i32) -> (i32, i32, i32) {
    %c0_i32 = arith.constant 0 : i32
    %c0_i32_0 = arith.constant 0 : i32
    %c0_i32_1 = arith.constant 0 : i32
    %c0_i32_2 = arith.constant 0 : i32
    return %c0_i32, %c0_i32_0, %c0_i32_1 : i32, i32, i32
  }
  func.func @transform_1(%arg0: i32) -> (i32, i32, i32) {
    %c0_i32 = arith.constant 0 : i32
    %c0_i32_0 = arith.constant 0 : i32
    %c0_i32_1 = arith.constant 0 : i32
    %c0_i32_2 = arith.constant 0 : i32
    return %c0_i32, %c0_i32_0, %c0_i32_1 : i32, i32, i32
  }
  func.func @transform_2(%arg0: i32) -> (i32, i32, i32) {
    %c0_i32 = arith.constant 0 : i32
    %c0_i32_0 = arith.constant 0 : i32
    %c0_i32_1 = arith.constant 0 : i32
    %c0_i32_2 = arith.constant 0 : i32
    return %c0_i32, %c0_i32_0, %c0_i32_1 : i32, i32, i32
  }
  func.func @transform_3(%arg0: i32) -> (i32, i32, i32) {
    %c0_i32 = arith.constant 0 : i32
    %c0_i32_0 = arith.constant 0 : i32
    %c0_i32_1 = arith.constant 0 : i32
    %c0_i32_2 = arith.constant 0 : i32
    return %c0_i32, %c0_i32_0, %c0_i32_1 : i32, i32, i32
  }
  func.func @transform_4(%arg0: i32) -> (i32, i32, i32) {
    %c0_i32 = arith.constant 0 : i32
    %c0_i32_0 = arith.constant 0 : i32
    %c0_i32_1 = arith.constant 0 : i32
    %c0_i32_2 = arith.constant 0 : i32
    return %c0_i32, %c0_i32_0, %c0_i32_1 : i32, i32, i32
  }
  func.func @transform_5(%arg0: i32) -> (i32, i32, i32) {
    %c0_i32 = arith.constant 0 : i32
    %c0_i32_0 = arith.constant 0 : i32
    %c0_i32_1 = arith.constant 0 : i32
    %c0_i32_2 = arith.constant 0 : i32
    return %c0_i32, %c0_i32_0, %c0_i32_1 : i32, i32, i32
  }
  func.func @transform_6(%arg0: i32) -> (i32, i32, i32) {
    %c0_i32 = arith.constant 0 : i32
    %c0_i32_0 = arith.constant 0 : i32
    %c0_i32_1 = arith.constant 0 : i32
    %c0_i32_2 = arith.constant 0 : i32
    return %c0_i32, %c0_i32_0, %c0_i32_1 : i32, i32, i32
  }
  func.func @transform_7(%arg0: i32) -> (i32, i32, i32) {
    %c0_i32 = arith.constant 0 : i32
    %c0_i32_0 = arith.constant 0 : i32
    %c0_i32_1 = arith.constant 0 : i32
    %c0_i32_2 = arith.constant 0 : i32
    return %c0_i32, %c0_i32_0, %c0_i32_1 : i32, i32, i32
  }
  func.func @transform_8(%arg0: i32) -> (i32, i32, i32) {
    %c0_i32 = arith.constant 0 : i32
    %c0_i32_0 = arith.constant 0 : i32
    %c0_i32_1 = arith.constant 0 : i32
    return %arg0, %c0_i32, %c0_i32_0 : i32, i32, i32
  }
  func.func @transform_9(%arg0: i32) -> (i32, i32, i32) {
    %c0_i32 = arith.constant 0 : i32
    %c0_i32_0 = arith.constant 0 : i32
    %c0_i32_1 = arith.constant 0 : i32
    return %arg0, %c0_i32, %c0_i32_0 : i32, i32, i32
  }
  func.func @transform_10(%arg0: i32) -> (i32, i32, i32) {
    %c0_i32 = arith.constant 0 : i32
    %c0_i32_0 = arith.constant 0 : i32
    %c0_i32_1 = arith.constant 0 : i32
    return %arg0, %c0_i32, %c0_i32_0 : i32, i32, i32
  }
  func.func @transform_11(%arg0: i32) -> (i32, i32, i32) {
    %c0_i32 = arith.constant 0 : i32
    %c0_i32_0 = arith.constant 0 : i32
    %c0_i32_1 = arith.constant 0 : i32
    return %arg0, %c0_i32, %c0_i32_0 : i32, i32, i32
  }
  func.func @transform_12(%arg0: i32) -> (i32, i32, i32) {
    %c0_i32 = arith.constant 0 : i32
    %c0_i32_0 = arith.constant 0 : i32
    %c0_i32_1 = arith.constant 0 : i32
    return %arg0, %c0_i32, %c0_i32_0 : i32, i32, i32
  }
  func.func @transform_13(%arg0: i32) -> (i32, i32, i32) {
    %c0_i32 = arith.constant 0 : i32
    %c0_i32_0 = arith.constant 0 : i32
    %c0_i32_1 = arith.constant 0 : i32
    return %arg0, %c0_i32, %c0_i32_0 : i32, i32, i32
  }
  func.func @transform_14(%arg0: i32) -> (i32, i32, i32, i32) {
    %c0_i32 = arith.constant 0 : i32
    %c0_i32_0 = arith.constant 0 : i32
    %c0_i32_1 = arith.constant 0 : i32
    %c0_i32_2 = arith.constant 0 : i32
    return %arg0, %c0_i32, %c0_i32_0, %c0_i32_1 : i32, i32, i32, i32
  }
  func.func @transform_15(%arg0: i32) -> (i32, i32, i32, i32) {
    %c0_i32 = arith.constant 0 : i32
    %c0_i32_0 = arith.constant 0 : i32
    %c0_i32_1 = arith.constant 0 : i32
    %c0_i32_2 = arith.constant 0 : i32
    return %arg0, %c0_i32, %c0_i32_0, %c0_i32_1 : i32, i32, i32, i32
  }
  func.func @transform_16(%arg0: i32) -> (i32, i32, i32, i32) {
    %c0_i32 = arith.constant 0 : i32
    %c0_i32_0 = arith.constant 0 : i32
    %c0_i32_1 = arith.constant 0 : i32
    %c0_i32_2 = arith.constant 0 : i32
    return %arg0, %c0_i32, %c0_i32_0, %c0_i32_1 : i32, i32, i32, i32
  }
  func.func @transform_17(%arg0: i32) -> (i32, i32, i32, i32) {
    %c0_i32 = arith.constant 0 : i32
    %c0_i32_0 = arith.constant 0 : i32
    %c0_i32_1 = arith.constant 0 : i32
    %c0_i32_2 = arith.constant 0 : i32
    return %arg0, %c0_i32, %c0_i32_0, %c0_i32_1 : i32, i32, i32, i32
  }
  func.func @transform_18(%arg0: i32) -> (i32, i32, i32, i32) {
    %c0_i32 = arith.constant 0 : i32
    %c0_i32_0 = arith.constant 0 : i32
    %c0_i32_1 = arith.constant 0 : i32
    %c0_i32_2 = arith.constant 0 : i32
    return %arg0, %c0_i32, %c0_i32_0, %c0_i32_1 : i32, i32, i32, i32
  }
  func.func @transform_19(%arg0: i32) -> (i32, i32, i32, i32) {
    %c0_i32 = arith.constant 0 : i32
    %c0_i32_0 = arith.constant 0 : i32
    %c0_i32_1 = arith.constant 0 : i32
    %c0_i32_2 = arith.constant 0 : i32
    return %arg0, %c0_i32, %c0_i32_0, %c0_i32_1 : i32, i32, i32, i32
  }
  func.func @transform_20(%arg0: i32) -> (i32, i32, i32) {
    %c0_i32 = arith.constant 0 : i32
    %c0_i32_0 = arith.constant 0 : i32
    %c0_i32_1 = arith.constant 0 : i32
    return %arg0, %c0_i32, %c0_i32_0 : i32, i32, i32
  }
  func.func @transform_21(%arg0: i32) -> (i32, i32, i32) {
    %c0_i32 = arith.constant 0 : i32
    %c0_i32_0 = arith.constant 0 : i32
    %c0_i32_1 = arith.constant 0 : i32
    return %arg0, %c0_i32, %c0_i32_0 : i32, i32, i32
  }
  func.func @transform_22(%arg0: i32) -> (i32, i32, i32) {
    %c0_i32 = arith.constant 0 : i32
    %c0_i32_0 = arith.constant 0 : i32
    %c0_i32_1 = arith.constant 0 : i32
    return %arg0, %c0_i32, %c0_i32_0 : i32, i32, i32
  }
  func.func @transform_23(%arg0: i32) -> (i32, i32, i32) {
    %c0_i32 = arith.constant 0 : i32
    %c0_i32_0 = arith.constant 0 : i32
    %c0_i32_1 = arith.constant 0 : i32
    return %arg0, %c0_i32, %c0_i32_0 : i32, i32, i32
  }
  func.func @transform_24(%arg0: i32) -> (i32, i32) {
    %c0_i32 = arith.constant 0 : i32
    %c0_i32_0 = arith.constant 0 : i32
    %c0_i32_1 = arith.constant 0 : i32
    return %c0_i32, %c0_i32_0 : i32, i32
  }
  func.func @transform_25(%arg0: i32) -> (i32, i32) {
    %c0_i32 = arith.constant 0 : i32
    %c0_i32_0 = arith.constant 0 : i32
    %c0_i32_1 = arith.constant 0 : i32
    return %c0_i32, %c0_i32_0 : i32, i32
  }
  func.func @transform_26(%arg0: i32) -> (i32, i32, i32) {
    %c0_i32 = arith.constant 0 : i32
    %c0_i32_0 = arith.constant 0 : i32
    %c0_i32_1 = arith.constant 0 : i32
    %c0_i32_2 = arith.constant 0 : i32
    return %c0_i32, %c0_i32_0, %c0_i32_1 : i32, i32, i32
  }
}

</mosaic_0001>

<bundles_post_ra>
// kernel: tpu_custom_call.1
= control target key start
LH: loop header
LB: loop body
LE: loop exit
PB: predicated region body
PF: predicated region fallthrough
CT: control target
= control target key end

     0   :  { %s8033_s0 = inlined_call_operand.hbm [shape: f32[2,8,32], index: 0, kind: input, shape index: {}]   ;;  %s8034_s1 = inlined_call_operand.hbm [shape: f32[2,1,8], index: 1, kind: input, shape index: {}]   ;;  %s8035_s2 = inlined_call_operand.vmem [shape: f32[2,6,32], index: 2, kind: input, shape index: {}]   ;;  %s8036_s3 = inlined_call_operand.hbm [shape: f32[2,1,6], index: 3, kind: input, shape index: {}]   ;;  %s8037_s4 = inlined_call_operand.vmem [shape: f32[2,6,32], index: 4, kind: input, shape index: {}]   ;;  %s8038_s5 = inlined_call_operand.hbm [shape: f32[2,1,6], index: 5, kind: input, shape index: {}]   ;;  %s8039_s6 = inlined_call_operand.vmem [shape: f32[2,6,32], index: 6, kind: input, shape index: {}]   ;;  %s8040_s7 = inlined_call_operand.hbm [shape: f32[2,1,6], index: 7, kind: input, shape index: {}]   ;;  %s8041_s8 = inlined_call_operand.vmem [shape: f32[2,5,32], index: 8, kind: input, shape index: {}]   ;;  %s8042_s9 = inlined_call_operand.vmem [shape: f32[2,5,32], index: 9, kind: input, shape index: {}]   ;;  %s8043_s10 = inlined_call_operand.vmem [shape: bf16[2,32,96], index: 10, kind: input, shape index: {}]   ;;  %s8044_s11 = inlined_call_operand.hbm [shape: f32[2,1,96], index: 11, kind: input, shape index: {}]   ;;  %s8045_s12 = inlined_call_operand.hbm [shape: bf16[2,32,32], index: 12, kind: input, shape index: {}]   ;;  %s8046_s13 = inlined_call_operand.hbm [shape: f32[2,1,32], index: 13, kind: input, shape index: {}]   ;;  %s8047_s14 = inlined_call_operand.vmem [shape: bf16[2,3,32,32], index: 14, kind: input, shape index: {}]   ;;  %s8048_s15 = inlined_call_operand.vmem [shape: f32[2,3,1,32], index: 15, kind: input, shape index: {}]   ;;  %s8049_s16 = inlined_call_operand.hbm [shape: bf16[2,3,32,64], index: 16, kind: input, shape index: {}]   ;;  %s8050_s17 = inlined_call_operand.vmem [shape: f32[2,3,1,64], index: 17, kind: input, shape index: {}]   ;;  %s8051_s18 = inlined_call_operand.hbm [shape: bf16[2,3,32,32], index: 18, kind: input, shape index: {}]   ;;  %s8052_s19 = inlined_call_operand.hbm [shape: f32[2,3,1,32], index: 19, kind: input, shape index: {}]   ;;  %s8053_s20 = inlined_call_operand.vmem [shape: bf16[2,32,64], index: 20, kind: input, shape index: {}]   ;;  %s8054_s21 = inlined_call_operand.vmem [shape: f32[2,1,64], index: 21, kind: input, shape index: {}]   ;;  %s8055_s22 = inlined_call_operand.vmem [shape: bf16[2,64,32], index: 22, kind: input, shape index: {}]   ;;  %s8056_s23 = inlined_call_operand.vmem [shape: f32[2,1,32], index: 23, kind: input, shape index: {}]   ;;  %s8057_s24 = inlined_call_operand.vmem [shape: f32[1,32], index: 24, kind: input, shape index: {}]   ;;  %s8058_s25 = inlined_call_operand.vmem [shape: f32[1,32], index: 25, kind: input, shape index: {}]   ;;  %s8059_s26 = inlined_call_operand.hbm [shape: f32[2,8,32], index: 26, kind: output, shape index: {}]  }
   0x1   :  { %8082 = sst [smem:[#allocation35_spill]] %s8033_s0 }
   0x2   :  { %8083 = sst [smem:[#allocation36_spill]] %s8034_s1 }
   0x3   :  { %8084 = sst [smem:[#allocation37_spill]] %s8035_s2 }
   0x4   :  { %8085 = sst [smem:[#allocation38_spill]] %s8036_s3 }
   0x5   :  { %8086 = sst [smem:[#allocation39_spill]] %s8037_s4 }
   0x6   :  { %8087 = sst [smem:[#allocation40_spill]] %s8038_s5 }
   0x7   :  { %8088 = sst [smem:[#allocation41_spill]] %s8039_s6 }
   0x8   :  { %8089 = sst [smem:[#allocation42_spill]] %s8040_s7 }
   0x9   :  { %8090 = sst [smem:[#allocation43_spill]] %s8041_s8 }
   0xa   :  { %8091 = sst [smem:[#allocation44_spill]] %s8042_s9 }
   0xb   :  { %8092 = sst [smem:[#allocation45_spill]] %s8043_s10 }
   0xc   :  { %8093 = sst [smem:[#allocation46_spill]] %s8044_s11 }
   0xd   :  { %8094 = sst [smem:[#allocation47_spill]] %s8045_s12 }
   0xe   :  { %8095 = sst [smem:[#allocation48_spill]] %s8046_s13 }
   0xf   :  { %8096 = sst [smem:[#allocation49_spill]] %s8047_s14 }
  0x10   :  { %8097 = sst [smem:[#allocation50_spill]] %s8048_s15 }
  0x11   :  { %8098 = sst [smem:[#allocation51_spill]] %s8049_s16 }
  0x12   :  { %8099 = sst [smem:[#allocation52_spill]] %s8050_s17 }
  0x13   :  { %8100 = sst [smem:[#allocation53_spill]] %s8051_s18 }
  0x14   :  { %8101 = sst [smem:[#allocation54_spill]] %s8052_s19 }
  0x15   :  { %8102 = sst [smem:[#allocation55_spill]] %s8053_s20 }
  0x16   :  { %8103 = sst [smem:[#allocation56_spill]] %s8054_s21 }
  0x17   :  { %8104 = sst [smem:[#allocation57_spill]] %s8055_s22 }
  0x18   :  { %8105 = sst [smem:[#allocation58_spill]] %s8056_s23 }
  0x19   :  { %8106 = sst [smem:[#allocation59_spill]] %s8057_s24 }
  0x1a   :  { %8107 = sst [smem:[#allocation60_spill]] %s8058_s25 }
  0x1b   :  { %8108 = sst [smem:[#allocation61_spill]] %s8059_s26 }
  0x1c   :  { %31 = vsyncpa [#allocation4], 0 }
  0x1d   :  { %32 = vsyncpa [#allocation7], 0 }
  0x1e   :  { %33 = vsyncpa [#allocation10], 0 }
  0x1f   :  { %34 = vsyncpa [#allocation13], 0 }
  0x20   :  { %36 = vsyncpa [#allocation13 + $0x1], 0 }
  0x21   :  { %37 = vsyncpa [#allocation16], 0 }
  0x22   :  { %39 = vsyncpa [#allocation16 + $0x1], 0 }
  0x23   :  { %40 = vsyncpa [#allocation19], 0 }
  0x24   :  { %42 = vsyncpa [#allocation19 + $0x1], 0 }
  0x25   :  { %43 = vsyncpa [#allocation5], 0  ;;  %s6556_s27 = smov 0   ;;  %s6558_s3 = smov 0  }
  0x26   :  { %s6560_s7 = smov 0   ;;  %s6562_s28 = smov 0  }
  0x27 LB: > { %8109 = sst [smem:[#allocation29_spill]] %s6383_s3  ;;  %s6580_s9 = sadd.s32 4294967295, %s6391_s28   ;;  %s6391_s28 = sphi %s6562_s28, %s8162_s28   ;;  %s6387_s7 = sphi %s6560_s7, %s8165_s7   ;;  %s6383_s3 = sphi %s6558_s3, %s8164_s3   ;;  %s6379_s27 = sphi %s6556_s27, %s8163_s27  }
  0x28   : > { %8110 = sst [smem:[#allocation30_spill]] %s6387_s7  ;;  %p5271_p0 = scmp.ge.s32.totalorder %s6391_s28, 1 }
  0x29   : > { %s8111_s29 = sld [smem:[#allocation36_spill]]  ;;  %p316_p1 = scmp.eq.s32.totalorder %s6580_s9, 0 }
  0x2a   : > { %p701_p2 = scmp.lt.s32.totalorder %s6391_s28, 3  ;;  %p5272_p3 = scmp.ne.s32.totalorder %s6580_s9, 0 }
  0x2b   : > { %s6393_s2 = smov [#allocation6]   ;;  %s8113_s1 = sld [smem:[#allocation40_spill]] }
  0x2c   : > { %p6586_p4 = pnand %p5271_p0, %p701_p2  ;;  %s728_s5 = sshll.u32 %s6393_s2, 4  ;;  %s729_s5 = int_to_ptr.vmem [resolvable:$true] %s728_s5 }
  0x2d   : > { %s8063_s26 = smov 16   ;;  %s8065_s10 = smov 1  }
  0x2e   : > { %p5602_p5 = pneg %p6586_p4  ;;  %s6612_s6 = sadd.s32 1, %s6391_s28  }
  0x2f   : > { %s726_s0 = sshll.u32 %s8111_s29, 4  ;;  %s6394_s29 = smov [#allocation9]   ;;  %s727_s0 = int_to_ptr.hbm [resolvable:$true] %s726_s0 }
  0x30   : > { %p6597_p6 = pnand %p5602_p5, %p316_p1  ;;  %s762_s2 = sshll.u32 %s6394_s29, 4  ;;  %s763_s2 = int_to_ptr.vmem [resolvable:$true] %s762_s2 }
  0x31   : > { %s760_s8 = sshll.u32 %s8113_s1, 4  ;;  %8115 = sst [smem:[#allocation31_spill]] %s6612_s6  ;;  %s761_s8 = int_to_ptr.hbm [resolvable:$true] %s760_s8 }
  0x32   : > { %5608 = dma.hbm_to_vmem [thread:$0]  (!%p6597_p6), %s727_s0, 32, %s729_s5, [#allocation7], %s8063_s26, %s8063_s26, %s8065_s10  }
  0x33   : > { %5614 = dma.hbm_to_vmem [thread:$0]  (!%p6597_p6), %s761_s8, 32, %s763_s2, [#allocation10], %s8063_s26, %s8063_s26, %s8065_s10  }
  0x34   : > { %s302_s1 = sadd.s32 1, %s6387_s7  ;;  %s299_s29 = ssub.s32 %s6391_s28, %s6612_s6 }
  0x35   : > { %p309_p7 = scmp.ne.s32.totalorder %s6387_s7, %s6383_s3  ;;  %p300_p8 = scmp.eq.s32.totalorder %s299_s29, 0 }
  0x36   : > { %p310_p9 = scmp.eq.s32.totalorder %s6391_s28, 0  ;;  %p315_p10 = scmp.ne.s32.totalorder %s6383_s3, %s6379_s27 }
  0x37   : > { %p5642_p11 = scmp.lt.s32.totalorder %s6391_s28, 2  ;;  %s6633_s5 = sand.u32 1, %s6391_s28  }
  0x38   : > { %s6624_s25 = scalar_select %p300_p8, %s6387_s7, %s302_s1  }
  0x39   : > { %p311_p12 = por %p310_p9, %p309_p7  ;;  %p6628_p13 = por %p316_p1, %p315_p10 }
  0x3a   : > { %8116 = sst [smem:[#allocation32_spill]] %s6624_s25  ;;  %s6636_s8 = sand.u32 1, %s6387_s7  }
  0x3b   : > { %s8118_s11 = sld [smem:[#allocation46_spill]]  ;;  %s824_s27 = scalar_lea.vmem [#allocation12], %s6636_s8 }
  0x3c   : > { %s831_s10 = sshll.u32 %s824_s27, 4  ;;  %p6643_p0 = pnand %p5642_p11, %p311_p12  ;;  %s832_s10 = int_to_ptr.vmem [resolvable:$true] %s831_s10 }
  0x3d   : > { %s8070_s6 = scalar_lea.sflag [#allocation13], %s6633_s5 }
  0x3e   : > { %p6650_p5 = pneg %p6643_p0 }
  0x41   : > { %s827_s29 = scalar_lea.hbm %s8118_s11, %s6391_s28  ;;  %s6042_s27 = scalar_lea.hbm %s8118_s11, 2 }
  0x42   : > { %s829_s1 = sshll.u32 %s827_s29, 4  ;;  %s830_s1 = int_to_ptr.hbm [resolvable:$true] %s829_s1 }
  0x43   : > { %s6035_s24 = sshra.s32 %s830_s1, 4  ;;  %s6036_s24 = int_to_ptr.hbm [resolvable:$true] %s6035_s24 }
  0x44   : > { %s6037_s7 = scalar_lea.hbm %s6036_s24, 1  ;;  %p6043_p9 = scmp.lt.s32.totalorder %s6036_s24, %s8118_s11 }
  0x45   : > { %p6038_p2 = scmp.ne.s32.totalorder %s6036_s24, %s6037_s7  ;;  %p6044_p10 = scmp.lt.s32.totalorder %s6042_s27, %s6037_s7 }
  0x47   : > { %p6040_p7 = pnand %p6650_p5, %p6038_p2  ;;  %p6045_p11 = por %p6044_p10, %p6043_p9 }
  0x49   : > { %p6041_p8 = pneg %p6040_p7 }
  0x4b   : > { %p6046_p12 = pnand %p6045_p11, %p6041_p8 }
  0x4d   : > { %6049 = shalt.err (!%p6046_p12)
}
  0x4e   : > { %5621 = dma.hbm_to_vmem [thread:$0]  (!%p6643_p0), %s830_s1, 16, %s832_s10, %s8070_s6  }
  0x4f   : > { %s8121_s13 = sld [smem:[#allocation48_spill]]  ;;  %s863_s15 = scalar_lea.vmem [#allocation15], %s6636_s8 }
  0x50   : > { %s870_s22 = sshll.u32 %s863_s15, 4  ;;  %s8071_s24 = scalar_lea.sflag [#allocation16], %s6633_s5  ;;  %s871_s22 = int_to_ptr.vmem [resolvable:$true] %s870_s22 }
  0x55   : > { %s866_s29 = scalar_lea.hbm %s8121_s13, %s6391_s28  ;;  %s6072_s10 = scalar_lea.hbm %s8121_s13, 2 }
  0x56   : > { %s868_s23 = sshll.u32 %s866_s29, 4  ;;  %s869_s23 = int_to_ptr.hbm [resolvable:$true] %s868_s23 }
  0x57   : > { %s6065_s7 = sshra.s32 %s869_s23, 4  ;;  %s6066_s7 = int_to_ptr.hbm [resolvable:$true] %s6065_s7 }
  0x58   : > { %s6067_s27 = scalar_lea.hbm %s6066_s7, 1  ;;  %p6073_p9 = scmp.lt.s32.totalorder %s6066_s7, %s8121_s13 }
  0x59   : > { %p6068_p2 = scmp.ne.s32.totalorder %s6066_s7, %s6067_s27  ;;  %p6074_p10 = scmp.lt.s32.totalorder %s6072_s10, %s6067_s27 }
  0x5b   : > { %p6070_p7 = pnand %p6068_p2, %p6650_p5  ;;  %p6075_p11 = por %p6074_p10, %p6073_p9 }
  0x5d   : > { %p6071_p8 = pneg %p6070_p7 }
  0x5f   : > { %p6076_p12 = pnand %p6075_p11, %p6071_p8 }
  0x61   : > { %6079 = shalt.err (!%p6076_p12)
}
  0x62   : > { %5627 = dma.hbm_to_vmem [thread:$0]  (!%p6643_p0), %s869_s23, 16, %s871_s22, %s8071_s24  }
  0x63   : > { %s8072_s11 = smul.u32 48, %s6636_s8  ;;  %s8122_s29 = sld [smem:[#allocation35_spill]] }
  0x64   : > { %s8073_s15 = smul.u32 48, %s6391_s28  ;;  %s8123_s18 = sld [smem:[#allocation53_spill]] }
  0x65   : > { %s925_s17 = scalar_lea.vmem [#allocation18], %s8072_s11  ;;  %s8074_s22 = scalar_lea.sflag [#allocation19], %s6633_s5 }
  0x66   : > { %s933_s6 = sshll.u32 %s925_s17, 4  ;;  %s934_s6 = int_to_ptr.vmem [resolvable:$true] %s933_s6 }
  0x69   : > { %s712_s7 = sshll.u32 %s8122_s29, 4  ;;  %s6689_s7 = int_to_ptr.hbm [resolvable:$true] %s712_s7 }
  0x6a   : > { %s930_s1 = scalar_lea.hbm %s8123_s18, %s8073_s15  ;;  %s6102_s29 = scalar_lea.hbm %s8123_s18, 96 }
  0x6b   : > { %s931_s13 = sshll.u32 %s930_s1, 4  ;;  %s932_s13 = int_to_ptr.hbm [resolvable:$true] %s931_s13 }
  0x6c   : > { %s6095_s23 = sshra.s32 %s932_s13, 4  ;;  %s6096_s23 = int_to_ptr.hbm [resolvable:$true] %s6095_s23 }
  0x6d   : > { %s6097_s24 = scalar_lea.hbm %s6096_s23, 48  ;;  %p6103_p9 = scmp.lt.s32.totalorder %s6096_s23, %s8123_s18 }
  0x6e   : > { %p6098_p2 = scmp.ne.s32.totalorder %s6096_s23, %s6097_s24  ;;  %p6104_p10 = scmp.lt.s32.totalorder %s6102_s29, %s6097_s24 }
  0x70   : > { %p6100_p7 = pnand %p6098_p2, %p6650_p5  ;;  %p6105_p11 = por %p6104_p10, %p6103_p9 }
  0x72   : > { %p6101_p8 = pneg %p6100_p7 }
  0x74   : > { %p6106_p12 = pnand %p6105_p11, %p6101_p8 }
  0x76   : > { %6109 = shalt.err (!%p6106_p12)
}
  0x77   : > { %s8075_s1 = smov 64   ;;  %s8077_s17 = smov 4  }
  0x78   : > { %5633 = dma.hbm_to_vmem [thread:$0]  (!%p6643_p0), %s932_s13, 768, %s934_s6, %s8074_s22, %s8075_s1, %s8075_s1, %s8077_s17  }
  0x79   : > { %s6399_s21 = smov [#allocation3]   ;;  %s6400_s24 = smov 128  }
  0x7a   : > { %s714_s23 = sshll.u32 %s6399_s21, 4  ;;  %s6401_s2 = smov 8   ;;  %s715_s23 = int_to_ptr.vmem [resolvable:$true] %s714_s23 }
  0x7b   : > { %5605 = dma.hbm_to_vmem [thread:$0]  (!%p6597_p6), %s6689_s7, 256, %s715_s23, [#allocation4], %s6400_s24, %s6400_s24, %s6401_s2  }
  0x7c   : > { %s8124_s10 = sld [smem:[#allocation38_spill]]  ;;  %s6402_s15 = smov [#allocation8]  }
  0x7d   : > { %s745_s18 = sshll.u32 %s6402_s15, 4  ;;  %s8125_s6 = sld [smem:[#allocation42_spill]]  ;;  %s746_s18 = int_to_ptr.vmem [resolvable:$true] %s745_s18 }
  0x7e   : > { %s8126_s22 = smov 1   ;;  %s8127_s1 = smov 16  }
  0x7f   : > { %s6403_s7 = smov [#allocation11]   ;;  %s5278_s24 = sshll.u32 %s6636_s8, 4 }
  0x80   : > { %s779_s23 = sshll.u32 %s6403_s7, 4  ;;  %s5524_s15 = sshll.u32 %s6391_s28, 4  ;;  %s780_s23 = int_to_ptr.vmem [resolvable:$true] %s779_s23 }
  0x81   : > { %s842_s14 = scalar_lea.vmem [#allocation14], %s5278_s24  ;;  %s8128_s12 = sld [smem:[#allocation47_spill]] }
  0x82   : > { %s743_s11 = sshll.u32 %s8124_s10, 4  ;;  %s850_s2 = sshll.u32 %s842_s14, 4  ;;  %s744_s11 = int_to_ptr.hbm [resolvable:$true] %s743_s11  ;;  %s851_s2 = int_to_ptr.vmem [resolvable:$true] %s850_s2 }
  0x83   : > { %s777_s21 = sshll.u32 %s8125_s6, 4  ;;  %s8130_s16 = sld [smem:[#allocation51_spill]]  ;;  %s778_s21 = int_to_ptr.hbm [resolvable:$true] %s777_s21 }
  0x84   : > { %5611 = dma.hbm_to_vmem [thread:$0]  (!%p6597_p6), %s744_s11, 32, %s746_s18, [#allocation7], %s8127_s1, %s8127_s1, %s8126_s22  }
  0x85   : > { %5617 = dma.hbm_to_vmem [thread:$0]  (!%p6597_p6), %s778_s21, 32, %s780_s23, [#allocation10], %s8127_s1, %s8127_s1, %s8126_s22  }
  0x86   : > { %s8129_s11 = smul.u32 48, %s6391_s28 }
  0x87   : > { %s847_s10 = scalar_lea.hbm %s8128_s12, %s5524_s15  ;;  %s6222_s24 = scalar_lea.hbm %s8128_s12, 32 }
  0x88   : > { %s848_s18 = sshll.u32 %s847_s10, 4  ;;  %s849_s18 = int_to_ptr.hbm [resolvable:$true] %s848_s18 }
  0x89   : > { %s901_s7 = scalar_lea.hbm %s8130_s16, %s8129_s11  ;;  %s6215_s4 = sshra.s32 %s849_s18, 4  ;;  %s6216_s4 = int_to_ptr.hbm [resolvable:$true] %s6215_s4 }
  0x8a   : > { %s6217_s17 = scalar_lea.hbm %s6216_s4, 16  ;;  %p6223_p8 = scmp.lt.s32.totalorder %s6216_s4, %s8128_s12 }
  0x8b   : > { %p6218_p2 = scmp.ne.s32.totalorder %s6216_s4, %s6217_s17  ;;  %p6224_p9 = scmp.lt.s32.totalorder %s6222_s24, %s6217_s17 }
  0x8d   : > { %p6220_p6 = pnand %p6218_p2, %p6650_p5  ;;  %p6225_p10 = por %p6224_p9, %p6223_p8 }
  0x8f   : > { %p6221_p7 = pneg %p6220_p6 }
  0x91   : > { %p6226_p11 = pnand %p6225_p10, %p6221_p7 }
  0x93   : > { %6229 = shalt.err (!%p6226_p11)
}
  0x94   : > { %s8131_s29 = smov 4   ;;  %s8132_s27 = smov 64  }
  0x95   : > { %s8133_s10 = scalar_lea.sflag [#allocation13], %s6633_s5  ;;  %s902_s11 = sshll.u32 %s901_s7, 4  ;;  %s903_s11 = int_to_ptr.hbm [resolvable:$true] %s902_s11 }
  0x96   : > { %5624 = dma.hbm_to_vmem [thread:$0]  (!%p6643_p0), %s849_s18, 256, %s851_s2, %s8133_s10, %s8132_s27, %s8132_s27, %s8131_s29  }
  0x97   : > { %s8134_s13 = smul.u32 48, %s6636_s8  ;;  %s6245_s17 = sshra.s32 %s903_s11, 4  ;;  %s6246_s17 = int_to_ptr.hbm [resolvable:$true] %s6245_s17 }
  0x98   : > { %s6247_s4 = scalar_lea.hbm %s6246_s17, 48  ;;  %s6252_s15 = scalar_lea.hbm %s8130_s16, 96 }
  0x99   : > { %s896_s6 = scalar_lea.vmem [#allocation17], %s8134_s13  ;;  %p6248_p12 = scmp.ne.s32.totalorder %s6246_s17, %s6247_s4 }
  0x9a   : > { %s904_s21 = sshll.u32 %s896_s6, 4  ;;  %p6253_p7 = scmp.lt.s32.totalorder %s6246_s17, %s8130_s16  ;;  %s905_s21 = int_to_ptr.vmem [resolvable:$true] %s904_s21 }
  0x9b   : > { %p6250_p2 = pnand %p6248_p12, %p6650_p5  ;;  %p6254_p8 = scmp.lt.s32.totalorder %s6252_s15, %s6247_s4 }
  0x9d   : > { %p6251_p6 = pneg %p6250_p2  ;;  %p6255_p9 = por %p6254_p8, %p6253_p7 }
  0x9f   : > { %p6256_p10 = pnand %p6255_p9, %p6251_p6 }
  0xa1   : > { %6259 = shalt.err (!%p6256_p10)
}
  0xa2   : > { %s8135_s2 = scalar_lea.sflag [#allocation16], %s6633_s5  ;;  %s5560_s18 = smul.u32 3, %s6636_s8 }
  0xa3   : > { %5630 = dma.hbm_to_vmem [thread:$0]  (!%p6643_p0), %s903_s11, 768, %s905_s21, %s8135_s2, %s8132_s27, %s8132_s27, %s8131_s29  }
  0xa4   : > { %s5561_s7 = smul.u32 3, %s6391_s28  ;;  %s8136_s19 = sld [smem:[#allocation54_spill]] }
  0xa5   : > { %s947_s6 = scalar_lea.vmem [#allocation20], %s5560_s18 }
  0xa6   : > { %s954_s17 = sshll.u32 %s947_s6, 4  ;;  %s955_s17 = int_to_ptr.vmem [resolvable:$true] %s954_s17 }
  0xaa   : > { %s951_s13 = scalar_lea.hbm %s8136_s19, %s5561_s7  ;;  %s6282_s28 = scalar_lea.hbm %s8136_s19, 6 }
  0xab   : > { %s952_s4 = sshll.u32 %s951_s13, 4  ;;  %s953_s4 = int_to_ptr.hbm [resolvable:$true] %s952_s4 }
  0xac   : > { %s6275_s23 = sshra.s32 %s953_s4, 4  ;;  %s6276_s23 = int_to_ptr.hbm [resolvable:$true] %s6275_s23 }
  0xad   : > { %s6277_s24 = scalar_lea.hbm %s6276_s23, 3  ;;  %p6283_p6 = scmp.lt.s32.totalorder %s6276_s23, %s8136_s19 }
  0xae   : > { %p6278_p11 = scmp.ne.s32.totalorder %s6276_s23, %s6277_s24  ;;  %p6284_p7 = scmp.lt.s32.totalorder %s6282_s28, %s6277_s24 }
  0xb0   : > { %p6280_p12 = pnand %p6278_p11, %p6650_p5  ;;  %p6285_p8 = por %p6284_p7, %p6283_p6 }
  0xb2   : > { %p6281_p2 = pneg %p6280_p12 }
  0xb4   : > { %p6286_p9 = pnand %p6285_p8, %p6281_p2 }
  0xb6   : > { %6289 = shalt.err (!%p6286_p9)
}
  0xb7   : > { %s8137_s26 = scalar_lea.sflag [#allocation19], %s6633_s5  ;;  %994 = sbr.rel (%p6586_p4) target bundleno = 6779 (0x1a7b), region = 124 }
  0xb8   : > { %5636 = dma.hbm_to_vmem [thread:$0]  (!%p6643_p0), %s953_s4, 48, %s955_s17, %s8137_s26, %s8127_s1, %s8127_s1, %s8126_s22  }
  0xbc   : > { %6350 = dma.done.wait (%p316_p1), [#allocation4], 256  }
  0xbd   : > { %6352 = vsyncadd (%p316_p1), [#allocation4], 4294967040 }
  0xbe   : > { %6354 = dma.done.wait (%p316_p1), [#allocation7], 64  }
  0xbf   : > { %6356 = vsyncadd (%p316_p1), [#allocation7], 4294967232 }
  0xc0   : > { %6358 = dma.done.wait (%p316_p1), [#allocation10], 64  }
  0xc1   : > { %6360 = vsyncadd (%p316_p1), [#allocation10], 4294967232  ;;  %s1021_s25 = sand.u32 1, %s6580_s9   ;;  %s6811_s30 = sand.u32 1, %s6383_s3  }
  0xc2   : > { %s1022_s5 = scalar_lea.sflag [#allocation13], %s1021_s25 }
  0xc3   : > { %6362 = dma.done.wait (%p6628_p13), %s1022_s5, 272  }
  0xc4   : > { %6364 = vsyncadd (%p6628_p13), %s1022_s5, 4294967024  ;;  %s5289_s1 = sshll.u32 %s6811_s30, 4  ;;  %s1041_s21 = scalar_lea.sflag [#allocation16], %s1021_s25 }
  0xc5   : > { %s6819_s11 = scalar_lea.vmem [#allocation14], %s5289_s1 }
  0xc6   : > { %6366 = dma.done.wait (%p6628_p13), %s1041_s21, 784  }
  0xc7   : > { %6368 = vsyncadd (%p6628_p13), %s1041_s21, 4294966512  ;;  %s5562_s2 = smul.u32 48, %s6811_s30  ;;  %s1060_s7 = scalar_lea.sflag [#allocation19], %s1021_s25 }
  0xc9   : > { %s6827_s18 = scalar_lea.vmem [#allocation17], %s5562_s2  ;;  %s6829_s10 = scalar_lea.vmem [#allocation18], %s5562_s2 }
  0xca   : > { %8138 = sst [smem:[#allocation33_spill]] %s6829_s10 }
  0xcb   : > { %6370 = dma.done.wait (%p6628_p13), %s1060_s7, 816  }
  0xcc   : > { %6372 = vsyncadd (%p6628_p13), %s1060_s7, 4294966480  ;;  %s5563_s12 = smul.u32 3, %s6811_s30  ;;  %p1203_p1 = scmp.lt.s32.totalorder %s6580_s9, 1 }
  0xcd   : > { %s8139_s0 = sld [smem:[#allocation43_spill]] }
  0xce   : > { %s6838_s13 = scalar_select %p1203_p1, %s6580_s9, 1 }
  0xcf   : > { %s8140_s28 = sld [smem:[#allocation44_spill]] }
  0xd0   : > { %s5290_s6 = sshll.u32 %s6838_s13, 3  ;;  %s5525_s17 = sshll.u32 %s6838_s13, 4 }
  0xd1   : > { %s8141_s25 = sld [smem:[#allocation45_spill]]  ;;  %s5564_s1 = smul.u32 48, %s6838_s13 }
  0xd2   : > { %s5565_s21 = smul.u32 3, %s6838_s13  ;;  %s8142_s20 = sld [smem:[#allocation55_spill]] }
  0xd3   : > { %s6845_s24 = scalar_lea.vmem %s8139_s0, %s5290_s6  ;;  %s8144_s0 = sld [smem:[#allocation49_spill]] }
  0xd4   : > { %s8145_s29 = sld [smem:[#allocation56_spill]] }
  0xd5   : > { %s6850_s8 = scalar_lea.vmem %s8140_s28, %s5290_s6  ;;  %s8146_s26 = sld [smem:[#allocation50_spill]] }
  0xd6   : > { %s8147_s10 = sld [smem:[#allocation52_spill]]  ;;  %s6893_s6 = scalar_lea.vmem [#allocation20], %s5563_s12 }
  0xd7   : > { %s6855_s5 = scalar_lea.vmem %s8141_s25, %s5525_s17  ;;  %s8148_s4 = sld [smem:[#allocation58_spill]] }
  0xd8   : > { %s6862_s14 = scalar_lea.vmem %s8142_s20, %s5525_s17  ;;  %s5527_s17 = sshll.u32 %s6838_s13, 5 }
  0xd9   : > { %8143 = sst [smem:[#allocation34_spill]] %s6862_s14  ;;  %s6867_s22 = scalar_lea.vmem %s8144_s0, %s5564_s1 }
  0xda   : > { %s1236_s28 = scalar_lea.vmem %s8145_s29, %s6838_s13  ;;  %s8149_s14 = sld [smem:[#allocation57_spill]] }
  0xdb   : > { %s6876_s25 = scalar_lea.vmem %s8146_s26, %s5565_s21 }
  0xdc   : > { %s6881_s2 = scalar_lea.vmem %s8147_s10, %s5565_s21  ;;  %1249 = sbr.rel (%p5272_p3) target bundleno = 228 (0xe4), region = 172 }
  0xdd   : > { %s1244_s1 = scalar_lea.vmem %s8148_s4, %s6838_s13 }
  0xe0   : > { %s6891_s15 = scalar_lea.vmem %s8149_s14, %s5527_s17 }
  0xe1   : > { %v1250_v0 = vld [vmem:[#allocation3] sm:$0xff]  ;;  %vm1252_vm0 = vcmask 261120   ;;  %v1251_v1 = vld [vmem:[#allocation3 + $0x8] sm:$0xff] }
  0xe2   : > { %1253 = vst.msk [vmem:[#allocation2] sm:$0xff] %vm1252_vm0, %v1250_v0 }
  0xe3   : > { %1254 = vst.msk [vmem:[#allocation2 + $0x8] sm:$0xff] %vm1252_vm0, %v1251_v1 }
  0xe4 PF: > { %vm1261_vm1 = vcmask 261120   ;;  %v6404_v6 = vmov 32.0   ;;  %v5529_v23 = vld [vmem:[%s6855_s5 + $0x8] sm:$0xff]  ;;  %v5528_v25 = vld [vmem:[%s6855_s5] sm:$0xff]  ;;  %s8150_s16 = scalar_lea.vmem [#allocation12], %s6811_s30  ;;  %s6405_s19 = smov 88  }
  0xe5   : > { %5791 = vrcp.f32 %v6404_v6  ;;  %1381 = vmatpush.bf16.msra.mxu0 %v5529_v23  ;;  %v6924_v57 = vld [vmem:[%s6845_s24] sm:$0x1f]  ;;  %s6406_s20 = smov 96   ;;  %s6407_s3 = smov 80   ;;  %vm1401_vm15 = vcmask 64512   ;;  %vm1484_vm0 = vcmask 1043456  }
  0xe6   : > { %v1343_v61 = vperm.slane %v6924_v57, 0  ;;  %v6928_v6 = vld [vmem:[%s6850_s8] sm:$0x1f]  ;;  %s6408_s14 = smov 112   ;;  %s6409_s10 = smov 72  }
  0xe7   : > { %s6410_s12 = smov 120   ;;  %s6411_s5 = smov 104  }
  0xe8   : > { %s6412_s21 = smov 64   ;;  %s6413_s29 = smov 56  }
  0xe9   : > { %v6897_v2 = vld [vmem:[#allocation2] sm:$0xff]  ;;  %1382 = vmatpush.bf16.msra.mxu0 %v5528_v25  ;;  %s6414_s27 = smov 48   ;;  %s6415_s26 = smov 40  }
  0xea   : > { %v6899_v3 = vld [vmem:[#allocation2 + $0x8] sm:$0xff]  ;;  %v1262_v4 = vsel %vm1261_vm1, %v6897_v2, 0.0  ;;  %s6416_s17 = smov 8   ;;  %s6417_s7 = smov 16  }
  0xeb   : > { %v1265_v5 = vsel %vm1261_vm1, %v6899_v3, 0.0  ;;  %1263 = vadd.xlane.f32.xlu0 %v1262_v4  ;;  %v5792_v7 = vpop.eup %5791  ;;  %s6418_s4 = smov 24   ;;  %s8152_s0 = sld [smem:[#allocation37_spill]] }
  0xec   : > { %v1269_v8 = vmul.f32 32.0, %v5792_v7  ;;  %vm1273_vm2 = vweird.f32 %v5792_v7  ;;  %s8154_s23 = sld [smem:[#allocation33_spill]]  ;;  %p5519_p3 = scmp.ne.s32.totalorder %s6580_s9, 1 }
  0xee   : > { %v1270_v9 = vsub.f32 1.0, %v1269_v8 }
  0xf0   : > { %v1271_v10 = vmul.f32 %v5792_v7, %v1270_v9 }
  0xf2   : > { %v1272_v11 = vadd.f32 %v5792_v7, %v1271_v10 }
  0xf3   : > { %1266 = vadd.xlane.f32.xlu0 %v1265_v5 }
  0xf4   : > { %v6905_v12 = vsel %vm1273_vm2, %v5792_v7, %v1272_v11  ;;  %vm1896_vm2 = vcmask 130048  }
 0x15e   : > { %v1264_v13 = vpop.xlane.xlu0 %1263 }
 0x15f   : > { %v1275_v14 = vmul.f32 %v6905_v12, %v1264_v13 }
 0x161   : > { %v6909_v15 = vsub.f32 %v6897_v2, %v1275_v14 }
 0x163   : > { %v1279_v16 = vmul.f32 %v6909_v15, %v6909_v15  ;;  %v1344_v8 = vmul.f32 %v1343_v61, %v6909_v15  ;;  %v5770_v15 = vld [vmem:[%s8150_s16] ss:$0 sm:$0xff] }
 0x165   : > { %v1281_v17 = vsel %vm1261_vm1, %v1279_v16, 0.0  ;;  %v1348_v16 = vperm.slane %v6928_v6, 0 }
 0x166   : > { %1282 = vadd.xlane.f32.xlu1 %v1281_v17  ;;  %v1267_v18 = vpop.xlane.xlu0 %1266 }
 0x167   : > { %v1276_v19 = vmul.f32 %v6905_v12, %v1267_v18 }
 0x169   : > { %v6916_v20 = vsub.f32 %v6899_v3, %v1276_v19 }
 0x16b   : > { %v1280_v21 = vmul.f32 %v6916_v20, %v6916_v20  ;;  %v1345_v10 = vmul.f32 %v1343_v61, %v6916_v20  ;;  %v5772_v61 = vld [vmem:[#allocation6 + $0x1] ss:$0 sm:$0xff] }
 0x16d   : > { %v1284_v22 = vsel %vm1261_vm1, %v1280_v21, 0.0 }
 0x16e   : > { %1285 = vadd.xlane.f32.xlu1 %v1284_v22 }
 0x1d9   : > { %v1283_v24 = vpop.xlane.xlu1 %1282 }
 0x1da   : > { %v1287_v26 = vmul.f32 0.032258064, %v1283_v24 }
 0x1dc   : > { %5793 = vrsqrt.f32 %v1287_v26  ;;  %vm1296_vm3 = vcmp.eq.f32.partialorder %v1287_v26, inf  ;;  %v1299_v39 = vand.u32 2147483648, %v1287_v26  ;;  %vm1298_vm4 = vcmp.eq.f32.partialorder %v1287_v26, 0.0 }
 0x1e1   : > { %v1286_v27 = vpop.xlane.xlu1 %1285 }
 0x1e2   : > { %v5794_v28 = vpop.eup %5793  ;;  %v1288_v29 = vmul.f32 0.032258064, %v1286_v27 }
 0x1e3   : > { %v1290_v30 = vmul.f32 %v5794_v28, %v1287_v26 }
 0x1e4   : > { %5795 = vrsqrt.f32 %v1288_v29  ;;  %vm1308_vm5 = vcmp.eq.f32.partialorder %v1288_v29, inf  ;;  %v1311_v47 = vand.u32 2147483648, %v1288_v29  ;;  %vm1310_vm6 = vcmp.eq.f32.partialorder %v1288_v29, 0.0 }
 0x1e5   : > { %v1291_v31 = vmul.f32 %v5794_v28, %v1290_v30 }
 0x1e7   : > { %v1292_v32 = vmul.f32 0.5, %v1291_v31 }
 0x1e9   : > { %v1293_v33 = vsub.f32 1.5, %v1292_v32 }
 0x1ea   : > { %v5796_v34 = vpop.eup %5795 }
 0x1eb   : > { %v1294_v35 = vmul.f32 %v5794_v28, %v1293_v33  ;;  %v1302_v36 = vmul.f32 %v5796_v34, %v1288_v29 }
 0x1ed   : > { %v1295_v37 = vmul.f32 %v1294_v35, %v1287_v26  ;;  %v1303_v38 = vmul.f32 %v5796_v34, %v1302_v36 }
 0x1ef   : > { %v1297_v40 = vsel %vm1296_vm3, %v1287_v26, %v1295_v37  ;;  %v1304_v41 = vmul.f32 0.5, %v1303_v38  ;;  %vm1899_vm3 = vcmask 195584  }
 0x1f0   : > { %v1300_v42 = vsel %vm1298_vm4, %v1299_v39, %v1297_v40 }
 0x1f1   : > { %v1305_v43 = vsub.f32 1.5, %v1304_v41  ;;  %v1313_v44 = vadd.f32 1e-06, %v1300_v42 }
 0x1f3   : > { %v1306_v45 = vmul.f32 %v5796_v34, %v1305_v43  ;;  %5797 = vrcp.f32 %v1313_v44  ;;  %v1326_v58 = vand.u32 2147483648, %v1313_v44  ;;  %vm1320_vm8 = vweird.f32 %v1313_v44 }
 0x1f4   : > { %v1324_v59 = vand.u32 2147483647, %v1313_v44 }
 0x1f5   : > { %v1307_v46 = vmul.f32 %v1306_v45, %v1288_v29  ;;  %v1327_v0 = vor.u32 1.1754944e-38, %v1326_v58 }
 0x1f6   : > { %vm1325_vm10 = vcmp.eq.f32.partialorder %v1324_v59, 8.507059e+37 }
 0x1f7   : > { %v1309_v48 = vsel %vm1308_vm5, %v1288_v29, %v1307_v46 }
 0x1f8   : > { %v1312_v49 = vsel %vm1310_vm6, %v1311_v47, %v1309_v48 }
 0x1f9   : > { %v5798_v50 = vpop.eup %5797  ;;  %v1314_v51 = vadd.f32 1e-06, %v1312_v49 }
 0x1fa   : > { %v1316_v52 = vmul.f32 %v5798_v50, %v1313_v44  ;;  %vm1321_vm7 = vweird.f32 %v5798_v50 }
 0x1fb   : > { %5799 = vrcp.f32 %v1314_v51  ;;  %vm1322_vm9 = vmor %vm1320_vm8, %vm1321_vm7  ;;  %v1340_v1 = vand.u32 2147483648, %v1314_v51  ;;  %v1338_v5 = vand.u32 2147483647, %v1314_v51  ;;  %vm1334_vm12 = vweird.f32 %v1314_v51 }
 0x1fc   : > { %v1317_v53 = vsub.f32 1.0, %v1316_v52 }
 0x1fd   : > { %v1341_v11 = vor.u32 1.1754944e-38, %v1340_v1  ;;  %vm1339_vm14 = vcmp.eq.f32.partialorder %v1338_v5, 8.507059e+37 }
 0x1fe   : > { %v1318_v54 = vmul.f32 %v5798_v50, %v1317_v53 }
 0x200   : > { %v1319_v55 = vadd.f32 %v5798_v50, %v1318_v54  ;;  %v5771_v54 = vld [vmem:[#allocation6] ss:$0 sm:$0xff] }
 0x201   : > { %v5800_v56 = vpop.eup %5799 }
 0x202   : > { %v1330_v60 = vmul.f32 %v5800_v56, %v1314_v51  ;;  %v1323_v62 = vsel %vm1322_vm9, %v5798_v50, %v1319_v55  ;;  %vm1335_vm11 = vweird.f32 %v5800_v56 }
 0x203   : > { %v1328_v7 = vsel %vm1325_vm10, %v1327_v0, %v1323_v62  ;;  %vm1336_vm13 = vmor %vm1334_vm12, %vm1335_vm11 }
 0x204   : > { %v1331_v63 = vsub.f32 1.0, %v1330_v60  ;;  %v1346_v14 = vmul.f32 %v1344_v8, %v1328_v7 }
 0x206   : > { %v1332_v4 = vmul.f32 %v5800_v56, %v1331_v63  ;;  %v1349_v19 = vadd.f32 %v1348_v16, %v1346_v14 }
 0x208   : > { %v1333_v9 = vadd.f32 %v5800_v56, %v1332_v4 }
 0x20a   : > { %v1337_v13 = vsel %vm1336_vm13, %v5800_v56, %v1333_v9 }
 0x20b   : > { %v1342_v17 = vsel %vm1339_vm14, %v1341_v11, %v1337_v13 }
 0x20c   : > { %v1347_v18 = vmul.f32 %v1345_v10, %v1342_v17 }
 0x20e   : > { %v1350_v21 = vadd.f32 %v1348_v16, %v1347_v18 }
 0x210   : > { %v1351_v22 = vpack.c.bf16 %v1350_v21, %v1349_v19 }
 0x212   : > { %5308 = vmatmul.msk.bf16.vlgmr.msra.gmra.mxu0 %vm1261_vm1, %v1351_v22 }
 0x28f   : > { %v1384_v23 = vpop.f32.mrf.mxu0 }
 0x290   : > { %v1385_v24 = vadd.f32 %v5770_v15, %v1384_v23 }
 0x292   : > { %v1394_v25 = vpack.c.bf16 %v1385_v24, %v1385_v24 }
 0x294   : > { %v1397_v20 = vunpack.c.l.b16 %v1394_v25 }
 0x296   : > { %v6936_v26 = vpack.c.b16 %v1397_v20, %v1397_v20 }
 0x297   : > { %v1386_v27 = vpop.f32.mrf.mxu0 }
 0x298   : > { %v1387_v28 = vadd.f32 %v5770_v15, %v1386_v27  ;;  %1524 = vrot.lane.b32.xlu0 %v6936_v26, %s6405_s19  ;;  %1399 = vrot.lane.b32.xlu2 %v6936_v26, %s6406_s20 }
 0x29a   : > { %v1395_v29 = vpack.c.bf16 %v1387_v28, %v1387_v28 }
 0x29c   : > { %v1422_v30 = vunpack.c.l.b16 %v1395_v29 }
 0x29e   : > { %v6942_v31 = vpack.c.b16 %v1422_v30, %v1422_v30 }
 0x2a0   : > { %1547 = vrot.lane.b32.xlu1 %v6942_v31, %s6405_s19  ;;  %1663 = vrot.lane.b32.xlu0 %v6942_v31, %s6407_s3 }
 0x2a1   : > { %1424 = vrot.lane.b32.xlu2 %v6942_v31, %s6406_s20 }
 0x2a8   : > { %1661 = vrot.lane.b32.xlu1 %v6942_v31, %s6408_s14  ;;  %1756 = vrot.lane.b32.xlu0 %v6936_v26, %s6409_s10 }
 0x2a9   : > { %1522 = vrot.lane.b32.xlu2 %v6936_v26, %s6410_s12 }
 0x2b0   : > { %1754 = vrot.lane.b32.xlu1 %v6936_v26, %s6411_s5  ;;  %1777 = vrot.lane.b32.xlu0 %v6942_v31, %s6411_s5 }
 0x2b1   : > { %1545 = vrot.lane.b32.xlu2 %v6942_v31, %s6410_s12 }
 0x2b9   : > { %1640 = vrot.lane.b32.xlu2 %v6936_v26, %s6407_s3 }
 0x2c1   : > { %1638 = vrot.lane.b32.xlu2 %v6936_v26, %s6408_s14 }
 0x2c9   : > { %1779 = vrot.lane.b32.xlu2 %v6942_v31, %s6409_s10 }
 0x2f2   : > { %v1400_v32 = vpop.permute.xlu2 %1399 }
 0x2f3   : > { %v1406_v33 = vsel %vm1401_vm15, %v1400_v32, 0 }
 0x2f4   : > { %1415 = vmatpush.bf16.xpose.msra.mxu1 %v1406_v33 }
 0x2fb   : > { %v1425_v34 = vpop.permute.xlu2 %1424  ;;  %5309 = vmatmul.msk.bf16.vlgmr.msra.gmra.mxu1 %vm1401_vm15, %v1394_v25 }
 0x2fc   : > { %v1430_v35 = vsel %vm1401_vm15, %v1425_v34, 0 }
 0x2fd   : > { %1439 = vmatpush.bf16.xpose.msra.mxu2 %v1430_v35 }
 0x303   : > { %v1523_v36 = vpop.permute.xlu2 %1522 }
 0x304   : > { %5310 = vmatmul.msk.bf16.vlgmr.msra.gmra.mxu2 %vm1401_vm15, %v1395_v29 }
 0x30a   : > { %v1525_v37 = vpop.permute.xlu0 %1524 }
 0x30b   : > { %v1546_v38 = vpop.permute.xlu2 %1545  ;;  %v1530_v39 = vsel %vm1401_vm15, %v1525_v37, 0 }
 0x30c   : > { %1539 = vmatpush.bf16.xpose.msrb.mxu0 %v1530_v39 }
 0x312   : > { %v1548_v40 = vpop.permute.xlu1 %1547  ;;  %v1664_v41 = vpop.permute.xlu0 %1663 }
 0x313   : > { %v1669_v42 = vsel %vm1401_vm15, %v1664_v41, 0  ;;  %v1641_v43 = vpop.permute.xlu2 %1640  ;;  %5313 = vmatmul.msk.bf16.vlgmr.msrb.gmra.mxu0 %vm1401_vm15, %v1523_v36  ;;  %v1553_v44 = vsel %vm1401_vm15, %v1548_v40, 0 }
 0x314   : > { %v1646_v45 = vsel %vm1401_vm15, %v1641_v43, 0  ;;  %1562 = vmatpush.bf16.xpose.msrb.mxu1 %v1553_v44 }
 0x315   : > { %1655 = vmatpush.bf16.xpose.msra.mxu0 %v1646_v45 }
 0x31a   : > { %v1757_v46 = vpop.permute.xlu0 %1756  ;;  %v1662_v51 = vpop.permute.xlu1 %1661 }
 0x31b   : > { %v1762_v47 = vsel %vm1401_vm15, %v1757_v46, 0  ;;  %v1639_v48 = vpop.permute.xlu2 %1638  ;;  %5314 = vmatmul.msk.bf16.vlgmr.msrb.gmra.mxu1 %vm1401_vm15, %v1546_v38 }
 0x31c   : > { %1678 = vmatpush.bf16.xpose.msra.mxu1 %v1669_v42 }
 0x31d   : > { %1771 = vmatpush.bf16.xpose.msrb.mxu0 %v1762_v47 }
 0x322   : > { %v1755_v52 = vpop.permute.xlu1 %1754  ;;  %v1778_v53 = vpop.permute.xlu0 %1777 }
 0x323   : > { %v1780_v49 = vpop.permute.xlu2 %1779  ;;  %5317 = vmatmul.msk.bf16.vlgmr.msra.gmra.mxu0 %vm1401_vm15, %v1639_v48 }
 0x324   : > { %v1785_v50 = vsel %vm1401_vm15, %v1780_v49, 0 }
 0x325   : > { %1794 = vmatpush.bf16.xpose.msrb.mxu1 %v1785_v50 }
 0x32b   : > { %5318 = vmatmul.msk.bf16.vlgmr.msra.gmra.mxu1 %vm1401_vm15, %v1662_v51 }
 0x333   : > { %5321 = vmatmul.msk.bf16.vlgmr.msrb.gmra.mxu0 %vm1401_vm15, %v1755_v52 }
 0x33b   : > { %5322 = vmatmul.msk.bf16.vlgmr.msrb.gmra.mxu1 %vm1401_vm15, %v1778_v53 }
 0x378   : > { %v1417_v55 = vpop.f32.mrf.mxu1 }
 0x379   : > { %v1445_v56 = vmul.f32 0.35355338, %v1417_v55 }
 0x37b   : > { %v1453_v58 = vadd.f32 %v5771_v54, %v1445_v56 }
 0x37d   : > { %v1455_v59 = vsel %vm1401_vm15, %v1453_v58, -inf }
 0x37e   : > { %1456 = vmax.xlane.f32.xlu2 %v1455_v59 }
 0x380   : > { %v1419_v60 = vpop.f32.mrf.mxu1 }
 0x387   : > { %v1441_v62 = vpop.f32.mrf.mxu2 }
 0x388   : > { %v1446_v63 = vmul.f32 0.35355338, %v1441_v62 }
 0x38a   : > { %v1454_v0 = vadd.f32 %v5772_v61, %v1446_v63 }
 0x38c   : > { %v1458_v1 = vsel %vm1401_vm15, %v1454_v0, -inf }
 0x38d   : > { %1459 = vmax.xlane.f32.xlu1 %v1458_v1 }
 0x38f   : > { %v1443_v4 = vpop.f32.mrf.mxu2 }
 0x390   : > { %v1541_v5 = vpop.f32.mrf.mxu0 }
 0x391   : > { %v1568_v7 = vmul.f32 0.35355338, %v1541_v5 }
 0x393   : > { %v1570_v8 = vadd.f32 %v5771_v54, %v1568_v7 }
 0x395   : > { %v1572_v9 = vsel %vm1401_vm15, %v1570_v8, -inf }
 0x396   : > { %1501 = vrot.lane.b32.xlu2 %v6942_v31, %s6412_s21  ;;  %1573 = vmax.xlane.f32.xlu0 %v1572_v9 }
 0x398   : > { %v1543_v10 = vpop.f32.mrf.mxu0  ;;  %v1564_v11 = vpop.f32.mrf.mxu1 }
 0x399   : > { %v1569_v15 = vmul.f32 0.35355338, %v1564_v11 }
 0x39b   : > { %v1571_v24 = vadd.f32 %v5772_v61, %v1569_v15 }
 0x39d   : > { %v1575_v20 = vsel %vm1401_vm15, %v1571_v24, -inf }
 0x39e   : > { %1617 = vrot.lane.b32.xlu2 %v6942_v31, %s6413_s29 }
 0x3a0   : > { %v1566_v13 = vpop.f32.mrf.mxu1  ;;  %v1657_v14 = vpop.f32.mrf.mxu0 }
 0x3a1   : > { %v1684_v27 = vmul.f32 0.35355338, %v1657_v14 }
 0x3a3   : > { %v1686_v30 = vadd.f32 %v5771_v54, %v1684_v27 }
 0x3a5   : > { %v1688_v33 = vsel %vm1401_vm15, %v1686_v30, -inf }
 0x3a6   : > { %1479 = vrot.lane.b32.xlu1 %v6936_v26, %s6412_s21 }
 0x3a8   : > { %v1659_v16 = vpop.f32.mrf.mxu0  ;;  %v1680_v17 = vpop.f32.mrf.mxu1 }
 0x3a9   : > { %v1685_v29 = vmul.f32 0.35355338, %v1680_v17 }
 0x3aa   : > { %1596 = vrot.lane.b32.xlu0 %v6936_v26, %s6413_s29  ;;  %s8155_s29 = sld [smem:[#allocation41_spill]] }
 0x3ab   : > { %v1687_v34 = vadd.f32 %v5772_v61, %v1685_v29 }
 0x3ad   : > { %v1691_v36 = vsel %vm1401_vm15, %v1687_v34, -inf }
 0x3b0   : > { %v1682_v18 = vpop.f32.mrf.mxu1  ;;  %v1773_v19 = vpop.f32.mrf.mxu0 }
 0x3b1   : > { %v1800_v35 = vmul.f32 0.35355338, %v1773_v19 }
 0x3b3   : > { %v1802_v37 = vadd.f32 %v5771_v54, %v1800_v35 }
 0x3b5   : > { %v1804_v38 = vsel %vm1401_vm15, %v1802_v37, -inf }
 0x3b8   : > { %v1775_v21 = vpop.f32.mrf.mxu0  ;;  %v1796_v22 = vpop.f32.mrf.mxu1 }
 0x3b9   : > { %v1801_v25 = vmul.f32 0.35355338, %v1796_v22 }
 0x3bb   : > { %v6992_v28 = vadd.f32 %v5772_v61, %v1801_v25 }
 0x3bd   : > { %v1807_v32 = vsel %vm1401_vm15, %v6992_v28, -inf }
 0x3c0   : > { %v1798_v23 = vpop.f32.mrf.mxu1 }
 0x3c7   : > { %1576 = vmax.xlane.f32.xlu2 %v1575_v20 }
 0x3cf   : > { %1808 = vmax.xlane.f32.xlu2 %v1807_v32 }
 0x3d0   : > { %1689 = vmax.xlane.f32.xlu1 %v1688_v33 }
 0x3d4   : > { %1692 = vmax.xlane.f32.xlu0 %v1691_v36 }
 0x3dc   : > { %1805 = vmax.xlane.f32.xlu0 %v1804_v38 }
 0x3f1   : > { %v1457_v39 = vpop.xlane.xlu2 %1456 }
 0x3f2   : > { %v1461_v40 = vsub.f32 %v1453_v58, %v1457_v39 }
 0x3f4   : > { %v1463_v41 = vmul.f32 1.442695, %v1461_v40 }
 0x3f6   : > { %5801 = vpow2.f32 %v1463_v41 }
 0x3f9   : > { %v1502_v52 = vpop.permute.xlu2 %1501 }
 0x3fa   : > { %v1507_v56 = vsel %vm1484_vm0, %v1502_v52, 0 }
 0x3fc   : > { %v6999_v42 = vpop.eup %5801 }
 0x3fd   : > { %v1467_v43 = vsel %vm1401_vm15, %v6999_v42, 0.0 }
 0x3fe   : > { %1468 = vadd.xlane.f32.xlu2 %v1467_v43 }
 0x400   : > { %v1460_v44 = vpop.xlane.xlu1 %1459 }
 0x401   : > { %v1462_v47 = vsub.f32 %v1454_v0, %v1460_v44  ;;  %v1618_v61 = vpop.permute.xlu2 %1617 }
 0x402   : > { %v1623_v32 = vsel %vm1484_vm0, %v1618_v61, 0 }
 0x403   : > { %v1465_v49 = vmul.f32 1.442695, %v1462_v47 }
 0x409   : > { %v1574_v45 = vpop.xlane.xlu0 %1573 }
 0x40a   : > { %v1578_v46 = vsub.f32 %v1570_v8, %v1574_v45 }
 0x40c   : > { %v1580_v48 = vmul.f32 1.442695, %v1578_v46 }
 0x40e   : > { %5803 = vpow2.f32 %v1580_v48 }
 0x40f   : > { %5805 = vpow2.f32 %v1465_v49 }
 0x414   : > { %v7003_v50 = vpop.eup %5803 }
 0x415   : > { %v1584_v51 = vsel %vm1401_vm15, %v7003_v50, 0.0  ;;  %v7010_v55 = vpop.eup %5805 }
 0x416   : > { %1585 = vadd.xlane.f32.xlu0 %v1584_v51  ;;  %1733 = vrot.lane.b32.xlu2 %v6942_v31, %s6414_s27  ;;  %v1470_v60 = vsel %vm1401_vm15, %v7010_v55, 0.0 }
 0x418   : > { %v1480_v53 = vpop.permute.xlu1 %1479 }
 0x419   : > { %v1486_v54 = vsel %vm1484_vm0, %v1480_v53, 0 }
 0x41a   : > { %1495 = vmatpush.bf16.msra.mxu3 %v1486_v54 }
 0x41c   : > { %v1597_v58 = vpop.permute.xlu0 %1596 }
 0x41d   : > { %v1602_v59 = vsel %vm1484_vm0, %v1597_v58, 0 }
 0x41e   : > { %1516 = vmatpush.bf16.msrb.mxu3 %v1507_v56  ;;  %1611 = vmatpush.bf16.msrb.mxu2 %v1602_v59 }
 0x41f   : > { %1471 = vadd.xlane.f32.xlu0 %v1470_v60 }
 0x43a   : > { %v1577_v62 = vpop.xlane.xlu2 %1576 }
 0x43b   : > { %v1579_v63 = vsub.f32 %v1571_v24, %v1577_v62 }
 0x43d   : > { %v1582_v0 = vmul.f32 1.442695, %v1579_v63 }
 0x43f   : > { %5807 = vpow2.f32 %v1582_v0 }
 0x442   : > { %v1809_v23 = vpop.xlane.xlu2 %1808 }
 0x443   : > { %v1690_v1 = vpop.xlane.xlu1 %1689  ;;  %v1811_v20 = vsub.f32 %v6992_v28, %v1809_v23 }
 0x444   : > { %v1694_v4 = vsub.f32 %v1686_v30, %v1690_v1 }
 0x445   : > { %v5808_v5 = vpop.eup %5807  ;;  %v1814_v30 = vmul.f32 1.442695, %v1811_v20 }
 0x446   : > { %v1696_v7 = vmul.f32 1.442695, %v1694_v4  ;;  %v1587_v8 = vsel %vm1401_vm15, %v5808_v5, 0.0 }
 0x447   : > { %v1693_v9 = vpop.xlane.xlu0 %1692  ;;  %1588 = vadd.xlane.f32.xlu1 %v1587_v8 }
 0x448   : > { %5809 = vpow2.f32 %v1696_v7  ;;  %v1695_v10 = vsub.f32 %v1687_v34, %v1693_v9 }
 0x44a   : > { %v1698_v11 = vmul.f32 1.442695, %v1695_v10 }
 0x44c   : > { %5811 = vpow2.f32 %v1698_v11 }
 0x44e   : > { %v7017_v13 = vpop.eup %5809 }
 0x44f   : > { %v1806_v14 = vpop.xlane.xlu0 %1805  ;;  %v1700_v16 = vsel %vm1401_vm15, %v7017_v13, 0.0 }
 0x450   : > { %v1810_v17 = vsub.f32 %v1802_v37, %v1806_v14  ;;  %1701 = vadd.xlane.f32.xlu2 %v1700_v16 }
 0x452   : > { %v5812_v18 = vpop.eup %5811  ;;  %v1812_v19 = vmul.f32 1.442695, %v1810_v17 }
 0x453   : > { %v1703_v21 = vsel %vm1401_vm15, %v5812_v18, 0.0 }
 0x454   : > { %5813 = vpow2.f32 %v1812_v19  ;;  %1704 = vadd.xlane.f32.xlu0 %v1703_v21 }
 0x45a   : > { %v7022_v22 = vpop.eup %5813 }
 0x45b   : > { %v1816_v15 = vsel %vm1401_vm15, %v7022_v22, 0.0 }
 0x45c   : > { %1817 = vadd.xlane.f32.xlu0 %v1816_v15 }
 0x460   : > { %1712 = vrot.lane.b32.xlu1 %v6936_v26, %s6414_s27 }
 0x468   : > { %1849 = vrot.lane.b32.xlu2 %v6942_v31, %s6415_s26 }
 0x470   : > { %1828 = vrot.lane.b32.xlu0 %v6936_v26, %s6415_s26  ;;  %s8153_s26 = sld [smem:[#allocation39_spill]] }
 0x471   : > { %v1469_v24 = vpop.xlane.xlu2 %1468 }
 0x472   : > { %5815 = vrcp.f32 %v1469_v24 }
 0x473   : > { %5817 = vpow2.f32 %v1814_v30  ;;  %v5531_v30 = vld [vmem:[%s6819_s11 + $0x8] sm:$0xff] }
 0x474   : > { %1927 = vmatpush.bf16.msra.mxu0 %v5531_v30 }
 0x478   : > { %v5816_v25 = vpop.eup %5815 }
 0x479   : > { %v1475_v27 = vmul.f32 %v5816_v25, %v6999_v42  ;;  %v5818_v33 = vpop.eup %5817  ;;  %v1734_v39 = vpop.permute.xlu2 %1733 }
 0x47a   : > { %v1819_v34 = vsel %vm1401_vm15, %v5818_v33, 0.0  ;;  %v1739_v41 = vsel %vm1484_vm0, %v1734_v39, 0 }
 0x47b   : > { %v1477_v29 = vpack.c.bf16 %v1475_v27, %v1475_v27 }
 0x47d   : > { %5311 = vmatmul.msk.bf16.vlgmr.msra.gmra.mxu3 %vm1401_vm15, %v1477_v29 }
 0x47e   : > { %1632 = vmatpush.bf16.msra.mxu3 %v1623_v32  ;;  %v5530_v32 = vld [vmem:[%s6819_s11] sm:$0xff]  ;;  %s8151_s11 = scalar_lea.vmem [#allocation15], %s6811_s30 }
 0x47f   : > { %1928 = vmatpush.bf16.msra.mxu0 %v5530_v32 }
 0x489   : > { %v1586_v31 = vpop.xlane.xlu0 %1585 }
 0x48a   : > { %5819 = vrcp.f32 %v1586_v31  ;;  %1820 = vadd.xlane.f32.xlu1 %v1819_v34 }
 0x490   : > { %v5820_v26 = vpop.eup %5819 }
 0x491   : > { %v1592_v28 = vmul.f32 %v5820_v26, %v7003_v50 }
 0x492   : > { %v1472_v35 = vpop.xlane.xlu0 %1471 }
 0x493   : > { %5821 = vrcp.f32 %v1472_v35  ;;  %v1594_v36 = vpack.c.bf16 %v1592_v28, %v1592_v28 }
 0x495   : > { %5315 = vmatmul.msk.bf16.vlgmr.msrb.gmra.mxu2 %vm1401_vm15, %v1594_v36 }
 0x499   : > { %v5822_v37 = vpop.eup %5821 }
 0x49a   : > { %v1476_v38 = vmul.f32 %v5822_v37, %v7010_v55 }
 0x49c   : > { %v1478_v40 = vpack.c.bf16 %v1476_v38, %v1476_v38 }
 0x49e   : > { %5312 = vmatmul.msk.bf16.vlgmr.msrb.gmra.mxu3 %vm1401_vm15, %v1478_v40 }
 0x49f   : > { %1748 = vmatpush.bf16.msrb.mxu3 %v1739_v41 }
 0x4ba   : > { %v1589_v42 = vpop.xlane.xlu1 %1588 }
 0x4bb   : > { %5823 = vrcp.f32 %v1589_v42 }
 0x4c1   : > { %v5824_v43 = vpop.eup %5823 }
 0x4c2   : > { %v1593_v44 = vmul.f32 %v5824_v43, %v5808_v5 }
 0x4c3   : > { %v1702_v45 = vpop.xlane.xlu2 %1701 }
 0x4c4   : > { %v1595_v46 = vpack.c.bf16 %v1593_v44, %v1593_v44  ;;  %5825 = vrcp.f32 %v1702_v45 }
 0x4c6   : > { %5316 = vmatmul.msk.bf16.vlgmr.msra.gmra.mxu3 %vm1401_vm15, %v1595_v46  ;;  %v5773_v46 = vld [vmem:[%s8151_s11] ss:$0 sm:$0xff] }
 0x4c7   : > { %v1705_v47 = vpop.xlane.xlu0 %1704 }
 0x4c8   : > { %5827 = vrcp.f32 %v1705_v47 }
 0x4ca   : > { %v5826_v50 = vpop.eup %5825 }
 0x4cb   : > { %v1850_v48 = vpop.permute.xlu2 %1849  ;;  %v1708_v53 = vmul.f32 %v5826_v50, %v7017_v13 }
 0x4cc   : > { %v1855_v49 = vsel %vm1484_vm0, %v1850_v48, 0 }
 0x4cd   : > { %1864 = vmatpush.bf16.msra.mxu3 %v1855_v49  ;;  %v1710_v58 = vpack.c.bf16 %v1708_v53, %v1708_v53 }
 0x4ce   : > { %v5828_v51 = vpop.eup %5827 }
 0x4cf   : > { %v1709_v52 = vmul.f32 %v5828_v51, %v5812_v18  ;;  %v1818_v59 = vpop.xlane.xlu0 %1817 }
 0x4d0   : > { %5829 = vrcp.f32 %v1818_v59 }
 0x4d1   : > { %v1711_v56 = vpack.c.bf16 %v1709_v52, %v1709_v52 }
 0x4d2   : > { %v1713_v54 = vpop.permute.xlu1 %1712 }
 0x4d3   : > { %v1718_v55 = vsel %vm1484_vm0, %v1713_v54, 0 }
 0x4d4   : > { %1727 = vmatpush.bf16.msra.mxu2 %v1718_v55  ;;  %v5535_v55 = vld [vmem:[%s6827_s18 + $0x8] sm:$0xff] }
 0x4d6   : > { %5320 = vmatmul.msk.bf16.vlgmr.msrb.gmra.mxu3 %vm1401_vm15, %v1711_v56  ;;  %v5830_v60 = vpop.eup %5829  ;;  %v1937_v56 = vld [vmem:[%s8152_s0] sm:$0x3f] }
 0x4d7   : > { %5319 = vmatmul.msk.bf16.vlgmr.msra.gmra.mxu2 %vm1401_vm15, %v1710_v58  ;;  %v1824_v61 = vmul.f32 %v5830_v60, %v7022_v22  ;;  %v2063_v58 = vrot.slane %v1937_v56, 2  ;;  %v2064_v59 = vrot.slane %v1937_v56, 4  ;;  %2067 = vst [vmem:[#allocation1] ss:$4 sm:$0xff] %v1937_v56  ;;  %v5534_v60 = vld [vmem:[%s6827_s18] sm:$0xff] }
 0x4d9   : > { %v1826_v0 = vpack.c.bf16 %v1824_v61, %v1824_v61  ;;  %2069 = vst [vmem:[#allocation1 + $0x1] ss:$4 sm:$0xff] %v2063_v58 }
 0x4da   : > { %2071 = vst [vmem:[#allocation1 + $0x2] ss:$4 sm:$0xff] %v2064_v59 }
 0x4e2   : > { %v1829_v62 = vpop.permute.xlu0 %1828 }
 0x4e3   : > { %v1834_v63 = vsel %vm1484_vm0, %v1829_v62, 0 }
 0x4e4   : > { %1843 = vmatpush.bf16.msrb.mxu2 %v1834_v63 }
 0x4e7   : > { %5323 = vmatmul.msk.bf16.vlgmr.msrb.gmra.mxu2 %vm1401_vm15, %v1826_v0 }
 0x4e8   : > { %2112 = vmatpush.bf16.msra.mxu2 %v5535_v55 }
 0x4ec   : > { %2113 = vmatpush.bf16.msra.mxu2 %v5534_v60 }
 0x4fd   : > { %v1821_v1 = vpop.xlane.xlu1 %1820 }
 0x4fe   : > { %5831 = vrcp.f32 %v1821_v1 }
 0x500   : > { %v1497_v4 = vpop.f32.mrf.mxu3 }
 0x504   : > { %v5832_v5 = vpop.eup %5831 }
 0x505   : > { %v1825_v7 = vmul.f32 %v5832_v5, %v5818_v33 }
 0x507   : > { %v1827_v8 = vpack.c.bf16 %v1825_v7, %v1825_v7 }
 0x508   : > { %v1499_v9 = vpop.f32.mrf.mxu3 }
 0x509   : > { %5324 = vmatmul.msk.bf16.vlgmr.msra.gmra.mxu3 %vm1401_vm15, %v1827_v8 }
 0x518   : > { %v1613_v10 = vpop.f32.mrf.mxu2 }
 0x520   : > { %v1615_v13 = vpop.f32.mrf.mxu2 }
 0x521   : > { %v1518_v11 = vpop.f32.mrf.mxu3 }
 0x529   : > { %v1520_v14 = vpop.f32.mrf.mxu3 }
 0x549   : > { %v1634_v16 = vpop.f32.mrf.mxu3 }
 0x54a   : > { %v5710_v17 = vpack.i.bf16 %v1634_v16, %v1613_v10 }
 0x54c   : > { %5711 = vrot.lane.b32.xlu0 %v5710_v17, %s6416_s17 }
 0x551   : > { %v1636_v18 = vpop.f32.mrf.mxu3 }
 0x552   : > { %v5533_v18 = vld [vmem:[%s6867_s22 + $0x8] sm:$0xff] }
 0x553   : > { %2053 = vmatpush.bf16.msra.mxu1 %v5533_v18 }
 0x559   : > { %v1750_v19 = vpop.f32.mrf.mxu3 }
 0x55a   : > { %v1729_v21 = vpop.f32.mrf.mxu2 }
 0x55b   : > { %v5715_v22 = vpack.i.bf16 %v1750_v19, %v1729_v21  ;;  %v5532_v19 = vld [vmem:[%s6867_s22] sm:$0xff] }
 0x55c   : > { %2054 = vmatpush.bf16.msra.mxu1 %v5532_v19 }
 0x55d   : > { %5716 = vrot.lane.b32.xlu2 %v5715_v22, %s6417_s7 }
 0x561   : > { %v1752_v15 = vpop.f32.mrf.mxu3 }
 0x562   : > { %v1731_v23 = vpop.f32.mrf.mxu2 }
 0x56a   : > { %v1845_v24 = vpop.f32.mrf.mxu2 }
 0x572   : > { %v1847_v25 = vpop.f32.mrf.mxu2 }
 0x58c   : > { %v1866_v20 = vpop.f32.mrf.mxu3 }
 0x58d   : > { %v5720_v27 = vpack.i.bf16 %v1866_v20, %v1845_v24 }
 0x58f   : > { %5721 = vrot.lane.b32.xlu0 %v5720_v27, %s6418_s4 }
 0x594   : > { %v1868_v29 = vpop.f32.mrf.mxu3 }
 0x5b7   : > { %v5717_v26 = vpop.permute.xlu2 %5716 }
 0x5b8   : > { %v5719_v36 = vunpack.i.h.bf16 %v5717_v26  ;;  %v5718_v37 = vunpack.i.l.bf16 %v5717_v26 }
 0x5be   : > { %v5712_v33 = vpop.permute.xlu0 %5711 }
 0x5bf   : > { %v5714_v31 = vunpack.i.h.bf16 %v5712_v33  ;;  %v5713_v34 = vunpack.i.l.bf16 %v5712_v33 }
 0x5c1   : > { %v1895_v35 = vsel %vm1401_vm15, %v1518_v11, %v5714_v31  ;;  %v1894_v28 = vsel %vm1401_vm15, %v1497_v4, %v5713_v34 }
 0x5c2   : > { %v1897_v41 = vsel %vm1896_vm2, %v1894_v28, %v5718_v37  ;;  %v1898_v42 = vsel %vm1896_vm2, %v1895_v35, %v5719_v36  ;;  %v7100_v37 = vld [vmem:[%s6881_s2] ss:$0 sm:$0xff] }
 0x601   : > { %v5722_v38 = vpop.permute.xlu0 %5721 }
 0x602   : > { %v5724_v39 = vunpack.i.h.bf16 %v5722_v38  ;;  %v5723_v40 = vunpack.i.l.bf16 %v5722_v38 }
 0x604   : > { %v1900_v43 = vsel %vm1899_vm3, %v1897_v41, %v5723_v40  ;;  %v1901_v44 = vsel %vm1899_vm3, %v1898_v42, %v5724_v39 }
 0x605   : > { %v1902_v45 = vpack.c.bf16 %v1901_v44, %v1900_v43 }
 0x607   : > { %5333 = vmatmul.msk.bf16.vlgmr.msra.gmra.mxu0 %vm1261_vm1, %v1902_v45 }
 0x684   : > { %v1930_v47 = vpop.f32.mrf.mxu0 }
 0x685   : > { %v1931_v48 = vadd.f32 %v5773_v46, %v1930_v47 }
 0x687   : > { %v7065_v49 = vadd.f32 %v1931_v48, %v6897_v2  ;;  %v1938_v2 = vld [vmem:[%s8152_s0 + $0x8] sm:$0x3f] }
 0x688   : > { %v2066_v61 = vrot.slane %v1938_v2, 4  ;;  %2073 = vst [vmem:[#allocation1 + $0x3] ss:$4 sm:$0xff] %v1938_v2 }
 0x689   : > { %v1941_v50 = vsel %vm1261_vm1, %v7065_v49, 0.0 }
 0x68a   : > { %1942 = vadd.xlane.f32.xlu2 %v1941_v50  ;;  %2077 = vst [vmem:[#allocation1 + $0x21] ss:$4 sm:$0xff] %v2066_v61 }
 0x68c   : > { %v1932_v51 = vpop.f32.mrf.mxu0 }
 0x68d   : > { %v1933_v52 = vadd.f32 %v5773_v46, %v1932_v51 }
 0x68f   : > { %v7070_v53 = vadd.f32 %v1933_v52, %v6899_v3  ;;  %v2065_v3 = vrot.slane %v1938_v2, 2  ;;  %v2078_v62 = vld.sshfl [vmem:[#allocation1] sm:$0xff pattern:$0x73625140] }
 0x691   : > { %v1944_v54 = vsel %vm1261_vm1, %v7070_v53, 0.0  ;;  %2075 = vst [vmem:[#allocation1 + $0x20] ss:$4 sm:$0xff] %v2065_v3  ;;  %v2015_v3 = vperm.slane %v6924_v57, 1 }
 0x692   : > { %1945 = vadd.xlane.f32.xlu0 %v1944_v54 }
 0x698   : > { %v2079_v63 = vld.sshfl [vmem:[#allocation1 + $0x20] sm:$0xff pattern:$0x73625140] }
 0x699   : > { %v2082_v0 = vpack.c.bf16 %v2079_v63, %v2078_v62 }
 0x69b   : > { %5351 = vmatmul.msk.bf16.vlgmr.msra.gmra.mxu2 %vm1261_vm1, %v2082_v0 }
 0x6fd   : > { %v1943_v1 = vpop.xlane.xlu2 %1942 }
 0x6fe   : > { %v1947_v4 = vmul.f32 %v1943_v1, %v6905_v12 }
 0x700   : > { %v7085_v5 = vsub.f32 %v7065_v49, %v1947_v4 }
 0x702   : > { %v1951_v7 = vmul.f32 %v7085_v5, %v7085_v5 }
 0x704   : > { %v1953_v8 = vsel %vm1261_vm1, %v1951_v7, 0.0 }
 0x705   : > { %v1946_v9 = vpop.xlane.xlu0 %1945  ;;  %1954 = vadd.xlane.f32.xlu1 %v1953_v8  ;;  %v2016_v8 = vmul.f32 %v2015_v3, %v7085_v5 }
 0x706   : > { %v1948_v10 = vmul.f32 %v1946_v9, %v6905_v12 }
 0x708   : > { %v7092_v11 = vsub.f32 %v7070_v53, %v1948_v10 }
 0x70a   : > { %v1952_v13 = vmul.f32 %v7092_v11, %v7092_v11  ;;  %v2017_v10 = vmul.f32 %v2015_v3, %v7092_v11 }
 0x70c   : > { %v1956_v14 = vsel %vm1261_vm1, %v1952_v13, 0.0 }
 0x70d   : > { %1957 = vadd.xlane.f32.xlu1 %v1956_v14 }
 0x71e   : > { %v2115_v39 = vpop.f32.mrf.mxu2 }
 0x71f   : > { %v7103_v40 = vadd.f32 %v7100_v37, %v2115_v39 }
 0x721   : > { %v7106_v43 = vrot.slane %v7103_v40, 2  ;;  %v7109_v44 = vrot.slane %v7103_v40, 4  ;;  %v7112_v45 = vrot.slane %v7103_v40, 6  ;;  %2133 = vst [vmem:[#allocation1] ss:$4 sm:$0xff] %v7103_v40 }
 0x723   : > { %2135 = vst [vmem:[#allocation1 + $0x1] ss:$4 sm:$0xff] %v7106_v43 }
 0x724   : > { %2137 = vst [vmem:[#allocation1 + $0x2] ss:$4 sm:$0xff] %v7109_v44 }
 0x725   : > { %2140 = vst [vmem:[#allocation1 + $0x20] ss:$4 sm:$0xff] %v7112_v45 }
 0x726   : > { %v2117_v11 = vpop.f32.mrf.mxu2 }
 0x72b   : > { %v7118_v56 = vld.sshfl [vmem:[#allocation1] sm:$0xff pattern:$0x73625140] }
 0x72c   : > { %2223 = vst [vmem:[#allocation1] ss:$4 sm:$0xff] %v7103_v40 }
 0x72d   : > { %2225 = vst [vmem:[#allocation1 + $0x1] ss:$4 sm:$0xff] %v7106_v43 }
 0x72e   : > { %2227 = vst [vmem:[#allocation1 + $0x2] ss:$4 sm:$0xff] %v7109_v44 }
 0x778   : > { %v1955_v16 = vpop.xlane.xlu1 %1954 }
 0x779   : > { %v1959_v17 = vmul.f32 0.032258064, %v1955_v16  ;;  %v2020_v16 = vperm.slane %v6928_v6, 1 }
 0x77b   : > { %5833 = vrsqrt.f32 %v1959_v17  ;;  %vm1968_vm4 = vcmp.eq.f32.partialorder %v1959_v17, inf  ;;  %v1971_v31 = vand.u32 2147483648, %v1959_v17  ;;  %vm1970_vm5 = vcmp.eq.f32.partialorder %v1959_v17, 0.0 }
 0x780   : > { %v1958_v21 = vpop.xlane.xlu1 %1957 }
 0x781   : > { %v5834_v22 = vpop.eup %5833  ;;  %v1960_v15 = vmul.f32 0.032258064, %v1958_v21 }
 0x782   : > { %v1962_v23 = vmul.f32 %v5834_v22, %v1959_v17 }
 0x783   : > { %5835 = vrsqrt.f32 %v1960_v15  ;;  %vm1980_vm6 = vcmp.eq.f32.partialorder %v1960_v15, inf  ;;  %v1983_v42 = vand.u32 2147483648, %v1960_v15  ;;  %vm1982_vm7 = vcmp.eq.f32.partialorder %v1960_v15, 0.0 }
 0x784   : > { %v1963_v24 = vmul.f32 %v5834_v22, %v1962_v23 }
 0x786   : > { %v1964_v25 = vmul.f32 0.5, %v1963_v24 }
 0x788   : > { %v1965_v20 = vsub.f32 1.5, %v1964_v25 }
 0x789   : > { %v5836_v27 = vpop.eup %5835 }
 0x78a   : > { %v1966_v29 = vmul.f32 %v5834_v22, %v1965_v20  ;;  %v1974_v30 = vmul.f32 %v5836_v27, %v1960_v15 }
 0x78c   : > { %v1967_v32 = vmul.f32 %v1966_v29, %v1959_v17  ;;  %v1975_v33 = vmul.f32 %v5836_v27, %v1974_v30 }
 0x78e   : > { %v1969_v34 = vsel %vm1968_vm4, %v1959_v17, %v1967_v32  ;;  %v1976_v26 = vmul.f32 0.5, %v1975_v33  ;;  %v7127_v17 = vld.sshfl [vmem:[#allocation1] sm:$0xff pattern:$0x73625140]  ;;  %vm2198_vm4 = vcmask 48128  }
 0x78f   : > { %v1972_v35 = vsel %vm1970_vm5, %v1971_v31, %v1969_v34  ;;  %2289 = vst [vmem:[#allocation1] ss:$4 sm:$0xff] %v7103_v40  ;;  %v2846_v31 = vld [vmem:[%s8153_s26] sm:$0x3f]  ;;  %vm2248_vm5 = vcmask 1042432  }
 0x790   : > { %v1985_v28 = vadd.f32 1e-06, %v1972_v35  ;;  %v1977_v36 = vsub.f32 1.5, %v1976_v26  ;;  %2291 = vst [vmem:[#allocation1 + $0x1] ss:$4 sm:$0xff] %v7106_v43  ;;  %v2974_v26 = vrot.slane %v2846_v31, 2 }
 0x791   : > { %2293 = vst [vmem:[#allocation1 + $0x2] ss:$4 sm:$0xff] %v7109_v44  ;;  %v2975_v35 = vrot.slane %v2846_v31, 4 }
 0x792   : > { %5837 = vrcp.f32 %v1985_v28  ;;  %v1978_v38 = vmul.f32 %v5836_v27, %v1977_v36  ;;  %v1998_v58 = vand.u32 2147483648, %v1985_v28  ;;  %vm1992_vm9 = vweird.f32 %v1985_v28  ;;  %v2847_v36 = vld [vmem:[%s8153_s26 + $0x8] sm:$0x3f] }
 0x793   : > { %v1996_v59 = vand.u32 2147483647, %v1985_v28 }
 0x794   : > { %v1979_v41 = vmul.f32 %v1978_v38, %v1960_v15  ;;  %v1999_v63 = vor.u32 1.1754944e-38, %v1998_v58  ;;  %v2148_v38 = vpack.c.bf16 %v7118_v56, %v7118_v56  ;;  %v2977_v56 = vrot.slane %v2847_v36, 4  ;;  %v5775_v58 = vld [vmem:[%s6876_s25] ss:$0 sm:$0xff] }
 0x795   : > { %vm1997_vm11 = vcmp.eq.f32.partialorder %v1996_v59, 8.507059e+37 }
 0x796   : > { %v1981_v46 = vsel %vm1980_vm6, %v1960_v15, %v1979_v41  ;;  %v7133_v15 = vadd.f32 %v7100_v37, %v2117_v11 }
 0x797   : > { %v1984_v47 = vsel %vm1982_vm7, %v1983_v42, %v1981_v46 }
 0x798   : > { %v5838_v48 = vpop.eup %5837  ;;  %v1986_v50 = vadd.f32 1e-06, %v1984_v47  ;;  %v7137_v6 = vrot.slane %v7133_v15, 2  ;;  %2142 = vst [vmem:[#allocation1 + $0x21] ss:$4 sm:$0xff] %v7133_v15 }
 0x799   : > { %v1988_v51 = vmul.f32 %v5838_v48, %v1985_v28  ;;  %vm1993_vm8 = vweird.f32 %v5838_v48  ;;  %v2294_v23 = vld.sshfl [vmem:[#allocation1] sm:$0xff pattern:$0x73625140] }
 0x79a   : > { %5839 = vrcp.f32 %v1986_v50  ;;  %vm1994_vm10 = vmor %vm1992_vm9, %vm1993_vm8  ;;  %v2012_v0 = vand.u32 2147483648, %v1986_v50  ;;  %v2010_v4 = vand.u32 2147483647, %v1986_v50  ;;  %vm2006_vm13 = vweird.f32 %v1986_v50  ;;  %2144 = vst [vmem:[#allocation1 + $0x22] ss:$4 sm:$0xff] %v7137_v6 }
 0x79b   : > { %v1989_v52 = vsub.f32 1.0, %v1988_v51  ;;  %2392 = vst [vmem:[#allocation1] ss:$4 sm:$0xff] %v7103_v40  ;;  %v2304_v37 = vpack.c.bf16 %v2294_v23, %v2294_v23 }
 0x79c   : > { %v2013_v13 = vor.u32 1.1754944e-38, %v2012_v0  ;;  %vm2011_vm0 = vcmp.eq.f32.partialorder %v2010_v4, 8.507059e+37  ;;  %2394 = vst [vmem:[#allocation1 + $0x1] ss:$4 sm:$0xff] %v7106_v43 }
 0x79d   : > { %v1990_v54 = vmul.f32 %v5838_v48, %v1989_v52  ;;  %2396 = vst [vmem:[#allocation1 + $0x2] ss:$4 sm:$0xff] %v7109_v44  ;;  %v2312_v42 = vunpack.c.l.b16 %v2304_v37 }
 0x79f   : > { %v1991_v55 = vadd.f32 %v5838_v48, %v1990_v54 }
 0x7a0   : > { %v5840_v2 = vpop.eup %5839 }
 0x7a1   : > { %v2002_v60 = vmul.f32 %v5840_v2, %v1986_v50  ;;  %v1995_v61 = vsel %vm1994_vm10, %v5838_v48, %v1991_v55  ;;  %vm2007_vm12 = vweird.f32 %v5840_v2  ;;  %v2145_v24 = vld.sshfl [vmem:[#allocation1 + $0x20] sm:$0xff pattern:$0x73625140]  ;;  %v2313_v48 = vpack.c.b16 %v2312_v42, %v2312_v42 }
 0x7a2   : > { %v2000_v7 = vsel %vm1997_vm11, %v1999_v63, %v1995_v61  ;;  %vm2008_vm14 = vmor %vm2006_vm13, %vm2007_vm12  ;;  %2230 = vst [vmem:[#allocation1 + $0x20] ss:$4 sm:$0xff] %v7112_v45  ;;  %v2149_v39 = vpack.c.bf16 %v2145_v24, %v2145_v24  ;;  %v2976_v55 = vrot.slane %v2847_v36, 2 }
 0x7a3   : > { %v2003_v62 = vsub.f32 1.0, %v2002_v60  ;;  %v2018_v57 = vmul.f32 %v2016_v8, %v2000_v7  ;;  %2232 = vst [vmem:[#allocation1 + $0x21] ss:$4 sm:$0xff] %v7133_v15  ;;  %2314 = vrot.lane.b32.xlu1 %v2313_v48, %s6410_s12 }
 0x7a4   : > { %v7146_v25 = vld.sshfl [vmem:[#allocation1] sm:$0xff pattern:$0x73625140]  ;;  %2234 = vst [vmem:[#allocation1 + $0x22] ss:$4 sm:$0xff] %v7137_v6 }
 0x7a5   : > { %v2004_v1 = vmul.f32 %v5840_v2, %v2003_v62  ;;  %v2021_v5 = vadd.f32 %v2020_v16, %v2018_v57  ;;  %2457 = vst [vmem:[#allocation1] ss:$4 sm:$0xff] %v7103_v40 }
 0x7a6   : > { %2459 = vst [vmem:[#allocation1 + $0x1] ss:$4 sm:$0xff] %v7106_v43 }
 0x7a7   : > { %v2005_v9 = vadd.f32 %v5840_v2, %v2004_v1  ;;  %2461 = vst [vmem:[#allocation1 + $0x2] ss:$4 sm:$0xff] %v7109_v44 }
 0x7a9   : > { %v2009_v14 = vsel %vm2008_vm14, %v5840_v2, %v2005_v9 }
 0x7aa   : > { %v2014_v18 = vsel %vm2011_vm0, %v2013_v13, %v2009_v14 }
 0x7ab   : > { %v2019_v19 = vmul.f32 %v2017_v10, %v2014_v18  ;;  %v7152_v20 = vld.sshfl [vmem:[#allocation1 + $0x20] sm:$0xff pattern:$0x73625140] }
 0x7ac   : > { %2296 = vst [vmem:[#allocation1 + $0x20] ss:$4 sm:$0xff] %v7112_v45 }
 0x7ad   : > { %v2022_v21 = vadd.f32 %v2020_v16, %v2019_v19  ;;  %2298 = vst [vmem:[#allocation1 + $0x21] ss:$4 sm:$0xff] %v7133_v15  ;;  %v2239_v16 = vpack.c.bf16 %v7152_v20, %v7152_v20 }
 0x7ae   : > { %v2462_v27 = vld.sshfl [vmem:[#allocation1] sm:$0xff pattern:$0x73625140]  ;;  %2300 = vst [vmem:[#allocation1 + $0x22] ss:$4 sm:$0xff] %v7137_v6 }
 0x7af   : > { %v2023_v22 = vpack.c.bf16 %v2022_v21, %v2021_v5  ;;  %2554 = vst [vmem:[#allocation1] ss:$4 sm:$0xff] %v7103_v40  ;;  %v2472_v41 = vpack.c.bf16 %v2462_v27, %v2462_v27  ;;  %v2266_v5 = vunpack.c.l.b16 %v2239_v16 }
 0x7b0   : > { %2556 = vst [vmem:[#allocation1 + $0x1] ss:$4 sm:$0xff] %v7106_v43 }
 0x7b1   : > { %5342 = vmatmul.msk.bf16.vlgmr.msra.gmra.mxu1 %vm1261_vm1, %v2023_v22  ;;  %2558 = vst [vmem:[#allocation1 + $0x2] ss:$4 sm:$0xff] %v7109_v44  ;;  %v2477_v51 = vunpack.c.l.b16 %v2472_v41  ;;  %v2267_v22 = vpack.c.b16 %v2266_v5, %v2266_v5 }
 0x7b3   : > { %v2478_v52 = vpack.c.b16 %v2477_v51, %v2477_v51 }
 0x7b5   : > { %v2301_v29 = vld.sshfl [vmem:[#allocation1 + $0x20] sm:$0xff pattern:$0x73625140]  ;;  %2479 = vrot.lane.b32.xlu1 %v2478_v52, %s6408_s14 }
 0x7b6   : > { %2399 = vst [vmem:[#allocation1 + $0x20] ss:$4 sm:$0xff] %v7112_v45 }
 0x7b7   : > { %2401 = vst [vmem:[#allocation1 + $0x21] ss:$4 sm:$0xff] %v7133_v15 }
 0x7b8   : > { %v7162_v30 = vld.sshfl [vmem:[#allocation1] sm:$0xff pattern:$0x73625140]  ;;  %2403 = vst [vmem:[#allocation1 + $0x22] ss:$4 sm:$0xff] %v7137_v6 }
 0x7b9   : > { %2619 = vst [vmem:[#allocation1] ss:$4 sm:$0xff] %v7103_v40 }
 0x7ba   : > { %2621 = vst [vmem:[#allocation1 + $0x1] ss:$4 sm:$0xff] %v7106_v43 }
 0x7bb   : > { %2623 = vst [vmem:[#allocation1 + $0x2] ss:$4 sm:$0xff] %v7109_v44 }
 0x7bf   : > { %v7168_v32 = vld.sshfl [vmem:[#allocation1 + $0x20] sm:$0xff pattern:$0x73625140] }
 0x7c0   : > { %2464 = vst [vmem:[#allocation1 + $0x20] ss:$4 sm:$0xff] %v7112_v45 }
 0x7c1   : > { %2466 = vst [vmem:[#allocation1 + $0x21] ss:$4 sm:$0xff] %v7133_v15 }
 0x7c2   : > { %v7172_v33 = vld.sshfl [vmem:[#allocation1] sm:$0xff pattern:$0x73625140]  ;;  %2468 = vst [vmem:[#allocation1 + $0x22] ss:$4 sm:$0xff] %v7137_v6 }
 0x7c3   : > { %2716 = vst [vmem:[#allocation1] ss:$4 sm:$0xff] %v7103_v40  ;;  %v2305_v40 = vpack.c.bf16 %v2301_v29, %v2301_v29  ;;  %v2634_v57 = vpack.c.bf16 %v7172_v33, %v7172_v33 }
 0x7c4   : > { %2718 = vst [vmem:[#allocation1 + $0x1] ss:$4 sm:$0xff] %v7106_v43  ;;  %v2154_v43 = vsel %vm1401_vm15, %v2148_v38, 0 }
 0x7c5   : > { %2720 = vst [vmem:[#allocation1 + $0x2] ss:$4 sm:$0xff] %v7109_v44  ;;  %v2173_v44 = vsel %vm1401_vm15, %v2149_v39, 0  ;;  %v2341_v46 = vunpack.c.l.b16 %v2305_v40  ;;  %2163 = vmatpush.bf16.xpose.msrb.mxu3 %v2154_v43  ;;  %v2639_v18 = vunpack.c.l.b16 %v2634_v57 }
 0x7c6   : > { %2182 = vmatpush.bf16.xpose.msrb.mxu0 %v2173_v44 }
 0x7c7   : > { %v2342_v50 = vpack.c.b16 %v2341_v46, %v2341_v46  ;;  %v2640_v11 = vpack.c.b16 %v2639_v18, %v2639_v18 }
 0x7c9   : > { %v7181_v34 = vld.sshfl [vmem:[#allocation1 + $0x20] sm:$0xff pattern:$0x73625140]  ;;  %2343 = vrot.lane.b32.xlu2 %v2342_v50, %s6410_s12 }
 0x7ca   : > { %2561 = vst [vmem:[#allocation1 + $0x20] ss:$4 sm:$0xff] %v7112_v45  ;;  %v2473_v10 = vpack.c.bf16 %v7181_v34, %v7181_v34 }
 0x7cb   : > { %2563 = vst [vmem:[#allocation1 + $0x21] ss:$4 sm:$0xff] %v7133_v15 }
 0x7cc   : > { %v7185_v28 = vld.sshfl [vmem:[#allocation1] sm:$0xff pattern:$0x73625140]  ;;  %2565 = vst [vmem:[#allocation1 + $0x22] ss:$4 sm:$0xff] %v7137_v6  ;;  %v2503_v13 = vunpack.c.l.b16 %v2473_v10 }
 0x7cd   : > { %2978 = vst [vmem:[#allocation1] ss:$4 sm:$0xff] %v2846_v31  ;;  %v7232_v31 = vld [vmem:[#allocation8] ss:$0 sm:$0xff] }
 0x7ce   : > { %2980 = vst [vmem:[#allocation1 + $0x1] ss:$4 sm:$0xff] %v2974_v26  ;;  %v2504_v14 = vpack.c.b16 %v2503_v13, %v2503_v13 }
 0x7cf   : > { %2982 = vst [vmem:[#allocation1 + $0x2] ss:$4 sm:$0xff] %v2975_v35  ;;  %v7234_v35 = vld [vmem:[#allocation8 + $0x1] ss:$0 sm:$0xff] }
 0x7d0   : > { %2984 = vst [vmem:[#allocation1 + $0x3] ss:$4 sm:$0xff] %v2847_v36 }
 0x7d3   : > { %v7195_v47 = vld.sshfl [vmem:[#allocation1 + $0x20] sm:$0xff pattern:$0x73625140] }
 0x7d4   : > { %2626 = vst [vmem:[#allocation1 + $0x20] ss:$4 sm:$0xff] %v7112_v45 }
 0x7d5   : > { %2628 = vst [vmem:[#allocation1 + $0x21] ss:$4 sm:$0xff] %v7133_v15 }
 0x7d6   : > { %2630 = vst [vmem:[#allocation1 + $0x22] ss:$4 sm:$0xff] %v7137_v6 }
 0x7dd   : > { %v2631_v54 = vld.sshfl [vmem:[#allocation1 + $0x20] sm:$0xff pattern:$0x73625140] }
 0x7de   : > { %2723 = vst [vmem:[#allocation1 + $0x20] ss:$4 sm:$0xff] %v7112_v45  ;;  %v2635_v62 = vpack.c.bf16 %v2631_v54, %v2631_v54 }
 0x7df   : > { %2725 = vst [vmem:[#allocation1 + $0x21] ss:$4 sm:$0xff] %v7133_v15 }
 0x7e0   : > { %2727 = vst [vmem:[#allocation1 + $0x22] ss:$4 sm:$0xff] %v7137_v6  ;;  %v2665_v4 = vunpack.c.l.b16 %v2635_v62 }
 0x7e2   : > { %v2666_v9 = vpack.c.b16 %v2665_v4, %v2665_v4 }
 0x7e7   : > { %v7206_v2 = vld.sshfl [vmem:[#allocation1 + $0x20] sm:$0xff pattern:$0x73625140] }
 0x7e8   : > { %2986 = vst [vmem:[#allocation1 + $0x20] ss:$4 sm:$0xff] %v2976_v55 }
 0x7e9   : > { %2988 = vst [vmem:[#allocation1 + $0x21] ss:$4 sm:$0xff] %v2977_v56 }
 0x815   : > { %v2315_v15 = vpop.permute.xlu1 %2314 }
 0x816   : > { %v2320_v6 = vsel %vm1401_vm15, %v2315_v15, 0 }
 0x817   : > { %2329 = vmatpush.bf16.xpose.msra.mxu3 %v2320_v6 }
 0x823   : > { %v2344_v19 = vpop.permute.xlu2 %2343 }
 0x824   : > { %v2349_v21 = vsel %vm1401_vm15, %v2344_v19, 0 }
 0x825   : > { %2358 = vmatpush.bf16.xpose.msra.mxu0 %v2349_v21 }
 0x827   : > { %v2480_v23 = vpop.permute.xlu1 %2479 }
 0x828   : > { %v2485_v24 = vsel %vm1401_vm15, %v2480_v23, 0 }
 0x82e   : > { %v2056_v59 = vpop.f32.mrf.mxu1 }
 0x82f   : > { %v2057_v60 = vadd.f32 %v5775_v58, %v2056_v59 }
 0x831   : > { %v2131_v3 = vpack.c.bf16 %v2057_v60, %v2057_v60 }
 0x833   : > { %v2307_v61 = vunpack.c.l.b16 %v2131_v3  ;;  %5352 = vmatmul.msk.bf16.vlgmr.msrb.gmra.mxu3 %vm1401_vm15, %v2131_v3 }
 0x834   : > { %2494 = vmatpush.bf16.xpose.msrb.mxu3 %v2485_v24 }
 0x835   : > { %v2308_v45 = vpack.c.b16 %v2307_v61, %v2307_v61 }
 0x836   : > { %v2058_v63 = vpop.f32.mrf.mxu1 }
 0x837   : > { %v2059_v0 = vadd.f32 %v5775_v58, %v2058_v63  ;;  %2474 = vrot.lane.b32.xlu2 %v2308_v45, %s6408_s14  ;;  %2309 = vrot.lane.b32.xlu0 %v2308_v45, %s6410_s12 }
 0x839   : > { %v2132_v1 = vpack.c.bf16 %v2059_v0, %v2059_v0 }
 0x83b   : > { %v2336_v7 = vunpack.c.l.b16 %v2132_v1  ;;  %5353 = vmatmul.msk.bf16.vlgmr.msrb.gmra.mxu0 %vm1401_vm15, %v2132_v1 }
 0x83d   : > { %v2337_v8 = vpack.c.b16 %v2336_v7, %v2336_v7 }
 0x83f   : > { %2338 = vrot.lane.b32.xlu1 %v2337_v8, %s6410_s12  ;;  %2667 = vrot.lane.b32.xlu2 %v2666_v9, %s6411_s5 }
 0x840   : > { %2500 = vrot.lane.b32.xlu0 %v2337_v8, %s6408_s14 }
 0x847   : > { %2505 = vrot.lane.b32.xlu1 %v2504_v14, %s6408_s14 }
 0x848   : > { %2636 = vrot.lane.b32.xlu0 %v2308_v45, %s6411_s5 }
 0x84f   : > { %2641 = vrot.lane.b32.xlu1 %v2640_v11, %s6411_s5 }
 0x850   : > { %2268 = vrot.lane.b32.xlu0 %v2267_v22, %s6406_s20 }
 0x857   : > { %2662 = vrot.lane.b32.xlu1 %v2337_v8, %s6411_s5 }
 0x891   : > { %v2475_v27 = vpop.permute.xlu2 %2474 }
 0x899   : > { %v2668_v36 = vpop.permute.xlu2 %2667 }
 0x89a   : > { %v2673_v43 = vsel %vm1401_vm15, %v2668_v36, 0 }
 0x8a9   : > { %v2310_v20 = vpop.permute.xlu0 %2309 }
 0x8aa   : > { %5356 = vmatmul.msk.bf16.vlgmr.msra.gmra.mxu3 %vm1401_vm15, %v2310_v20 }
 0x8b1   : > { %v2339_v29 = vpop.permute.xlu1 %2338 }
 0x8b2   : > { %v2501_v33 = vpop.permute.xlu0 %2500  ;;  %5357 = vmatmul.msk.bf16.vlgmr.msra.gmra.mxu0 %vm1401_vm15, %v2339_v29  ;;  %v2407_v29 = vpack.c.bf16 %v7146_v25, %v7146_v25 }
 0x8b6   : > { %v2165_v34 = vpop.f32.mrf.mxu3 }
 0x8b7   : > { %v2188_v26 = vmul.f32 0.35355338, %v2165_v34 }
 0x8b8   : > { %v2184_v37 = vpop.f32.mrf.mxu0 }
 0x8b9   : > { %v2189_v38 = vmul.f32 0.35355338, %v2184_v37  ;;  %v2506_v39 = vpop.permute.xlu1 %2505  ;;  %v2196_v40 = vadd.f32 %v7232_v31, %v2188_v26  ;;  %v2410_v26 = vunpack.c.l.b16 %v2407_v29 }
 0x8ba   : > { %v2637_v41 = vpop.permute.xlu0 %2636  ;;  %v2511_v42 = vsel %vm1401_vm15, %v2506_v39, 0  ;;  %5360 = vmatmul.msk.bf16.vlgmr.msrb.gmra.mxu3 %vm1401_vm15, %v2475_v27 }
 0x8bb   : > { %2520 = vmatpush.bf16.xpose.msrb.mxu0 %v2511_v42  ;;  %v2199_v44 = vsel %vm2198_vm4, %v2196_v40, -inf  ;;  %v2197_v46 = vadd.f32 %v7234_v35, %v2189_v38  ;;  %v2408_v38 = vpack.c.bf16 %v7168_v32, %v7168_v32  ;;  %v2238_v32 = vpack.c.bf16 %v7127_v17, %v7127_v17 }
 0x8bc   : > { %2200 = vmax.xlane.f32.xlu0 %v2199_v44 }
 0x8bd   : > { %v2202_v48 = vsel %vm2198_vm4, %v2197_v46, -inf  ;;  %v2434_v42 = vunpack.c.l.b16 %v2408_v38 }
 0x8be   : > { %2203 = vmax.xlane.f32.xlu2 %v2202_v48  ;;  %v2167_v50 = vpop.f32.mrf.mxu3  ;;  %v2241_v48 = vunpack.c.l.b16 %v2238_v32 }
 0x8c0   : > { %v2186_v51 = vpop.f32.mrf.mxu0  ;;  %v2242_v50 = vpack.c.b16 %v2241_v48, %v2241_v48 }
 0x8c1   : > { %v2642_v52 = vpop.permute.xlu1 %2641 }
 0x8c2   : > { %v2269_v54 = vpop.permute.xlu0 %2268  ;;  %v2647_v55 = vsel %vm1401_vm15, %v2642_v52, 0  ;;  %5361 = vmatmul.msk.bf16.vlgmr.msrb.gmra.mxu0 %vm1401_vm15, %v2501_v33 }
 0x8c3   : > { %2682 = vmatpush.bf16.xpose.msra.mxu0 %v2673_v43  ;;  %v2274_v56 = vsel %vm2248_vm5, %v2269_v54, 0  ;;  %2656 = vmatpush.bf16.xpose.msra.mxu3 %v2647_v55 }
 0x8c4   : > { %2283 = vmatpush.bf16.msrb.mxu2 %v2274_v56 }
 0x8c9   : > { %v2663_v58 = vpop.permute.xlu1 %2662 }
 0x8ca   : > { %5364 = vmatmul.msk.bf16.vlgmr.msra.gmra.mxu3 %vm1401_vm15, %v2637_v41  ;;  %v2570_v41 = vpack.c.bf16 %v7195_v47, %v7195_v47 }
 0x8cc   : > { %v2596_v43 = vunpack.c.l.b16 %v2570_v41 }
 0x8d2   : > { %5365 = vmatmul.msk.bf16.vlgmr.msra.gmra.mxu0 %vm1401_vm15, %v2663_v58 }
 0x92d   : > { %v2331_v59 = vpop.f32.mrf.mxu3 }
 0x92e   : > { %v2364_v60 = vmul.f32 0.35355338, %v2331_v59 }
 0x92f   : > { %v2201_v3 = vpop.xlane.xlu0 %2200  ;;  %v2360_v61 = vpop.f32.mrf.mxu0 }
 0x930   : > { %v2205_v45 = vsub.f32 %v2196_v40, %v2201_v3  ;;  %v2365_v62 = vmul.f32 0.35355338, %v2360_v61  ;;  %v7249_v63 = vadd.f32 %v7232_v31, %v2364_v60  ;;  %v2411_v40 = vpack.c.b16 %v2410_v26, %v2410_v26 }
 0x931   : > { %v2204_v0 = vpop.xlane.xlu2 %2203  ;;  %v2732_v26 = vpack.c.bf16 %v7206_v2, %v7206_v2 }
 0x932   : > { %v2207_v1 = vmul.f32 1.442695, %v2205_v45  ;;  %v2206_v4 = vsub.f32 %v2197_v46, %v2204_v0  ;;  %v2368_v7 = vsel %vm2198_vm4, %v7249_v63, -inf  ;;  %v2367_v8 = vadd.f32 %v7234_v35, %v2365_v62 }
 0x933   : > { %2369 = vmax.xlane.f32.xlu2 %v2368_v7  ;;  %v2435_v46 = vpack.c.b16 %v2434_v42, %v2434_v42 }
 0x934   : > { %5841 = vpow2.f32 %v2207_v1  ;;  %v2209_v9 = vmul.f32 1.442695, %v2206_v4  ;;  %v2371_v10 = vsel %vm2198_vm4, %v2367_v8, -inf }
 0x935   : > { %v2333_v13 = vpop.f32.mrf.mxu3  ;;  %2372 = vmax.xlane.f32.xlu1 %v2371_v10 }
 0x936   : > { %5843 = vpow2.f32 %v2209_v9 }
 0x937   : > { %v2362_v14 = vpop.f32.mrf.mxu0 }
 0x93a   : > { %v7255_v57 = vpop.eup %5841 }
 0x93b   : > { %v2211_v16 = vsel %vm2198_vm4, %v7255_v57, 0.0 }
 0x93c   : > { %v5844_v18 = vpop.eup %5843  ;;  %2212 = vadd.xlane.f32.xlu2 %v2211_v16 }
 0x93d   : > { %v2496_v19 = vpop.f32.mrf.mxu3  ;;  %v2214_v5 = vsel %vm2198_vm4, %v5844_v18, 0.0 }
 0x93e   : > { %v2526_v21 = vmul.f32 0.35355338, %v2496_v19  ;;  %2215 = vadd.xlane.f32.xlu0 %v2214_v5 }
 0x93f   : > { %v2522_v11 = vpop.f32.mrf.mxu0 }
 0x940   : > { %v2527_v22 = vmul.f32 0.35355338, %v2522_v11  ;;  %v2528_v15 = vadd.f32 %v7232_v31, %v2526_v21 }
 0x942   : > { %v2530_v6 = vsel %vm2198_vm4, %v2528_v15, -inf  ;;  %v2529_v23 = vadd.f32 %v7234_v35, %v2527_v22 }
 0x943   : > { %2531 = vmax.xlane.f32.xlu1 %v2530_v6 }
 0x944   : > { %v2533_v24 = vsel %vm2198_vm4, %v2529_v23, -inf }
 0x945   : > { %v2498_v20 = vpop.f32.mrf.mxu3 }
 0x946   : > { %2534 = vmax.xlane.f32.xlu0 %v2533_v24 }
 0x947   : > { %v2524_v27 = vpop.f32.mrf.mxu0 }
 0x94d   : > { %v2658_v33 = vpop.f32.mrf.mxu3 }
 0x94e   : > { %v2688_v34 = vmul.f32 0.35355338, %v2658_v33 }
 0x94f   : > { %v2684_v36 = vpop.f32.mrf.mxu0 }
 0x950   : > { %v2690_v37 = vadd.f32 %v7232_v31, %v2688_v34  ;;  %v2597_v31 = vpack.c.b16 %v2596_v43, %v2596_v43  ;;  %v2689_v47 = vmul.f32 0.35355338, %v2684_v36 }
 0x952   : > { %v2692_v39 = vsel %vm2198_vm4, %v2690_v37, -inf  ;;  %v7279_v51 = vadd.f32 %v7234_v35, %v2689_v47 }
 0x953   : > { %2693 = vmax.xlane.f32.xlu1 %v2692_v39  ;;  %v2731_v39 = vpack.c.bf16 %v7185_v28, %v7185_v28 }
 0x954   : > { %2412 = vrot.lane.b32.xlu2 %v2411_v40, %s6405_s19  ;;  %v2695_v52 = vsel %vm2198_vm4, %v7279_v51, -inf }
 0x955   : > { %v2660_v25 = vpop.f32.mrf.mxu3 }
 0x956   : > { %v2734_v25 = vunpack.c.l.b16 %v2731_v39 }
 0x957   : > { %v2686_v44 = vpop.f32.mrf.mxu0 }
 0x958   : > { %v2735_v43 = vpack.c.b16 %v2734_v25, %v2734_v25 }
 0x95a   : > { %2436 = vrot.lane.b32.xlu0 %v2435_v46, %s6405_s19 }
 0x95c   : > { %2598 = vrot.lane.b32.xlu2 %v2597_v31, %s6407_s3 }
 0x96c   : > { %2243 = vrot.lane.b32.xlu1 %v2242_v50, %s6406_s20 }
 0x985   : > { %2696 = vmax.xlane.f32.xlu2 %v2695_v52 }
 0x9a6   : > { %v2370_v54 = vpop.xlane.xlu2 %2369 }
 0x9a7   : > { %v2374_v55 = vsub.f32 %v7249_v63, %v2370_v54 }
 0x9a8   : > { %v2373_v56 = vpop.xlane.xlu1 %2372 }
 0x9a9   : > { %v2376_v58 = vmul.f32 1.442695, %v2374_v55  ;;  %v2375_v59 = vsub.f32 %v2367_v8, %v2373_v56 }
 0x9ab   : > { %5845 = vpow2.f32 %v2376_v58  ;;  %v2378_v17 = vmul.f32 1.442695, %v2375_v59 }
 0x9ad   : > { %5847 = vpow2.f32 %v2378_v17 }
 0x9af   : > { %v2213_v62 = vpop.xlane.xlu2 %2212 }
 0x9b1   : > { %v7284_v60 = vpop.eup %5845  ;;  %v2216_v3 = vpop.xlane.xlu0 %2215 }
 0x9b2   : > { %5849 = vrcp.f32 %v2216_v3  ;;  %v2380_v35 = vsel %vm2198_vm4, %v7284_v60, 0.0 }
 0x9b3   : > { %2381 = vadd.xlane.f32.xlu2 %v2380_v35  ;;  %v7288_v45 = vpop.eup %5847 }
 0x9b4   : > { %v2383_v9 = vsel %vm2198_vm4, %v7288_v45, 0.0 }
 0x9b6   : > { %v2532_v61 = vpop.xlane.xlu1 %2531 }
 0x9b7   : > { %v2536_v0 = vsub.f32 %v2528_v15, %v2532_v61  ;;  %v2413_v16 = vpop.permute.xlu2 %2412  ;;  %v2569_v15 = vpack.c.bf16 %v7162_v30, %v7162_v30  ;;  %v2758_v30 = vunpack.c.l.b16 %v2732_v26 }
 0x9b8   : > { %v5850_v63 = vpop.eup %5849  ;;  %v2418_v42 = vsel %vm2248_vm5, %v2413_v16, 0 }
 0x9b9   : > { %v2220_v1 = vmul.f32 %v5850_v63, %v5844_v18  ;;  %v2538_v4 = vmul.f32 1.442695, %v2536_v0  ;;  %v2535_v7 = vpop.xlane.xlu0 %2534  ;;  %v2572_v20 = vunpack.c.l.b16 %v2569_v15 }
 0x9ba   : > { %v2537_v8 = vsub.f32 %v2529_v23, %v2535_v7 }
 0x9bb   : > { %v2222_v10 = vpack.c.bf16 %v2220_v1, %v2220_v1  ;;  %5851 = vpow2.f32 %v2538_v4  ;;  %2384 = vadd.xlane.f32.xlu2 %v2383_v9  ;;  %v2573_v33 = vpack.c.b16 %v2572_v20, %v2572_v20 }
 0x9bc   : > { %v2540_v13 = vmul.f32 1.442695, %v2537_v8 }
 0x9bd   : > { %5355 = vmatmul.msk.bf16.vlgmr.msrb.gmra.mxu2 %vm2198_vm4, %v2222_v10  ;;  %v5541_v10 = vld [vmem:[%s6827_s18 + $0x18] sm:$0xff] }
 0x9be   : > { %5853 = vpow2.f32 %v2540_v13 }
 0x9bf   : > { %v2599_v6 = vpop.permute.xlu2 %2598 }
 0x9c0   : > { %v2604_v27 = vsel %vm2248_vm5, %v2599_v6, 0 }
 0x9c1   : > { %v7293_v14 = vpop.eup %5851 }
 0x9c2   : > { %v2542_v19 = vsel %vm2198_vm4, %v7293_v14, 0.0 }
 0x9c3   : > { %2543 = vadd.xlane.f32.xlu1 %v2542_v19  ;;  %v5540_v19 = vld [vmem:[%s6827_s18 + $0x10] sm:$0xff] }
 0x9c4   : > { %v7297_v18 = vpop.eup %5853 }
 0x9c5   : > { %v2545_v5 = vsel %vm2198_vm4, %v7297_v18, 0.0 }
 0x9c6   : > { %v2694_v21 = vpop.xlane.xlu1 %2693  ;;  %2546 = vadd.xlane.f32.xlu0 %v2545_v5 }
 0x9c7   : > { %v2698_v11 = vsub.f32 %v2690_v37, %v2694_v21  ;;  %v2759_v37 = vpack.c.b16 %v2758_v30, %v2758_v30  ;;  %v2989_v21 = vld.sshfl [vmem:[#allocation1] sm:$0xff pattern:$0x73625140] }
 0x9c9   : > { %v2700_v22 = vmul.f32 1.442695, %v2698_v11  ;;  %v2990_v11 = vld.sshfl [vmem:[#allocation1 + $0x20] sm:$0xff pattern:$0x73625140] }
 0x9cb   : > { %5855 = vpow2.f32 %v2700_v22  ;;  %v2993_v22 = vpack.c.bf16 %v2990_v11, %v2989_v21 }
 0x9cc   : > { %v2437_v23 = vpop.permute.xlu0 %2436  ;;  %5857 = vrcp.f32 %v2213_v62 }
 0x9cd   : > { %v2442_v24 = vsel %vm2248_vm5, %v2437_v23, 0 }
 0x9ce   : > { %2451 = vmatpush.bf16.msra.mxu2 %v2442_v24 }
 0x9d1   : > { %v7305_v29 = vpop.eup %5855 }
 0x9d2   : > { %2613 = vmatpush.bf16.msrb.mxu2 %v2604_v27  ;;  %v2704_v34 = vsel %vm2198_vm4, %v7305_v29, 0.0  ;;  %v5858_v36 = vpop.eup %5857 }
 0x9d3   : > { %2705 = vadd.xlane.f32.xlu0 %v2704_v34  ;;  %2574 = vrot.lane.b32.xlu2 %v2573_v33, %s6407_s3  ;;  %v2219_v38 = vmul.f32 %v5858_v36, %v7255_v57 }
 0x9d5   : > { %v2221_v2 = vpack.c.bf16 %v2219_v38, %v2219_v38 }
 0x9dc   : > { %2760 = vrot.lane.b32.xlu1 %v2759_v37, %s6409_s10 }
 0x9de   : > { %v2244_v40 = vpop.permute.xlu1 %2243 }
 0x9df   : > { %v2250_v41 = vsel %vm2248_vm5, %v2244_v40, 0 }
 0x9e0   : > { %2259 = vmatpush.bf16.msrb.mxu1 %v2250_v41  ;;  %v5778_v41 = vld [vmem:[%s6881_s2 + $0x1] ss:$0 sm:$0xff] }
 0x9e3   : > { %5354 = vmatmul.msk.bf16.vlgmr.msrb.gmra.mxu1 %vm2198_vm4, %v2221_v2  ;;  %v5537_v2 = vld [vmem:[%s8154_s23 + $0x8] sm:$0xff] }
 0x9e4   : > { %2427 = vmatpush.bf16.msra.mxu1 %v2418_v42  ;;  %2836 = vmatpush.bf16.msrb.mxu3 %v5537_v2 }
 0x9e7   : > { %2736 = vrot.lane.b32.xlu0 %v2735_v43, %s6409_s10 }
 0x9f8   : > { %v2697_v44 = vpop.xlane.xlu2 %2696 }
 0x9f9   : > { %v2699_v57 = vsub.f32 %v7279_v51, %v2697_v44 }
 0x9fb   : > { %v2702_v46 = vmul.f32 1.442695, %v2699_v57 }
 0x9fd   : > { %5859 = vpow2.f32 %v2702_v46  ;;  %v5536_v46 = vld [vmem:[%s8154_s23] sm:$0xff] }
 0x9fe   : > { %2837 = vmatpush.bf16.msrb.mxu3 %v5536_v46 }
 0xa03   : > { %v5860_v28 = vpop.eup %5859 }
 0xa04   : > { %v2707_v31 = vsel %vm2198_vm4, %v5860_v28, 0.0 }
 0xa05   : > { %2708 = vadd.xlane.f32.xlu2 %v2707_v31 }
 0xa26   : > { %v2382_v32 = vpop.xlane.xlu2 %2381 }
 0xa27   : > { %5861 = vrcp.f32 %v2382_v32 }
 0xa2d   : > { %v5862_v48 = vpop.eup %5861 }
 0xa2e   : > { %v2388_v50 = vmul.f32 %v5862_v48, %v7284_v60  ;;  %v2385_v47 = vpop.xlane.xlu2 %2384 }
 0xa2f   : > { %5863 = vrcp.f32 %v2385_v47 }
 0xa30   : > { %v2390_v52 = vpack.c.bf16 %v2388_v50, %v2388_v50 }
 0xa32   : > { %5358 = vmatmul.msk.bf16.vlgmr.msra.gmra.mxu1 %vm2198_vm4, %v2390_v52 }
 0xa35   : > { %v5864_v54 = vpop.eup %5863 }
 0xa36   : > { %v2389_v55 = vmul.f32 %v5864_v54, %v7288_v45  ;;  %v2544_v51 = vpop.xlane.xlu1 %2543  ;;  %v2575_v56 = vpop.permute.xlu2 %2574 }
 0xa37   : > { %5865 = vrcp.f32 %v2544_v51  ;;  %v2580_v58 = vsel %vm2248_vm5, %v2575_v56, 0 }
 0xa38   : > { %v2391_v59 = vpack.c.bf16 %v2389_v55, %v2389_v55  ;;  %2589 = vmatpush.bf16.msrb.mxu1 %v2580_v58 }
 0xa39   : > { %v2547_v17 = vpop.xlane.xlu0 %2546 }
 0xa3a   : > { %5359 = vmatmul.msk.bf16.vlgmr.msra.gmra.mxu2 %vm2198_vm4, %v2391_v59  ;;  %5867 = vrcp.f32 %v2547_v17 }
 0xa3d   : > { %v5866_v60 = vpop.eup %5865 }
 0xa3e   : > { %v2550_v3 = vmul.f32 %v5866_v60, %v7293_v14 }
 0xa40   : > { %v2552_v35 = vpack.c.bf16 %v2550_v3, %v2550_v3  ;;  %v7328_v61 = vpop.f32.mrf.mxu2  ;;  %v5868_v62 = vpop.eup %5867 }
 0xa41   : > { %v2551_v45 = vmul.f32 %v5868_v62, %v7297_v18 }
 0xa42   : > { %5362 = vmatmul.msk.bf16.vlgmr.msrb.gmra.mxu1 %vm2198_vm4, %v2552_v35 }
 0xa43   : > { %v2553_v0 = vpack.c.bf16 %v2551_v45, %v2551_v45 }
 0xa46   : > { %v2706_v1 = vpop.xlane.xlu0 %2705 }
 0xa47   : > { %5869 = vrcp.f32 %v2706_v1 }
 0xa48   : > { %v2287_v63 = vpop.f32.mrf.mxu2 }
 0xa4a   : > { %5363 = vmatmul.msk.bf16.vlgmr.msrb.gmra.mxu2 %vm2198_vm4, %v2553_v0 }
 0xa4d   : > { %v5870_v8 = vpop.eup %5869 }
 0xa4e   : > { %v2761_v4 = vpop.permute.xlu1 %2760  ;;  %v2712_v9 = vmul.f32 %v5870_v8, %v7305_v29 }
 0xa4f   : > { %v2766_v7 = vsel %vm2248_vm5, %v2761_v4, 0 }
 0xa50   : > { %2775 = vmatpush.bf16.msra.mxu2 %v2766_v7  ;;  %v2714_v16 = vpack.c.bf16 %v2712_v9, %v2712_v9  ;;  %v3759_v7 = vld [vmem:[%s8155_s29] sm:$0x3f] }
 0xa51   : > { %v3887_v9 = vrot.slane %v3759_v7, 2 }
 0xa59   : > { %v2737_v13 = vpop.permute.xlu0 %2736 }
 0xa5a   : > { %v2742_v14 = vsel %vm2248_vm5, %v2737_v13, 0 }
 0xa5b   : > { %2751 = vmatpush.bf16.msra.mxu1 %v2742_v14  ;;  %v3760_v14 = vld [vmem:[%s8155_s29 + $0x8] sm:$0x3f] }
 0xa5e   : > { %5366 = vmatmul.msk.bf16.vlgmr.msra.gmra.mxu1 %vm2198_vm4, %v2714_v16  ;;  %v3889_v16 = vrot.slane %v3760_v14, 2 }
 0xa5f   : > { %3025 = vmatpush.bf16.msrb.mxu1 %v5541_v10  ;;  %v3888_v10 = vrot.slane %v3759_v7, 4 }
 0xa60   : > { %v7339_v18 = vpop.f32.mrf.mxu1 }
 0xa63   : > { %3026 = vmatpush.bf16.msrb.mxu1 %v5540_v19  ;;  %v3890_v19 = vrot.slane %v3760_v14, 4 }
 0xa68   : > { %v2263_v5 = vpop.f32.mrf.mxu1 }
 0xa6e   : > { %5404 = vmatmul.msk.bf16.vlgmr.msrb.gmra.mxu1 %vm1261_vm1, %v2993_v22 }
 0xa78   : > { %v2709_v15 = vpop.xlane.xlu2 %2708 }
 0xa79   : > { %5871 = vrcp.f32 %v2709_v15 }
 0xa7f   : > { %v5872_v6 = vpop.eup %5871 }
 0xa80   : > { %v2713_v23 = vmul.f32 %v5872_v6, %v5860_v28 }
 0xa82   : > { %v2715_v24 = vpack.c.bf16 %v2713_v23, %v2713_v23 }
 0xa84   : > { %5367 = vmatmul.msk.bf16.vlgmr.msra.gmra.mxu2 %vm2198_vm4, %v2715_v24 }
 0xaaf   : > { %v2429_v20 = vpop.f32.mrf.mxu1 }
 0xab7   : > { %v2431_v27 = vpop.f32.mrf.mxu1 }
 0xabd   : > { %v2453_v29 = vpop.f32.mrf.mxu2 }
 0xabe   : > { %v5725_v33 = vpack.i.bf16 %v2453_v29, %v2429_v20 }
 0xabf   : > { %v2591_v34 = vpop.f32.mrf.mxu1 }
 0xac0   : > { %5726 = vrot.lane.b32.xlu1 %v5725_v33, %s6416_s17 }
 0xac5   : > { %v2455_v26 = vpop.f32.mrf.mxu2 }
 0xac7   : > { %v2593_v30 = vpop.f32.mrf.mxu1 }
 0xacd   : > { %v2615_v36 = vpop.f32.mrf.mxu2 }
 0xace   : > { %v5730_v37 = vpack.i.bf16 %v2615_v36, %v2591_v34 }
 0xad0   : > { %5731 = vrot.lane.b32.xlu0 %v5730_v37, %s6417_s7 }
 0xad5   : > { %v2617_v38 = vpop.f32.mrf.mxu2 }
 0xad6   : > { %v5779_v38 = vld [vmem:[%s6893_s6] ss:$0 sm:$0xff] }
 0xadb   : > { %v2753_v39 = vpop.f32.mrf.mxu1 }
 0xae3   : > { %v2755_v40 = vpop.f32.mrf.mxu1 }
 0xaeb   : > { %v3028_v42 = vpop.f32.mrf.mxu1 }
 0xaec   : > { %v7347_v25 = vadd.f32 %v5778_v41, %v3028_v42 }
 0xaee   : > { %v7350_v43 = vrot.slane %v7347_v25, 2  ;;  %v7353_v44 = vrot.slane %v7347_v25, 4  ;;  %v7356_v57 = vrot.slane %v7347_v25, 6  ;;  %3048 = vst [vmem:[#allocation1] ss:$4 sm:$0xff] %v7347_v25 }
 0xaf0   : > { %3050 = vst [vmem:[#allocation1 + $0x1] ss:$4 sm:$0xff] %v7350_v43 }
 0xaf1   : > { %3052 = vst [vmem:[#allocation1 + $0x2] ss:$4 sm:$0xff] %v7353_v44 }
 0xaf2   : > { %3055 = vst [vmem:[#allocation1 + $0x20] ss:$4 sm:$0xff] %v7356_v57 }
 0xaf3   : > { %v3030_v28 = vpop.f32.mrf.mxu1 }
 0xaf4   : > { %v7363_v31 = vadd.f32 %v5778_v41, %v3030_v28 }
 0xaf6   : > { %v7366_v32 = vrot.slane %v7363_v31, 2  ;;  %3057 = vst [vmem:[#allocation1 + $0x21] ss:$4 sm:$0xff] %v7363_v31 }
 0xaf8   : > { %v3053_v48 = vld.sshfl [vmem:[#allocation1] sm:$0xff pattern:$0x73625140]  ;;  %3059 = vst [vmem:[#allocation1 + $0x22] ss:$4 sm:$0xff] %v7366_v32 }
 0xaf9   : > { %3137 = vst [vmem:[#allocation1] ss:$4 sm:$0xff] %v7347_v25  ;;  %v3063_v50 = vpack.c.bf16 %v3053_v48, %v3053_v48 }
 0xafa   : > { %3139 = vst [vmem:[#allocation1 + $0x1] ss:$4 sm:$0xff] %v7350_v43 }
 0xafb   : > { %3141 = vst [vmem:[#allocation1 + $0x2] ss:$4 sm:$0xff] %v7353_v44  ;;  %v3069_v47 = vsel %vm1401_vm15, %v3063_v50, 0 }
 0xafc   : > { %3078 = vmatpush.bf16.xpose.msrb.mxu2 %v3069_v47 }
 0xaff   : > { %v3060_v52 = vld.sshfl [vmem:[#allocation1 + $0x20] sm:$0xff pattern:$0x73625140] }
 0xb00   : > { %3144 = vst [vmem:[#allocation1 + $0x20] ss:$4 sm:$0xff] %v7356_v57  ;;  %v3064_v54 = vpack.c.bf16 %v3060_v52, %v3060_v52 }
 0xb01   : > { %3146 = vst [vmem:[#allocation1 + $0x21] ss:$4 sm:$0xff] %v7363_v31 }
 0xb02   : > { %v7376_v55 = vld.sshfl [vmem:[#allocation1] sm:$0xff pattern:$0x73625140]  ;;  %3148 = vst [vmem:[#allocation1 + $0x22] ss:$4 sm:$0xff] %v7366_v32  ;;  %v3088_v51 = vsel %vm1401_vm15, %v3064_v54, 0 }
 0xb03   : > { %3202 = vst [vmem:[#allocation1] ss:$4 sm:$0xff] %v7347_v25  ;;  %3097 = vmatpush.bf16.xpose.msra.mxu3 %v3088_v51 }
 0xb04   : > { %3204 = vst [vmem:[#allocation1 + $0x1] ss:$4 sm:$0xff] %v7350_v43 }
 0xb05   : > { %3206 = vst [vmem:[#allocation1 + $0x2] ss:$4 sm:$0xff] %v7353_v44 }
 0xb07   : > { %v2777_v56 = vpop.f32.mrf.mxu2 }
 0xb08   : > { %v5735_v58 = vpack.i.bf16 %v2777_v56, %v2753_v39 }
 0xb09   : > { %v7383_v59 = vld.sshfl [vmem:[#allocation1 + $0x20] sm:$0xff pattern:$0x73625140] }
 0xb0a   : > { %3209 = vst [vmem:[#allocation1 + $0x20] ss:$4 sm:$0xff] %v7356_v57  ;;  %5736 = vrot.lane.b32.xlu2 %v5735_v58, %s6418_s4 }
 0xb0b   : > { %3211 = vst [vmem:[#allocation1 + $0x21] ss:$4 sm:$0xff] %v7363_v31 }
 0xb0c   : > { %v7388_v17 = vld.sshfl [vmem:[#allocation1] sm:$0xff pattern:$0x73625140]  ;;  %3213 = vst [vmem:[#allocation1 + $0x22] ss:$4 sm:$0xff] %v7366_v32 }
 0xb0d   : > { %3305 = vst [vmem:[#allocation1] ss:$4 sm:$0xff] %v7347_v25 }
 0xb0e   : > { %3307 = vst [vmem:[#allocation1 + $0x1] ss:$4 sm:$0xff] %v7350_v43 }
 0xb0f   : > { %3309 = vst [vmem:[#allocation1 + $0x2] ss:$4 sm:$0xff] %v7353_v44  ;;  %v2779_v60 = vpop.f32.mrf.mxu2 }
 0xb13   : > { %v7394_v3 = vld.sshfl [vmem:[#allocation1 + $0x20] sm:$0xff pattern:$0x73625140] }
 0xb14   : > { %3312 = vst [vmem:[#allocation1 + $0x20] ss:$4 sm:$0xff] %v7356_v57  ;;  %v3218_v56 = vpack.c.bf16 %v7394_v3, %v7394_v3 }
 0xb15   : > { %3314 = vst [vmem:[#allocation1 + $0x21] ss:$4 sm:$0xff] %v7363_v31 }
 0xb16   : > { %v7398_v35 = vld.sshfl [vmem:[#allocation1] sm:$0xff pattern:$0x73625140]  ;;  %3316 = vst [vmem:[#allocation1 + $0x22] ss:$4 sm:$0xff] %v7366_v32  ;;  %v3254_v58 = vunpack.c.l.b16 %v3218_v56 }
 0xb17   : > { %3370 = vst [vmem:[#allocation1] ss:$4 sm:$0xff] %v7347_v25 }
 0xb18   : > { %3372 = vst [vmem:[#allocation1 + $0x1] ss:$4 sm:$0xff] %v7350_v43 }
 0xb19   : > { %3374 = vst [vmem:[#allocation1 + $0x2] ss:$4 sm:$0xff] %v7353_v44 }
 0xb1d   : > { %v7404_v62 = vld.sshfl [vmem:[#allocation1 + $0x20] sm:$0xff pattern:$0x73625140] }
 0xb1e   : > { %3377 = vst [vmem:[#allocation1 + $0x20] ss:$4 sm:$0xff] %v7356_v57 }
 0xb1f   : > { %3379 = vst [vmem:[#allocation1 + $0x21] ss:$4 sm:$0xff] %v7363_v31 }
 0xb20   : > { %v7408_v45 = vld.sshfl [vmem:[#allocation1] sm:$0xff pattern:$0x73625140]  ;;  %3381 = vst [vmem:[#allocation1 + $0x22] ss:$4 sm:$0xff] %v7366_v32 }
 0xb21   : > { %3467 = vst [vmem:[#allocation1] ss:$4 sm:$0xff] %v7347_v25 }
 0xb22   : > { %3469 = vst [vmem:[#allocation1 + $0x1] ss:$4 sm:$0xff] %v7350_v43 }
 0xb23   : > { %3471 = vst [vmem:[#allocation1 + $0x2] ss:$4 sm:$0xff] %v7353_v44 }
 0xb27   : > { %v7414_v0 = vld.sshfl [vmem:[#allocation1 + $0x20] sm:$0xff pattern:$0x73625140] }
 0xb28   : > { %3474 = vst [vmem:[#allocation1 + $0x20] ss:$4 sm:$0xff] %v7356_v57  ;;  %v3386_v60 = vpack.c.bf16 %v7414_v0, %v7414_v0 }
 0xb29   : > { %3476 = vst [vmem:[#allocation1 + $0x21] ss:$4 sm:$0xff] %v7363_v31 }
 0xb2a   : > { %v7418_v63 = vld.sshfl [vmem:[#allocation1] sm:$0xff pattern:$0x73625140]  ;;  %3478 = vst [vmem:[#allocation1 + $0x22] ss:$4 sm:$0xff] %v7366_v32 }
 0xb2b   : > { %3532 = vst [vmem:[#allocation1] ss:$4 sm:$0xff] %v7347_v25 }
 0xb2c   : > { %3534 = vst [vmem:[#allocation1 + $0x1] ss:$4 sm:$0xff] %v7350_v43 }
 0xb2d   : > { %3536 = vst [vmem:[#allocation1 + $0x2] ss:$4 sm:$0xff] %v7353_v44 }
 0xb31   : > { %v7424_v1 = vld.sshfl [vmem:[#allocation1 + $0x20] sm:$0xff pattern:$0x73625140] }
 0xb32   : > { %3539 = vst [vmem:[#allocation1 + $0x20] ss:$4 sm:$0xff] %v7356_v57  ;;  %v5727_v21 = vpop.permute.xlu1 %5726 }
 0xb33   : > { %3541 = vst [vmem:[#allocation1 + $0x21] ss:$4 sm:$0xff] %v7363_v31  ;;  %v5729_v22 = vunpack.i.h.bf16 %v5727_v21  ;;  %v5728_v15 = vunpack.i.l.bf16 %v5727_v21 }
 0xb34   : > { %v7428_v4 = vld.sshfl [vmem:[#allocation1] sm:$0xff pattern:$0x73625140]  ;;  %3543 = vst [vmem:[#allocation1 + $0x22] ss:$4 sm:$0xff] %v7366_v32 }
 0xb35   : > { %3629 = vst [vmem:[#allocation1] ss:$4 sm:$0xff] %v7347_v25  ;;  %v2806_v20 = vsel %vm1401_vm15, %v7328_v61, %v5729_v22  ;;  %v2805_v27 = vsel %vm1401_vm15, %v7339_v18, %v5728_v15  ;;  %v5538_v22 = vld [vmem:[%s6867_s22 + $0x10] sm:$0xff] }
 0xb36   : > { %3631 = vst [vmem:[#allocation1 + $0x1] ss:$4 sm:$0xff] %v7350_v43  ;;  %v3217_v43 = vpack.c.bf16 %v7388_v17, %v7388_v17  ;;  %v3255_v17 = vpack.c.b16 %v3254_v58, %v3254_v58 }
 0xb37   : > { %3633 = vst [vmem:[#allocation1 + $0x2] ss:$4 sm:$0xff] %v7353_v44 }
 0xb38   : > { %v3225_v44 = vunpack.c.l.b16 %v3217_v43 }
 0xb3b   : > { %v7437_v8 = vld.sshfl [vmem:[#allocation1 + $0x20] sm:$0xff pattern:$0x73625140] }
 0xb3c   : > { %3638 = vst [vmem:[#allocation1 + $0x21] ss:$4 sm:$0xff] %v7363_v31 }
 0xb3d   : > { %3636 = vst [vmem:[#allocation1 + $0x20] ss:$4 sm:$0xff] %v7356_v57  ;;  %v3226_v57 = vpack.c.b16 %v3225_v44, %v3225_v44 }
 0xb3e   : > { %v7441_v13 = vld.sshfl [vmem:[#allocation1] sm:$0xff pattern:$0x73625140]  ;;  %3640 = vst [vmem:[#allocation1 + $0x22] ss:$4 sm:$0xff] %v7366_v32 }
 0xb3f   : > { %3891 = vst [vmem:[#allocation1] ss:$4 sm:$0xff] %v3759_v7  ;;  %v3416_v7 = vunpack.c.l.b16 %v3386_v60 }
 0xb40   : > { %3893 = vst [vmem:[#allocation1 + $0x1] ss:$4 sm:$0xff] %v3887_v9 }
 0xb41   : > { %3895 = vst [vmem:[#allocation1 + $0x2] ss:$4 sm:$0xff] %v3888_v10  ;;  %v3417_v9 = vpack.c.b16 %v3416_v7, %v3416_v7 }
 0xb42   : > { %3897 = vst [vmem:[#allocation1 + $0x3] ss:$4 sm:$0xff] %v3760_v14  ;;  %v5732_v11 = vpop.permute.xlu0 %5731 }
 0xb43   : > { %v5734_v6 = vunpack.i.h.bf16 %v5732_v11  ;;  %v5733_v23 = vunpack.i.l.bf16 %v5732_v11  ;;  %v5539_v11 = vld [vmem:[%s6867_s22 + $0x18] sm:$0xff] }
 0xb44   : > { %2964 = vmatpush.bf16.msrb.mxu0 %v5539_v11 }
 0xb45   : > { %v7447_v5 = vld.sshfl [vmem:[#allocation1 + $0x20] sm:$0xff pattern:$0x73625140]  ;;  %v2808_v34 = vsel %vm1896_vm2, %v2806_v20, %v5734_v6  ;;  %v2807_v26 = vsel %vm1896_vm2, %v2805_v27, %v5733_v23 }
 0xb46   : > { %3899 = vst [vmem:[#allocation1 + $0x20] ss:$4 sm:$0xff] %v3889_v16 }
 0xb47   : > { %3901 = vst [vmem:[#allocation1 + $0x21] ss:$4 sm:$0xff] %v3890_v19 }
 0xb48   : > { %2965 = vmatpush.bf16.msrb.mxu0 %v5538_v22 }
 0xb64   : > { %v5737_v24 = vpop.permute.xlu2 %5736 }
 0xb65   : > { %v5739_v29 = vunpack.i.h.bf16 %v5737_v24  ;;  %v5738_v33 = vunpack.i.l.bf16 %v5737_v24 }
 0xb67   : > { %v2810_v30 = vsel %vm1899_vm3, %v2808_v34, %v5739_v29  ;;  %v2809_v36 = vsel %vm1899_vm3, %v2807_v26, %v5738_v33 }
 0xb68   : > { %v2811_v37 = vpack.c.bf16 %v2810_v30, %v2809_v36 }
 0xb6a   : > { %5376 = vmatmul.msk.bf16.vlgmr.msrb.gmra.mxu3 %vm1261_vm1, %v2811_v37 }
 0xbed   : > { %v2839_v39 = vpop.f32.mrf.mxu3 }
 0xbee   : > { %v2840_v40 = vadd.f32 %v5779_v38, %v2839_v39 }
 0xbf0   : > { %v7460_v61 = vadd.f32 %v2840_v40, %v7065_v49 }
 0xbf2   : > { %v2850_v18 = vsel %vm1261_vm1, %v7460_v61, 0.0 }
 0xbf3   : > { %2851 = vadd.xlane.f32.xlu1 %v2850_v18 }
 0xbf5   : > { %v2841_v41 = vpop.f32.mrf.mxu3 }
 0xbf6   : > { %v2842_v42 = vadd.f32 %v5779_v38, %v2841_v41 }
 0xbf8   : > { %v7465_v2 = vadd.f32 %v2842_v42, %v7070_v53 }
 0xbfa   : > { %v2853_v25 = vsel %vm1261_vm1, %v7465_v2, 0.0 }
 0xbfb   : > { %2854 = vadd.xlane.f32.xlu0 %v2853_v25 }
 0xc0f   : > { %3227 = vrot.lane.b32.xlu0 %v3226_v57, %s6410_s12 }
 0xc66   : > { %v2852_v49 = vpop.xlane.xlu1 %2851 }
 0xc67   : > { %v2856_v46 = vmul.f32 %v2852_v49, %v6905_v12 }
 0xc69   : > { %v7474_v28 = vsub.f32 %v7460_v61, %v2856_v46 }
 0xc6b   : > { %v2860_v53 = vmul.f32 %v7474_v28, %v7474_v28 }
 0xc6d   : > { %v2862_v31 = vsel %vm1261_vm1, %v2860_v53, 0.0 }
 0xc6e   : > { %v2855_v32 = vpop.xlane.xlu0 %2854  ;;  %2863 = vadd.xlane.f32.xlu2 %v2862_v31 }
 0xc6f   : > { %v2857_v48 = vmul.f32 %v2855_v32, %v6905_v12 }
 0xc71   : > { %v7481_v50 = vsub.f32 %v7465_v2, %v2857_v48 }
 0xc73   : > { %v2861_v47 = vmul.f32 %v7481_v50, %v7481_v50 }
 0xc75   : > { %v2865_v52 = vsel %vm1261_vm1, %v2861_v47, 0.0 }
 0xc76   : > { %2866 = vadd.xlane.f32.xlu1 %v2865_v52  ;;  %v7497_v52 = vld [vmem:[%s6845_s24] sm:$0x1f] }
 0xc81   : > { %v3228_v54 = vpop.permute.xlu0 %3227 }
 0xc82   : > { %v3233_v51 = vsel %vm1401_vm15, %v3228_v54, 0  ;;  %v2924_v54 = vperm.slane %v7497_v52, 2 }
 0xc83   : > { %3242 = vmatpush.bf16.xpose.msra.mxu2 %v3233_v51 }
 0xc8f   : > { %3256 = vrot.lane.b32.xlu1 %v3255_v17, %s6410_s12 }
 0xc97   : > { %3418 = vrot.lane.b32.xlu1 %v3417_v9, %s6408_s14 }
 0xce1   : > { %v2864_v10 = vpop.xlane.xlu2 %2863 }
 0xce2   : > { %v2868_v14 = vmul.f32 0.032258064, %v2864_v10  ;;  %v2925_v10 = vmul.f32 %v2924_v54, %v7474_v28  ;;  %v5780_v28 = vld [vmem:[%s6876_s25 + $0x1] ss:$0 sm:$0xff] }
 0xce4   : > { %5873 = vrsqrt.f32 %v2868_v14  ;;  %vm2877_vm6 = vcmp.eq.f32.partialorder %v2868_v14, inf  ;;  %v2880_v33 = vand.u32 2147483648, %v2868_v14  ;;  %vm2879_vm7 = vcmp.eq.f32.partialorder %v2868_v14, 0.0 }
 0xce9   : > { %v2867_v16 = vpop.xlane.xlu1 %2866 }
 0xcea   : > { %v5874_v19 = vpop.eup %5873  ;;  %v2869_v21 = vmul.f32 0.032258064, %v2867_v16  ;;  %v2926_v16 = vmul.f32 %v2924_v54, %v7481_v50 }
 0xceb   : > { %v2871_v3 = vmul.f32 %v5874_v19, %v2868_v14 }
 0xcec   : > { %5875 = vrsqrt.f32 %v2869_v21  ;;  %vm2889_vm8 = vcmp.eq.f32.partialorder %v2869_v21, inf  ;;  %v2892_v40 = vand.u32 2147483648, %v2869_v21  ;;  %vm2891_vm9 = vcmp.eq.f32.partialorder %v2869_v21, 0.0 }
 0xced   : > { %v2872_v15 = vmul.f32 %v5874_v19, %v2871_v3  ;;  %v7503_v3 = vld [vmem:[%s6850_s8] sm:$0x1f] }
 0xcee   : > { %v2929_v22 = vperm.slane %v7503_v3, 2 }
 0xcef   : > { %v2873_v6 = vmul.f32 0.5, %v2872_v15 }
 0xcf1   : > { %v2874_v0 = vsub.f32 1.5, %v2873_v6 }
 0xcf2   : > { %v5876_v23 = vpop.eup %5875 }
 0xcf3   : > { %v2875_v24 = vmul.f32 %v5874_v19, %v2874_v0  ;;  %v2883_v20 = vmul.f32 %v5876_v23, %v2869_v21 }
 0xcf5   : > { %v2876_v27 = vmul.f32 %v2875_v24, %v2868_v14  ;;  %v2884_v29 = vmul.f32 %v5876_v23, %v2883_v20 }
 0xcf7   : > { %v2878_v34 = vsel %vm2877_vm6, %v2868_v14, %v2876_v27  ;;  %v2885_v26 = vmul.f32 0.5, %v2884_v29 }
 0xcf8   : > { %v2881_v30 = vsel %vm2879_vm7, %v2880_v33, %v2878_v34 }
 0xcf9   : > { %v2894_v36 = vadd.f32 1e-06, %v2881_v30  ;;  %v2886_v37 = vsub.f32 1.5, %v2885_v26  ;;  %v3547_v26 = vpack.c.bf16 %v7428_v4, %v7428_v4 }
 0xcfb   : > { %5877 = vrcp.f32 %v2894_v36  ;;  %v2887_v38 = vmul.f32 %v5876_v23, %v2886_v37  ;;  %v2907_v32 = vand.u32 2147483648, %v2894_v36  ;;  %vm2901_vm11 = vweird.f32 %v2894_v36 }
 0xcfc   : > { %v2905_v48 = vand.u32 2147483647, %v2894_v36 }
 0xcfd   : > { %v2888_v39 = vmul.f32 %v2887_v38, %v2869_v21  ;;  %v2908_v58 = vor.u32 1.1754944e-38, %v2907_v32  ;;  %v3552_v38 = vunpack.c.l.b16 %v3547_v26  ;;  %v7531_v32 = vld [vmem:[#allocation9] ss:$0 sm:$0xff] }
 0xcfe   : > { %vm2906_vm13 = vcmp.eq.f32.partialorder %v2905_v48, 8.507059e+37 }
 0xcff   : > { %v2890_v18 = vsel %vm2889_vm8, %v2869_v21, %v2888_v39 }
 0xd00   : > { %v2893_v41 = vsel %vm2891_vm9, %v2892_v40, %v2890_v18 }
 0xd01   : > { %v5878_v42 = vpop.eup %5877  ;;  %v2895_v25 = vadd.f32 1e-06, %v2893_v41  ;;  %v3257_v43 = vpop.permute.xlu1 %3256  ;;  %v3385_v41 = vpack.c.bf16 %v7408_v45, %v7408_v45 }
 0xd02   : > { %v3262_v44 = vsel %vm1401_vm15, %v3257_v43, 0  ;;  %v2897_v57 = vmul.f32 %v5878_v42, %v2894_v36  ;;  %vm2902_vm10 = vweird.f32 %v5878_v42  ;;  %v3152_v43 = vpack.c.bf16 %v7376_v55, %v7376_v55 }
 0xd03   : > { %5879 = vrcp.f32 %v2895_v25  ;;  %3271 = vmatpush.bf16.xpose.msrb.mxu3 %v3262_v44  ;;  %vm2903_vm12 = vmor %vm2901_vm11, %vm2902_vm10  ;;  %v2921_v17 = vand.u32 2147483648, %v2895_v25  ;;  %v2919_v7 = vand.u32 2147483647, %v2895_v25  ;;  %vm2915_vm0 = vweird.f32 %v2895_v25 }
 0xd04   : > { %v2898_v49 = vsub.f32 1.0, %v2897_v57  ;;  %v3390_v4 = vunpack.c.l.b16 %v3385_v41  ;;  %v3155_v44 = vunpack.c.l.b16 %v3152_v43  ;;  %v3548_v57 = vpack.c.bf16 %v7437_v8, %v7437_v8 }
 0xd05   : > { %v2922_v19 = vor.u32 1.1754944e-38, %v2921_v17  ;;  %vm2920_vm7 = vcmp.eq.f32.partialorder %v2919_v7, 8.507059e+37  ;;  %v7537_v7 = vld [vmem:[#allocation9 + $0x1] ss:$0 sm:$0xff] }
 0xd06   : > { %v2899_v46 = vmul.f32 %v5878_v42, %v2898_v49  ;;  %v3156_v45 = vpack.c.b16 %v3155_v44, %v3155_v44  ;;  %v3578_v49 = vunpack.c.l.b16 %v3548_v57 }
 0xd08   : > { %v2900_v53 = vadd.f32 %v5878_v42, %v2899_v46  ;;  %v3579_v46 = vpack.c.b16 %v3578_v49, %v3578_v49 }
 0xd09   : > { %v5880_v31 = vpop.eup %5879  ;;  %v3419_v36 = vpop.permute.xlu1 %3418 }
 0xd0a   : > { %v2911_v47 = vmul.f32 %v5880_v31, %v2895_v25  ;;  %v2904_v51 = vsel %vm2903_vm12, %v5878_v42, %v2900_v53  ;;  %vm2916_vm14 = vweird.f32 %v5880_v31  ;;  %v3424_v39 = vsel %vm1401_vm15, %v3419_v36, 0 }
 0xd0b   : > { %v2909_v9 = vsel %vm2906_vm13, %v2908_v58, %v2904_v51  ;;  %vm2917_vm6 = vmor %vm2915_vm0, %vm2916_vm14  ;;  %v3553_v42 = vpack.c.b16 %v3552_v38, %v3552_v38  ;;  %v3391_v25 = vpack.c.b16 %v3390_v4, %v3390_v4 }
 0xd0c   : > { %v2912_v56 = vsub.f32 1.0, %v2911_v47  ;;  %v2927_v11 = vmul.f32 %v2925_v10, %v2909_v9 }
 0xd0e   : > { %v2913_v60 = vmul.f32 %v5880_v31, %v2912_v56  ;;  %v2930_v0 = vadd.f32 %v2929_v22, %v2927_v11 }
 0xd10   : > { %v2914_v14 = vadd.f32 %v5880_v31, %v2913_v60 }
 0xd12   : > { %v2918_v21 = vsel %vm2917_vm6, %v5880_v31, %v2914_v14 }
 0xd13   : > { %v2923_v15 = vsel %vm2920_vm7, %v2922_v19, %v2918_v21 }
 0xd14   : > { %v2928_v6 = vmul.f32 %v2926_v16, %v2923_v15 }
 0xd16   : > { %v2931_v23 = vadd.f32 %v2929_v22, %v2928_v6 }
 0xd18   : > { %v2932_v24 = vpack.c.bf16 %v2931_v23, %v2930_v0 }
 0xd1a   : > { %5390 = vmatmul.msk.bf16.vlgmr.msrb.gmra.mxu0 %vm1261_vm1, %v2932_v24 }
 0xd97   : > { %v2967_v20 = vpop.f32.mrf.mxu0 }
 0xd98   : > { %v2968_v27 = vadd.f32 %v5780_v28, %v2967_v20 }
 0xd9a   : > { %v3046_v50 = vpack.c.bf16 %v2968_v27, %v2968_v27 }
 0xd9c   : > { %v3220_v29 = vunpack.c.l.b16 %v3046_v50  ;;  %5410 = vmatmul.msk.bf16.vlgmr.msrb.gmra.mxu2 %vm1401_vm15, %v3046_v50 }
 0xd9e   : > { %v3221_v33 = vpack.c.b16 %v3220_v29, %v3220_v29 }
 0xd9f   : > { %v2969_v34 = vpop.f32.mrf.mxu0 }
 0xda0   : > { %v2970_v30 = vadd.f32 %v5780_v28, %v2969_v34  ;;  %3222 = vrot.lane.b32.xlu2 %v3221_v33, %s6410_s12 }
 0xda2   : > { %v3047_v37 = vpack.c.bf16 %v2970_v30, %v2970_v30 }
 0xda4   : > { %v3249_v40 = vunpack.c.l.b16 %v3047_v37  ;;  %5411 = vmatmul.msk.bf16.vlgmr.msra.gmra.mxu3 %vm1401_vm15, %v3047_v37 }
 0xda5   : > { %3433 = vmatpush.bf16.xpose.msra.mxu3 %v3424_v39 }
 0xda6   : > { %v3250_v18 = vpack.c.b16 %v3249_v40, %v3249_v40 }
 0xda8   : > { %3413 = vrot.lane.b32.xlu1 %v3250_v18, %s6408_s14  ;;  %3251 = vrot.lane.b32.xlu0 %v3250_v18, %s6410_s12 }
 0xda9   : > { %3554 = vrot.lane.b32.xlu2 %v3553_v42, %s6411_s5 }
 0xdb0   : > { %3392 = vrot.lane.b32.xlu0 %v3391_v25, %s6408_s14  ;;  %3549 = vrot.lane.b32.xlu1 %v3221_v33, %s6411_s5 }
 0xdb1   : > { %3575 = vrot.lane.b32.xlu2 %v3250_v18, %s6411_s5 }
 0xdb8   : > { %3157 = vrot.lane.b32.xlu1 %v3156_v45, %s6406_s20  ;;  %3387 = vrot.lane.b32.xlu0 %v3221_v33, %s6408_s14 }
 0xdc0   : > { %3580 = vrot.lane.b32.xlu0 %v3579_v46, %s6411_s5 }
 0xdfa   : > { %v3223_v55 = vpop.permute.xlu2 %3222 }
 0xdfb   : > { %5414 = vmatmul.msk.bf16.vlgmr.msra.gmra.mxu2 %vm1401_vm15, %v3223_v55 }
 0xe03   : > { %v3555_v8 = vpop.permute.xlu2 %3554 }
 0xe04   : > { %v3560_v17 = vsel %vm1401_vm15, %v3555_v8, 0 }
 0xe0b   : > { %v3576_v23 = vpop.permute.xlu2 %3575 }
 0xe1a   : > { %v3252_v53 = vpop.permute.xlu0 %3251  ;;  %v3414_v31 = vpop.permute.xlu1 %3413 }
 0xe1b   : > { %5415 = vmatmul.msk.bf16.vlgmr.msrb.gmra.mxu3 %vm1401_vm15, %v3252_v53 }
 0xe1f   : > { %v3080_v48 = vpop.f32.mrf.mxu2 }
 0xe20   : > { %v3103_v47 = vmul.f32 0.35355338, %v3080_v48 }
 0xe22   : > { %v3393_v54 = vpop.permute.xlu0 %3392  ;;  %v3550_v51 = vpop.permute.xlu1 %3549  ;;  %v3111_v56 = vadd.f32 %v7531_v32, %v3103_v47  ;;  %v3320_v47 = vpack.c.bf16 %v7398_v35, %v7398_v35 }
 0xe23   : > { %v3398_v58 = vsel %vm1401_vm15, %v3393_v54, 0 }
 0xe24   : > { %3407 = vmatpush.bf16.xpose.msrb.mxu2 %v3398_v58  ;;  %v3113_v60 = vsel %vm2198_vm4, %v3111_v56, -inf  ;;  %v3323_v8 = vunpack.c.l.b16 %v3320_v47 }
 0xe25   : > { %3114 = vmax.xlane.f32.xlu0 %v3113_v60  ;;  %v3153_v60 = vpack.c.bf16 %v7383_v59, %v7383_v59 }
 0xe26   : > { %v3324_v58 = vpack.c.b16 %v3323_v8, %v3323_v8  ;;  %v3483_v8 = vpack.c.bf16 %v7424_v1, %v7424_v1 }
 0xe27   : > { %v3082_v9 = vpop.f32.mrf.mxu2  ;;  %v3099_v10 = vpop.f32.mrf.mxu3  ;;  %v3179_v35 = vunpack.c.l.b16 %v3153_v60  ;;  %v3644_v60 = vpack.c.bf16 %v7441_v13, %v7441_v13 }
 0xe28   : > { %v3104_v14 = vmul.f32 0.35355338, %v3099_v10 }
 0xe2a   : > { %v3388_v16 = vpop.permute.xlu0 %3387  ;;  %v3158_v19 = vpop.permute.xlu1 %3157  ;;  %v3112_v21 = vadd.f32 %v7537_v7, %v3104_v14 }
 0xe2b   : > { %v3163_v11 = vsel %vm2248_vm5, %v3158_v19, 0  ;;  %5418 = vmatmul.msk.bf16.vlgmr.msrb.gmra.mxu2 %vm1401_vm15, %v3388_v16  ;;  %5419 = vmatmul.msk.bf16.vlgmr.msra.gmra.mxu3 %vm1401_vm15, %v3414_v31  ;;  %v3180_v16 = vpack.c.b16 %v3179_v35, %v3179_v35  ;;  %v3321_v19 = vpack.c.bf16 %v7404_v62, %v7404_v62 }
 0xe2c   : > { %3569 = vmatpush.bf16.xpose.msra.mxu2 %v3560_v17  ;;  %3172 = vmatpush.bf16.msra.mxu0 %v3163_v11  ;;  %v3116_v22 = vsel %vm2198_vm4, %v3112_v21, -inf }
 0xe2d   : > { %3117 = vmax.xlane.f32.xlu1 %v3116_v22 }
 0xe2f   : > { %v3101_v15 = vpop.f32.mrf.mxu3 }
 0xe30   : > { %v3482_v15 = vpack.c.bf16 %v7418_v63, %v7418_v63 }
 0xe32   : > { %v3581_v6 = vpop.permute.xlu0 %3580 }
 0xe33   : > { %v3586_v0 = vsel %vm1401_vm15, %v3581_v6, 0  ;;  %v3485_v6 = vunpack.c.l.b16 %v3482_v15 }
 0xe34   : > { %3595 = vmatpush.bf16.xpose.msrb.mxu3 %v3586_v0 }
 0xe35   : > { %v3486_v0 = vpack.c.b16 %v3485_v6, %v3485_v6 }
 0xe3b   : > { %5422 = vmatmul.msk.bf16.vlgmr.msra.gmra.mxu2 %vm1401_vm15, %v3550_v51  ;;  %5423 = vmatmul.msk.bf16.vlgmr.msrb.gmra.mxu3 %vm1401_vm15, %v3576_v23 }
 0xe7e   : > { %v3244_v24 = vpop.f32.mrf.mxu2 }
 0xe7f   : > { %v3277_v28 = vmul.f32 0.35355338, %v3244_v24 }
 0xe81   : > { %v7548_v20 = vadd.f32 %v7531_v32, %v3277_v28 }
 0xe83   : > { %v3281_v27 = vsel %vm2198_vm4, %v7548_v20, -inf }
 0xe84   : > { %3282 = vmax.xlane.f32.xlu2 %v3281_v27 }
 0xe86   : > { %v3246_v50 = vpop.f32.mrf.mxu2 }
 0xe98   : > { %v3115_v29 = vpop.xlane.xlu0 %3114 }
 0xe99   : > { %v3119_v33 = vsub.f32 %v3111_v56, %v3115_v29 }
 0xe9b   : > { %v3121_v34 = vmul.f32 1.442695, %v3119_v33 }
 0xe9d   : > { %5881 = vpow2.f32 %v3121_v34 }
 0xe9e   : > { %v3273_v26 = vpop.f32.mrf.mxu3 }
 0xe9f   : > { %v3278_v30 = vmul.f32 0.35355338, %v3273_v26 }
 0xea0   : > { %v3118_v36 = vpop.xlane.xlu1 %3117 }
 0xea1   : > { %v3120_v37 = vsub.f32 %v3112_v21, %v3118_v36  ;;  %v7553_v38 = vadd.f32 %v7537_v7, %v3278_v30  ;;  %v3347_v21 = vunpack.c.l.b16 %v3321_v19 }
 0xea3   : > { %v5882_v39 = vpop.eup %5881  ;;  %v3123_v40 = vmul.f32 1.442695, %v3120_v37  ;;  %v3284_v18 = vsel %vm2198_vm4, %v7553_v38, -inf  ;;  %v3348_v11 = vpack.c.b16 %v3347_v21, %v3347_v21 }
 0xea4   : > { %3285 = vmax.xlane.f32.xlu0 %v3284_v18  ;;  %v3125_v41 = vsel %vm2198_vm4, %v5882_v39, 0.0 }
 0xea5   : > { %5883 = vpow2.f32 %v3123_v40  ;;  %3126 = vadd.xlane.f32.xlu2 %v3125_v41 }
 0xea6   : > { %v3275_v42 = vpop.f32.mrf.mxu3 }
 0xeab   : > { %v7558_v4 = vpop.eup %5883 }
 0xeac   : > { %v3128_v25 = vsel %vm2198_vm4, %v7558_v4, 0.0 }
 0xead   : > { %3129 = vadd.xlane.f32.xlu0 %v3128_v25 }
 0xeae   : > { %v3409_v43 = vpop.f32.mrf.mxu2  ;;  %v3435_v44 = vpop.f32.mrf.mxu3 }
 0xeaf   : > { %v3439_v45 = vmul.f32 0.35355338, %v3409_v43  ;;  %v3440_v57 = vmul.f32 0.35355338, %v3435_v44 }
 0xeb1   : > { %v3442_v49 = vadd.f32 %v7537_v7, %v3440_v57  ;;  %v3441_v46 = vadd.f32 %v7531_v32, %v3439_v45 }
 0xeb3   : > { %v3446_v55 = vsel %vm2198_vm4, %v3442_v49, -inf  ;;  %v3443_v53 = vsel %vm2198_vm4, %v3441_v46, -inf }
 0xeb4   : > { %3447 = vmax.xlane.f32.xlu2 %v3446_v55  ;;  %3444 = vmax.xlane.f32.xlu1 %v3443_v53 }
 0xeb6   : > { %v3411_v31 = vpop.f32.mrf.mxu2  ;;  %v3437_v48 = vpop.f32.mrf.mxu3 }
 0xebe   : > { %v3571_v54 = vpop.f32.mrf.mxu2  ;;  %v3597_v51 = vpop.f32.mrf.mxu3 }
 0xebf   : > { %v3602_v56 = vmul.f32 0.35355338, %v3597_v51 }
 0xec1   : > { %3325 = vrot.lane.b32.xlu0 %v3324_v58, %s6405_s19  ;;  %v7570_v17 = vadd.f32 %v7537_v7, %v3602_v56  ;;  %v3601_v7 = vmul.f32 0.35355338, %v3571_v54  ;;  %v3509_v54 = vunpack.c.l.b16 %v3483_v8 }
 0xec3   : > { %v3608_v9 = vsel %vm2198_vm4, %v7570_v17, -inf  ;;  %v7581_v59 = vadd.f32 %v7531_v32, %v3601_v7  ;;  %v3510_v58 = vpack.c.b16 %v3509_v54, %v3509_v54 }
 0xec4   : > { %3609 = vmax.xlane.f32.xlu1 %v3608_v9  ;;  %v3647_v9 = vunpack.c.l.b16 %v3644_v60 }
 0xec5   : > { %v3605_v22 = vsel %vm2198_vm4, %v7581_v59, -inf }
 0xec6   : > { %v3573_v10 = vpop.f32.mrf.mxu2  ;;  %v3599_v14 = vpop.f32.mrf.mxu3 }
 0xec7   : > { %v3645_v14 = vpack.c.bf16 %v7447_v5, %v7447_v5 }
 0xec9   : > { %v3671_v35 = vunpack.c.l.b16 %v3645_v14 }
 0xecc   : > { %3181 = vrot.lane.b32.xlu2 %v3180_v16, %s6406_s20  ;;  %v3672_v16 = vpack.c.b16 %v3671_v35, %v3671_v35 }
 0xedd   : > { %3349 = vrot.lane.b32.xlu1 %v3348_v11, %s6405_s19 }
 0xeeb   : > { %3606 = vmax.xlane.f32.xlu0 %v3605_v22 }
 0xef7   : > { %v3283_v62 = vpop.xlane.xlu2 %3282 }
 0xef8   : > { %v3287_v23 = vsub.f32 %v7548_v20, %v3283_v62 }
 0xefa   : > { %v3289_v27 = vmul.f32 1.442695, %v3287_v23 }
 0xeff   : > { %3487 = vrot.lane.b32.xlu0 %v3486_v0, %s6407_s3 }
 0xf17   : > { %v3286_v24 = vpop.xlane.xlu0 %3285 }
 0xf18   : > { %v3127_v28 = vpop.xlane.xlu2 %3126  ;;  %v3288_v50 = vsub.f32 %v7553_v38, %v3286_v24 }
 0xf19   : > { %5885 = vrcp.f32 %v3127_v28 }
 0xf1a   : > { %5887 = vpow2.f32 %v3289_v27  ;;  %v3291_v26 = vmul.f32 1.442695, %v3288_v50 }
 0xf1f   : > { %v5886_v32 = vpop.eup %5885 }
 0xf20   : > { %v3133_v29 = vmul.f32 %v5886_v32, %v5882_v39  ;;  %v3130_v34 = vpop.xlane.xlu0 %3129  ;;  %v7591_v63 = vpop.eup %5887 }
 0xf21   : > { %5889 = vrcp.f32 %v3130_v34  ;;  %v3293_v40 = vsel %vm2198_vm4, %v7591_v63, 0.0 }
 0xf22   : > { %v3135_v33 = vpack.c.bf16 %v3133_v29, %v3133_v29  ;;  %5891 = vpow2.f32 %v3291_v26 }
 0xf24   : > { %5412 = vmatmul.msk.bf16.vlgmr.msra.gmra.mxu0 %vm2198_vm4, %v3135_v33 }
 0xf27   : > { %v3448_v30 = vpop.xlane.xlu2 %3447  ;;  %v3445_v20 = vpop.xlane.xlu1 %3444 }
 0xf28   : > { %v3450_v36 = vsub.f32 %v3442_v49, %v3448_v30  ;;  %v3449_v37 = vsub.f32 %v3441_v46, %v3445_v20  ;;  %v5890_v39 = vpop.eup %5889 }
 0xf29   : > { %3294 = vadd.xlane.f32.xlu0 %v3293_v40  ;;  %v7595_v41 = vpop.eup %5891  ;;  %v3134_v42 = vmul.f32 %v5890_v39, %v7558_v4 }
 0xf2a   : > { %v3453_v18 = vmul.f32 1.442695, %v3450_v36  ;;  %v3451_v38 = vmul.f32 1.442695, %v3449_v37  ;;  %v3296_v44 = vsel %vm2198_vm4, %v7595_v41, 0.0 }
 0xf2b   : > { %v3136_v57 = vpack.c.bf16 %v3134_v42, %v3134_v42 }
 0xf2c   : > { %5893 = vpow2.f32 %v3453_v18 }
 0xf2d   : > { %5895 = vpow2.f32 %v3451_v38 }
 0xf2f   : > { %v3182_v25 = vpop.permute.xlu2 %3181 }
 0xf30   : > { %v3187_v43 = vsel %vm2248_vm5, %v3182_v25, 0 }
 0xf31   : > { %3196 = vmatpush.bf16.msra.mxu1 %v3187_v43  ;;  %3297 = vadd.xlane.f32.xlu0 %v3296_v44 }
 0xf32   : > { %v7601_v45 = vpop.eup %5893 }
 0xf33   : > { %v5896_v49 = vpop.eup %5895  ;;  %v3326_v46 = vpop.permute.xlu0 %3325  ;;  %v3458_v55 = vsel %vm2198_vm4, %v7601_v45, 0.0 }
 0xf34   : > { %v3331_v53 = vsel %vm2248_vm5, %v3326_v46, 0  ;;  %5413 = vmatmul.msk.bf16.vlgmr.msra.gmra.mxu1 %vm2198_vm4, %v3136_v57  ;;  %3459 = vadd.xlane.f32.xlu1 %v3458_v55  ;;  %v3455_v4 = vsel %vm2198_vm4, %v5896_v49, 0.0 }
 0xf35   : > { %3456 = vadd.xlane.f32.xlu2 %v3455_v4  ;;  %3340 = vmatpush.bf16.msrb.mxu0 %v3331_v53 }
 0xf37   : > { %v3610_v31 = vpop.xlane.xlu1 %3609 }
 0xf38   : > { %v3612_v48 = vsub.f32 %v7570_v17, %v3610_v31  ;;  %v3648_v17 = vpack.c.b16 %v3647_v9, %v3647_v9  ;;  %v3902_v31 = vld.sshfl [vmem:[#allocation1] sm:$0xff pattern:$0x73625140] }
 0xf3a   : > { %v3615_v47 = vmul.f32 1.442695, %v3612_v48  ;;  %v3903_v48 = vld.sshfl [vmem:[#allocation1 + $0x20] sm:$0xff pattern:$0x73625140] }
 0xf3c   : > { %5897 = vpow2.f32 %v3615_v47  ;;  %v3906_v47 = vpack.c.bf16 %v3903_v48, %v3902_v31 }
 0xf42   : > { %v7611_v51 = vpop.eup %5897 }
 0xf43   : > { %v3620_v56 = vsel %vm2198_vm4, %v7611_v51, 0.0 }
 0xf44   : > { %3621 = vadd.xlane.f32.xlu2 %v3620_v56 }
 0xf45   : > { %3511 = vrot.lane.b32.xlu0 %v3510_v58, %s6407_s3 }
 0xf4d   : > { %3649 = vrot.lane.b32.xlu1 %v3648_v17, %s6409_s10 }
 0xf4f   : > { %v3350_v10 = vpop.permute.xlu1 %3349 }
 0xf50   : > { %v3355_v1 = vsel %vm2248_vm5, %v3350_v10, 0 }
 0xf51   : > { %3364 = vmatpush.bf16.msrb.mxu1 %v3355_v1 }
 0xf5c   : > { %3673 = vrot.lane.b32.xlu2 %v3672_v16, %s6409_s10 }
 0xf5e   : > { %v3607_v19 = vpop.xlane.xlu0 %3606 }
 0xf5f   : > { %v3611_v13 = vsub.f32 %v7581_v59, %v3607_v19 }
 0xf61   : > { %v3613_v21 = vmul.f32 1.442695, %v3611_v13  ;;  %v5543_v13 = vld [vmem:[%s8154_s23 + $0x18] sm:$0xff] }
 0xf62   : > { %3749 = vmatpush.bf16.msrb.mxu2 %v5543_v13 }
 0xf63   : > { %5899 = vpow2.f32 %v3613_v21  ;;  %v5542_v21 = vld [vmem:[%s8154_s23 + $0x10] sm:$0xff] }
 0xf66   : > { %3750 = vmatpush.bf16.msrb.mxu2 %v5542_v21 }
 0xf69   : > { %v5900_v11 = vpop.eup %5899 }
 0xf6a   : > { %v3617_v7 = vsel %vm2198_vm4, %v5900_v11, 0.0 }
 0xf6f   : > { %3618 = vadd.xlane.f32.xlu0 %v3617_v7  ;;  %v5783_v7 = vld [vmem:[%s6881_s2 + $0x2] ss:$0 sm:$0xff] }
 0xf71   : > { %v3488_v22 = vpop.permute.xlu0 %3487 }
 0xf72   : > { %v3493_v15 = vsel %vm2248_vm5, %v3488_v22, 0 }
 0xf73   : > { %3502 = vmatpush.bf16.msra.mxu0 %v3493_v15 }
 0xf9c   : > { %v3295_v6 = vpop.xlane.xlu0 %3294 }
 0xf9d   : > { %5901 = vrcp.f32 %v3295_v6 }
 0xfa1   : > { %v7626_v5 = vpop.f32.mrf.mxu0 }
 0xfa3   : > { %v5902_v0 = vpop.eup %5901 }
 0xfa4   : > { %v3301_v62 = vmul.f32 %v5902_v0, %v7591_v63  ;;  %v3298_v23 = vpop.xlane.xlu0 %3297 }
 0xfa5   : > { %5903 = vrcp.f32 %v3298_v23 }
 0xfa6   : > { %v3303_v59 = vpack.c.bf16 %v3301_v62, %v3301_v62 }
 0xfa7   : > { %v3460_v29 = vpop.xlane.xlu1 %3459 }
 0xfa8   : > { %v3457_v24 = vpop.xlane.xlu2 %3456  ;;  %5416 = vmatmul.msk.bf16.vlgmr.msrb.gmra.mxu0 %vm2198_vm4, %v3303_v59 }
 0xfa9   : > { %5905 = vrcp.f32 %v3457_v24  ;;  %v3176_v28 = vpop.f32.mrf.mxu0 }
 0xfaa   : > { %5907 = vrcp.f32 %v3460_v29 }
 0xfab   : > { %v5904_v27 = vpop.eup %5903 }
 0xfac   : > { %v3302_v32 = vmul.f32 %v5904_v27, %v7595_v41 }
 0xfae   : > { %v3304_v50 = vpack.c.bf16 %v3302_v32, %v3302_v32 }
 0xfaf   : > { %v5906_v33 = vpop.eup %5905 }
 0xfb0   : > { %5417 = vmatmul.msk.bf16.vlgmr.msrb.gmra.mxu1 %vm2198_vm4, %v3304_v50  ;;  %v3463_v26 = vmul.f32 %v5906_v33, %v5896_v49  ;;  %v5908_v30 = vpop.eup %5907  ;;  %v5547_v49 = vld [vmem:[%s6827_s18 + $0x28] sm:$0xff] }
 0xfb1   : > { %v7632_v34 = vpop.f32.mrf.mxu1  ;;  %v3464_v18 = vmul.f32 %v5908_v30, %v7601_v45  ;;  %v5546_v45 = vld [vmem:[%s6827_s18 + $0x20] sm:$0xff] }
 0xfb2   : > { %v3465_v63 = vpack.c.bf16 %v3463_v26, %v3463_v26 }
 0xfb3   : > { %v3466_v38 = vpack.c.bf16 %v3464_v18, %v3464_v18 }
 0xfb7   : > { %v3622_v20 = vpop.xlane.xlu2 %3621  ;;  %v3512_v36 = vpop.permute.xlu0 %3511 }
 0xfb8   : > { %v3517_v37 = vsel %vm2248_vm5, %v3512_v36, 0  ;;  %5420 = vmatmul.msk.bf16.vlgmr.msra.gmra.mxu0 %vm2198_vm4, %v3465_v63  ;;  %5909 = vrcp.f32 %v3622_v20 }
 0xfb9   : > { %v3200_v40 = vpop.f32.mrf.mxu1  ;;  %3526 = vmatpush.bf16.msra.mxu1 %v3517_v37 }
 0xfbe   : > { %v5910_v43 = vpop.eup %5909 }
 0xfbf   : > { %v3674_v39 = vpop.permute.xlu2 %3673  ;;  %v3650_v41 = vpop.permute.xlu1 %3649  ;;  %v3626_v44 = vmul.f32 %v5910_v43, %v7611_v51 }
 0xfc0   : > { %v3679_v42 = vsel %vm2248_vm5, %v3674_v39, 0  ;;  %v3655_v25 = vsel %vm2248_vm5, %v3650_v41, 0  ;;  %5421 = vmatmul.msk.bf16.vlgmr.msra.gmra.mxu1 %vm2198_vm4, %v3466_v38 }
 0xfc1   : > { %3664 = vmatpush.bf16.msrb.mxu0 %v3655_v25  ;;  %3688 = vmatpush.bf16.msrb.mxu1 %v3679_v42  ;;  %v3628_v57 = vpack.c.bf16 %v3626_v44, %v3626_v44 }
 0xfc5   : > { %3938 = vmatpush.bf16.msra.mxu0 %v5547_v49 }
 0xfc9   : > { %3939 = vmatpush.bf16.msra.mxu0 %v5546_v45 }
 0xfd0   : > { %5425 = vmatmul.msk.bf16.vlgmr.msrb.gmra.mxu1 %vm2198_vm4, %v3628_v57 }
 0xfe2   : > { %v3619_v46 = vpop.xlane.xlu0 %3618 }
 0xfe3   : > { %5911 = vrcp.f32 %v3619_v46 }
 0xfe9   : > { %v5912_v55 = vpop.eup %5911 }
 0xfea   : > { %v3625_v53 = vmul.f32 %v5912_v55, %v5900_v11 }
 0xfec   : > { %v3627_v4 = vpack.c.bf16 %v3625_v53, %v3625_v53 }
 0xfee   : > { %5424 = vmatmul.msk.bf16.vlgmr.msrb.gmra.mxu0 %vm2198_vm4, %v3627_v4 }
 0xffe   : > { %5462 = vmatmul.msk.bf16.vlgmr.msra.gmra.mxu0 %vm1261_vm1, %v3906_v47 }
0x1025   : > { %v3342_v8 = vpop.f32.mrf.mxu0 }
0x102d   : > { %v3344_v54 = vpop.f32.mrf.mxu0  ;;  %v3366_v51 = vpop.f32.mrf.mxu1 }
0x102e   : > { %v5740_v56 = vpack.i.bf16 %v3366_v51, %v3342_v8 }
0x1030   : > { %5741 = vrot.lane.b32.xlu0 %v5740_v56, %s6416_s17 }
0x1035   : > { %v3368_v58 = vpop.f32.mrf.mxu1  ;;  %v3504_v60 = vpop.f32.mrf.mxu0 }
0x103d   : > { %v3506_v9 = vpop.f32.mrf.mxu0  ;;  %v3528_v17 = vpop.f32.mrf.mxu1 }
0x103e   : > { %v5745_v10 = vpack.i.bf16 %v3528_v17, %v3504_v60 }
0x1040   : > { %5746 = vrot.lane.b32.xlu2 %v5745_v10, %s6417_s7 }
0x1045   : > { %v3530_v1 = vpop.f32.mrf.mxu1 }
0x104d   : > { %v3690_v14 = vpop.f32.mrf.mxu1 }
0x1055   : > { %v3692_v35 = vpop.f32.mrf.mxu1 }
0x106b   : > { %v3666_v16 = vpop.f32.mrf.mxu0 }
0x106c   : > { %v5750_v19 = vpack.i.bf16 %v3690_v14, %v3666_v16 }
0x106e   : > { %5751 = vrot.lane.b32.xlu1 %v5750_v19, %s6418_s4 }
0x1073   : > { %v3668_v11 = vpop.f32.mrf.mxu0 }
0x107b   : > { %v3941_v22 = vpop.f32.mrf.mxu0 }
0x107c   : > { %v7652_v15 = vadd.f32 %v5783_v7, %v3941_v22 }
0x107e   : > { %v7655_v6 = vrot.slane %v7652_v15, 2  ;;  %v7658_v0 = vrot.slane %v7652_v15, 4  ;;  %v7661_v62 = vrot.slane %v7652_v15, 6  ;;  %3961 = vst [vmem:[#allocation1] ss:$4 sm:$0xff] %v7652_v15 }
0x1080   : > { %3963 = vst [vmem:[#allocation1 + $0x1] ss:$4 sm:$0xff] %v7655_v6 }
0x1081   : > { %3965 = vst [vmem:[#allocation1 + $0x2] ss:$4 sm:$0xff] %v7658_v0 }
0x1082   : > { %3968 = vst [vmem:[#allocation1 + $0x20] ss:$4 sm:$0xff] %v7661_v62 }
0x1083   : > { %v3943_v23 = vpop.f32.mrf.mxu0 }
0x1084   : > { %v7667_v59 = vadd.f32 %v5783_v7, %v3943_v23 }
0x1086   : > { %v7670_v24 = vrot.slane %v7667_v59, 2  ;;  %3970 = vst [vmem:[#allocation1 + $0x21] ss:$4 sm:$0xff] %v7667_v59 }
0x1088   : > { %3972 = vst [vmem:[#allocation1 + $0x22] ss:$4 sm:$0xff] %v7670_v24  ;;  %v3966_v28 = vld.sshfl [vmem:[#allocation1] sm:$0xff pattern:$0x73625140] }
0x1089   : > { %v3976_v27 = vpack.c.bf16 %v3966_v28, %v3966_v28  ;;  %4050 = vst [vmem:[#allocation1] ss:$4 sm:$0xff] %v7652_v15 }
0x108a   : > { %4052 = vst [vmem:[#allocation1 + $0x1] ss:$4 sm:$0xff] %v7655_v6 }
0x108b   : > { %v3982_v32 = vsel %vm1401_vm15, %v3976_v27, 0  ;;  %4054 = vst [vmem:[#allocation1 + $0x2] ss:$4 sm:$0xff] %v7658_v0 }
0x108c   : > { %3991 = vmatpush.bf16.xpose.msra.mxu1 %v3982_v32 }
0x108f   : > { %v3973_v50 = vld.sshfl [vmem:[#allocation1 + $0x20] sm:$0xff pattern:$0x73625140] }
0x1090   : > { %v3977_v29 = vpack.c.bf16 %v3973_v50, %v3973_v50  ;;  %4057 = vst [vmem:[#allocation1 + $0x20] ss:$4 sm:$0xff] %v7661_v62 }
0x1091   : > { %4059 = vst [vmem:[#allocation1 + $0x21] ss:$4 sm:$0xff] %v7667_v59 }
0x1092   : > { %v4001_v33 = vsel %vm1401_vm15, %v3977_v29, 0  ;;  %4061 = vst [vmem:[#allocation1 + $0x22] ss:$4 sm:$0xff] %v7670_v24  ;;  %v7682_v26 = vld.sshfl [vmem:[#allocation1] sm:$0xff pattern:$0x73625140] }
0x1093   : > { %4010 = vmatpush.bf16.xpose.msra.mxu2 %v4001_v33  ;;  %4115 = vst [vmem:[#allocation1] ss:$4 sm:$0xff] %v7652_v15  ;;  %v5545_v33 = vld [vmem:[%s6867_s22 + $0x28] sm:$0xff] }
0x1094   : > { %4117 = vst [vmem:[#allocation1 + $0x1] ss:$4 sm:$0xff] %v7655_v6  ;;  %3877 = vmatpush.bf16.msra.mxu3 %v5545_v33 }
0x1095   : > { %4119 = vst [vmem:[#allocation1 + $0x2] ss:$4 sm:$0xff] %v7658_v0 }
0x1099   : > { %v7687_v63 = vld.sshfl [vmem:[#allocation1 + $0x20] sm:$0xff pattern:$0x73625140] }
0x109a   : > { %4122 = vst [vmem:[#allocation1 + $0x20] ss:$4 sm:$0xff] %v7661_v62  ;;  %v5747_v57 = vpop.permute.xlu2 %5746 }
0x109b   : > { %4124 = vst [vmem:[#allocation1 + $0x21] ss:$4 sm:$0xff] %v7667_v59  ;;  %v5749_v46 = vunpack.i.h.bf16 %v5747_v57  ;;  %v5748_v55 = vunpack.i.l.bf16 %v5747_v57 }
0x109c   : > { %v7691_v30 = vld.sshfl [vmem:[#allocation1] sm:$0xff pattern:$0x73625140]  ;;  %4126 = vst [vmem:[#allocation1 + $0x22] ss:$4 sm:$0xff] %v7670_v24 }
0x109d   : > { %4218 = vst [vmem:[#allocation1] ss:$4 sm:$0xff] %v7652_v15  ;;  %v4130_v14 = vpack.c.bf16 %v7691_v30, %v7691_v30  ;;  %v5544_v30 = vld [vmem:[%s6867_s22 + $0x20] sm:$0xff]  ;;  %s8156_s22 = sld [smem:[#allocation34_spill]] }
0x109e   : > { %4220 = vst [vmem:[#allocation1 + $0x1] ss:$4 sm:$0xff] %v7655_v6  ;;  %3878 = vmatpush.bf16.msra.mxu3 %v5544_v30 }
0x109f   : > { %4222 = vst [vmem:[#allocation1 + $0x2] ss:$4 sm:$0xff] %v7658_v0  ;;  %v4138_v35 = vunpack.c.l.b16 %v4130_v14 }
0x10a1   : > { %v4139_v16 = vpack.c.b16 %v4138_v35, %v4138_v35 }
0x10a2   : > { %v5742_v25 = vpop.permute.xlu0 %5741 }
0x10a3   : > { %v7697_v20 = vld.sshfl [vmem:[#allocation1 + $0x20] sm:$0xff pattern:$0x73625140]  ;;  %v5744_v43 = vunpack.i.h.bf16 %v5742_v25  ;;  %v5743_v44 = vunpack.i.l.bf16 %v5742_v25 }
0x10a4   : > { %4225 = vst [vmem:[#allocation1 + $0x20] ss:$4 sm:$0xff] %v7661_v62 }
0x10a5   : > { %4227 = vst [vmem:[#allocation1 + $0x21] ss:$4 sm:$0xff] %v7667_v59  ;;  %v3719_v49 = vsel %vm1401_vm15, %v7632_v34, %v5744_v43  ;;  %v3718_v45 = vsel %vm1401_vm15, %v7626_v5, %v5743_v44  ;;  %v5784_v34 = vld [vmem:[%s6893_s6 + $0x1] ss:$0 sm:$0xff] }
0x10a6   : > { %4229 = vst [vmem:[#allocation1 + $0x22] ss:$4 sm:$0xff] %v7670_v24  ;;  %v7702_v36 = vld.sshfl [vmem:[#allocation1] sm:$0xff pattern:$0x73625140]  ;;  %v3720_v48 = vsel %vm1896_vm2, %v3718_v45, %v5748_v55  ;;  %v3721_v47 = vsel %vm1896_vm2, %v3719_v49, %v5749_v46 }
0x10a7   : > { %4283 = vst [vmem:[#allocation1] ss:$4 sm:$0xff] %v7652_v15 }
0x10a8   : > { %4285 = vst [vmem:[#allocation1 + $0x1] ss:$4 sm:$0xff] %v7655_v6 }
0x10a9   : > { %4287 = vst [vmem:[#allocation1 + $0x2] ss:$4 sm:$0xff] %v7658_v0 }
0x10ad   : > { %v7707_v37 = vld.sshfl [vmem:[#allocation1 + $0x20] sm:$0xff pattern:$0x73625140] }
0x10ae   : > { %4290 = vst [vmem:[#allocation1 + $0x20] ss:$4 sm:$0xff] %v7661_v62 }
0x10af   : > { %4292 = vst [vmem:[#allocation1 + $0x21] ss:$4 sm:$0xff] %v7667_v59 }
0x10b0   : > { %v7711_v40 = vld.sshfl [vmem:[#allocation1] sm:$0xff pattern:$0x73625140]  ;;  %4294 = vst [vmem:[#allocation1 + $0x22] ss:$4 sm:$0xff] %v7670_v24 }
0x10b1   : > { %4380 = vst [vmem:[#allocation1] ss:$4 sm:$0xff] %v7652_v15  ;;  %v4298_v28 = vpack.c.bf16 %v7711_v40, %v7711_v40 }
0x10b2   : > { %4382 = vst [vmem:[#allocation1 + $0x1] ss:$4 sm:$0xff] %v7655_v6 }
0x10b3   : > { %4384 = vst [vmem:[#allocation1 + $0x2] ss:$4 sm:$0xff] %v7658_v0  ;;  %v4303_v27 = vunpack.c.l.b16 %v4298_v28 }
0x10b5   : > { %v4304_v32 = vpack.c.b16 %v4303_v27, %v4303_v27 }
0x10b7   : > { %v7717_v18 = vld.sshfl [vmem:[#allocation1 + $0x20] sm:$0xff pattern:$0x73625140] }
0x10b8   : > { %4387 = vst [vmem:[#allocation1 + $0x20] ss:$4 sm:$0xff] %v7661_v62 }
0x10b9   : > { %4389 = vst [vmem:[#allocation1 + $0x21] ss:$4 sm:$0xff] %v7667_v59 }
0x10ba   : > { %4391 = vst [vmem:[#allocation1 + $0x22] ss:$4 sm:$0xff] %v7670_v24  ;;  %v7722_v38 = vld.sshfl [vmem:[#allocation1] sm:$0xff pattern:$0x73625140] }
0x10bb   : > { %4445 = vst [vmem:[#allocation1] ss:$4 sm:$0xff] %v7652_v15 }
0x10bc   : > { %4447 = vst [vmem:[#allocation1 + $0x1] ss:$4 sm:$0xff] %v7655_v6 }
0x10bd   : > { %4449 = vst [vmem:[#allocation1 + $0x2] ss:$4 sm:$0xff] %v7658_v0 }
0x10c1   : > { %v7727_v39 = vld.sshfl [vmem:[#allocation1 + $0x20] sm:$0xff pattern:$0x73625140] }
0x10c2   : > { %4452 = vst [vmem:[#allocation1 + $0x20] ss:$4 sm:$0xff] %v7661_v62 }
0x10c3   : > { %4454 = vst [vmem:[#allocation1 + $0x21] ss:$4 sm:$0xff] %v7667_v59 }
0x10c4   : > { %4456 = vst [vmem:[#allocation1 + $0x22] ss:$4 sm:$0xff] %v7670_v24  ;;  %v7732_v41 = vld.sshfl [vmem:[#allocation1] sm:$0xff pattern:$0x73625140] }
0x10c5   : > { %4542 = vst [vmem:[#allocation1] ss:$4 sm:$0xff] %v7652_v15 }
0x10c6   : > { %4544 = vst [vmem:[#allocation1 + $0x1] ss:$4 sm:$0xff] %v7655_v6 }
0x10c7   : > { %4546 = vst [vmem:[#allocation1 + $0x2] ss:$4 sm:$0xff] %v7658_v0  ;;  %v4131_v0 = vpack.c.bf16 %v7697_v20, %v7697_v20 }
0x10cb   : > { %v7737_v42 = vld.sshfl [vmem:[#allocation1 + $0x20] sm:$0xff pattern:$0x73625140] }
0x10cc   : > { %4549 = vst [vmem:[#allocation1 + $0x20] ss:$4 sm:$0xff] %v7661_v62 }
0x10cd   : > { %4551 = vst [vmem:[#allocation1 + $0x21] ss:$4 sm:$0xff] %v7667_v59  ;;  %v4167_v59 = vunpack.c.l.b16 %v4131_v0 }
0x10ce   : > { %4553 = vst [vmem:[#allocation1 + $0x22] ss:$4 sm:$0xff] %v7670_v24 }
0x10cf   : > { %v4168_v24 = vpack.c.b16 %v4167_v59, %v4167_v59 }
0x10e0   : > { %v5752_v53 = vpop.permute.xlu1 %5751 }
0x10e1   : > { %v5754_v4 = vunpack.i.h.bf16 %v5752_v53  ;;  %v5753_v31 = vunpack.i.l.bf16 %v5752_v53 }
0x10e3   : > { %v3722_v8 = vsel %vm1899_vm3, %v3720_v48, %v5753_v31  ;;  %v3723_v54 = vsel %vm1899_vm3, %v3721_v47, %v5754_v4 }
0x10e4   : > { %v3724_v51 = vpack.c.bf16 %v3723_v54, %v3722_v8 }
0x10e6   : > { %5434 = vmatmul.msk.bf16.vlgmr.msrb.gmra.mxu2 %vm1261_vm1, %v3724_v51 }
0x1169   : > { %v3752_v56 = vpop.f32.mrf.mxu2 }
0x116a   : > { %v3753_v58 = vadd.f32 %v5784_v34, %v3752_v56 }
0x116c   : > { %v7753_v5 = vadd.f32 %v3753_v58, %v7460_v61 }
0x116e   : > { %v3763_v60 = vsel %vm1261_vm1, %v7753_v5, 0.0 }
0x116f   : > { %3764 = vadd.xlane.f32.xlu2 %v3763_v60 }
0x1171   : > { %v3754_v9 = vpop.f32.mrf.mxu2 }
0x1172   : > { %v3755_v17 = vadd.f32 %v5784_v34, %v3754_v9 }
0x1174   : > { %v7758_v10 = vadd.f32 %v3755_v17, %v7465_v2 }
0x1176   : > { %v3766_v1 = vsel %vm1261_vm1, %v7758_v10, 0.0 }
0x1177   : > { %3767 = vadd.xlane.f32.xlu1 %v3766_v1 }
0x1190   : > { %4140 = vrot.lane.b32.xlu1 %v4139_v16, %s6410_s12 }
0x11e2   : > { %v3765_v61 = vpop.xlane.xlu2 %3764 }
0x11e3   : > { %v3769_v19 = vmul.f32 %v3765_v61, %v6905_v12 }
0x11e5   : > { %v7767_v13 = vsub.f32 %v7753_v5, %v3769_v19 }
0x11e7   : > { %v3773_v2 = vmul.f32 %v7767_v13, %v7767_v13 }
0x11e9   : > { %v3775_v21 = vsel %vm1261_vm1, %v3773_v2, 0.0 }
0x11ea   : > { %v3768_v11 = vpop.xlane.xlu1 %3767  ;;  %3776 = vadd.xlane.f32.xlu0 %v3775_v21 }
0x11eb   : > { %v3770_v7 = vmul.f32 %v3768_v11, %v6905_v12 }
0x11ed   : > { %v7774_v22 = vsub.f32 %v7758_v10, %v3770_v7 }
0x11ef   : > { %v3774_v15 = vmul.f32 %v7774_v22, %v7774_v22 }
0x11f1   : > { %v3778_v6 = vsel %vm1261_vm1, %v3774_v15, 0.0 }
0x11f2   : > { %3779 = vadd.xlane.f32.xlu2 %v3778_v6  ;;  %v3837_v6 = vperm.slane %v7497_v52, 3 }
0x11f4   : > { %v3839_v52 = vmul.f32 %v3837_v6, %v7774_v22 }
0x1202   : > { %v4141_v62 = vpop.permute.xlu1 %4140 }
0x1203   : > { %v4146_v23 = vsel %vm1401_vm15, %v4141_v62, 0 }
0x1204   : > { %4155 = vmatpush.bf16.xpose.msrb.mxu1 %v4146_v23 }
0x120a   : > { %4169 = vrot.lane.b32.xlu2 %v4168_v24, %s6410_s12 }
0x1212   : > { %4305 = vrot.lane.b32.xlu2 %v4304_v32, %s6408_s14  ;;  %v3838_v32 = vmul.f32 %v3837_v6, %v7767_v13  ;;  %v5785_v13 = vld [vmem:[%s6876_s25 + $0x2] ss:$0 sm:$0xff] }
0x125d   : > { %v3777_v50 = vpop.xlane.xlu0 %3776 }
0x125e   : > { %v3781_v29 = vmul.f32 0.032258064, %v3777_v50 }
0x1260   : > { %5913 = vrsqrt.f32 %v3781_v29  ;;  %vm3790_vm8 = vcmp.eq.f32.partialorder %v3781_v29, inf  ;;  %v3793_v47 = vand.u32 2147483648, %v3781_v29  ;;  %vm3792_vm9 = vcmp.eq.f32.partialorder %v3781_v29, 0.0 }
0x1265   : > { %v3780_v20 = vpop.xlane.xlu2 %3779 }
0x1266   : > { %v5914_v25 = vpop.eup %5913  ;;  %v3782_v43 = vmul.f32 0.032258064, %v3780_v20 }
0x1267   : > { %v3784_v44 = vmul.f32 %v5914_v25, %v3781_v29 }
0x1268   : > { %5915 = vrsqrt.f32 %v3782_v43  ;;  %vm3802_vm10 = vcmp.eq.f32.partialorder %v3782_v43, inf  ;;  %v3805_v9 = vand.u32 2147483648, %v3782_v43  ;;  %vm3804_vm11 = vcmp.eq.f32.partialorder %v3782_v43, 0.0 }
0x1269   : > { %v3785_v57 = vmul.f32 %v5914_v25, %v3784_v44 }
0x126b   : > { %v3786_v40 = vmul.f32 0.5, %v3785_v57 }
0x126d   : > { %v3787_v49 = vsub.f32 1.5, %v3786_v40  ;;  %v4170_v45 = vpop.permute.xlu2 %4169 }
0x126e   : > { %v5916_v46 = vpop.eup %5915  ;;  %v4175_v55 = vsel %vm1401_vm15, %v4170_v45, 0 }
0x126f   : > { %v3788_v53 = vmul.f32 %v5914_v25, %v3787_v49  ;;  %v3796_v4 = vmul.f32 %v5916_v46, %v3782_v43  ;;  %4184 = vmatpush.bf16.xpose.msrb.mxu2 %v4175_v55 }
0x1271   : > { %v3789_v31 = vmul.f32 %v3788_v53, %v3781_v29  ;;  %v3797_v48 = vmul.f32 %v5916_v46, %v3796_v4 }
0x1273   : > { %v3791_v8 = vsel %vm3790_vm8, %v3781_v29, %v3789_v31  ;;  %v3798_v54 = vmul.f32 0.5, %v3797_v48  ;;  %v3842_v29 = vperm.slane %v7503_v3, 3  ;;  %v4299_v31 = vpack.c.bf16 %v7717_v18, %v7717_v18 }
0x1274   : > { %v3794_v51 = vsel %vm3792_vm9, %v3793_v47, %v3791_v8 }
0x1275   : > { %v3807_v34 = vadd.f32 1e-06, %v3794_v51  ;;  %v3799_v56 = vsub.f32 1.5, %v3798_v54  ;;  %v4329_v8 = vunpack.c.l.b16 %v4299_v31 }
0x1277   : > { %5917 = vrcp.f32 %v3807_v34  ;;  %v3800_v58 = vmul.f32 %v5916_v46, %v3799_v56  ;;  %v3820_v11 = vand.u32 2147483648, %v3807_v34  ;;  %vm3814_vm13 = vweird.f32 %v3807_v34  ;;  %v4306_v46 = vpop.permute.xlu2 %4305 }
0x1278   : > { %v3818_v7 = vand.u32 2147483647, %v3807_v34  ;;  %v4311_v3 = vsel %vm1401_vm15, %v4306_v46, 0  ;;  %v4330_v56 = vpack.c.b16 %v4329_v8, %v4329_v8 }
0x1279   : > { %v3801_v60 = vmul.f32 %v3800_v58, %v3782_v43  ;;  %v3821_v23 = vor.u32 1.1754944e-38, %v3820_v11  ;;  %v4460_v58 = vpack.c.bf16 %v7732_v41, %v7732_v41 }
0x127a   : > { %vm3819_vm0 = vcmp.eq.f32.partialorder %v3818_v7, 8.507059e+37 }
0x127b   : > { %v3803_v17 = vsel %vm3802_vm10, %v3782_v43, %v3801_v60  ;;  %v4465_v60 = vunpack.c.l.b16 %v4460_v58 }
0x127c   : > { %v3806_v1 = vsel %vm3804_vm11, %v3805_v9, %v3803_v17 }
0x127d   : > { %v5918_v14 = vpop.eup %5917  ;;  %v3808_v35 = vadd.f32 1e-06, %v3806_v1  ;;  %v4466_v17 = vpack.c.b16 %v4465_v60, %v4465_v60  ;;  %v7814_v1 = vld [vmem:[#allocation11] ss:$0 sm:$0xff] }
0x127e   : > { %v3810_v16 = vmul.f32 %v5918_v14, %v3807_v34  ;;  %vm3815_vm12 = vweird.f32 %v5918_v14  ;;  %v4461_v34 = vpack.c.bf16 %v7737_v42, %v7737_v42 }
0x127f   : > { %5919 = vrcp.f32 %v3808_v35  ;;  %vm3816_vm14 = vmor %vm3814_vm13, %vm3815_vm12  ;;  %v3834_v59 = vand.u32 2147483648, %v3808_v35  ;;  %v3832_v28 = vand.u32 2147483647, %v3808_v35  ;;  %vm3828_vm7 = vweird.f32 %v3808_v35 }
0x1280   : > { %v3811_v61 = vsub.f32 1.0, %v3810_v16  ;;  %v4491_v18 = vunpack.c.l.b16 %v4461_v34  ;;  %v4233_v34 = vpack.c.bf16 %v7702_v36, %v7702_v36 }
0x1281   : > { %v3835_v33 = vor.u32 1.1754944e-38, %v3834_v59  ;;  %vm3833_vm9 = vcmp.eq.f32.partialorder %v3832_v28, 8.507059e+37 }
0x1282   : > { %v3812_v19 = vmul.f32 %v5918_v14, %v3811_v61  ;;  %v4492_v9 = vpack.c.b16 %v4491_v18, %v4491_v18  ;;  %v4236_v18 = vunpack.c.l.b16 %v4233_v34 }
0x1284   : > { %v3813_v2 = vadd.f32 %v5918_v14, %v3812_v19 }
0x1285   : > { %v5920_v21 = vpop.eup %5919 }
0x1286   : > { %v3824_v15 = vmul.f32 %v5920_v21, %v3808_v35  ;;  %v3817_v0 = vsel %vm3816_vm14, %v5918_v14, %v3813_v2  ;;  %vm3829_vm6 = vweird.f32 %v5920_v21 }
0x1287   : > { %v3822_v27 = vsel %vm3819_vm0, %v3821_v23, %v3817_v0  ;;  %vm3830_vm8 = vmor %vm3828_vm7, %vm3829_vm6  ;;  %vm4831_vm7 = vcmask 523264  }
0x1288   : > { %v3825_v62 = vsub.f32 1.0, %v3824_v15  ;;  %v3840_v20 = vmul.f32 %v3838_v32, %v3822_v27 }
0x128a   : > { %v3826_v24 = vmul.f32 %v5920_v21, %v3825_v62  ;;  %v3843_v44 = vadd.f32 %v3842_v29, %v3840_v20  ;;  %v7823_v62 = vld [vmem:[#allocation11 + $0x1] ss:$0 sm:$0xff] }
0x128c   : > { %v3827_v50 = vadd.f32 %v5920_v21, %v3826_v24 }
0x128e   : > { %v3831_v30 = vsel %vm3830_vm8, %v5920_v21, %v3827_v50 }
0x128f   : > { %v3836_v25 = vsel %vm3833_vm9, %v3835_v33, %v3831_v30 }
0x1290   : > { %v3841_v43 = vmul.f32 %v3839_v52, %v3836_v25 }
0x1292   : > { %v3844_v57 = vadd.f32 %v3842_v29, %v3841_v43 }
0x1294   : > { %v3845_v40 = vpack.c.bf16 %v3844_v57, %v3843_v44 }
0x1296   : > { %5448 = vmatmul.msk.bf16.vlgmr.msra.gmra.mxu3 %vm1261_vm1, %v3845_v40 }
0x1319   : > { %v3880_v49 = vpop.f32.mrf.mxu3 }
0x131a   : > { %v3881_v45 = vadd.f32 %v5785_v13, %v3880_v49 }
0x131c   : > { %v3959_v55 = vpack.c.bf16 %v3881_v45, %v3881_v45 }
0x131e   : > { %v4133_v53 = vunpack.c.l.b16 %v3959_v55  ;;  %5468 = vmatmul.msk.bf16.vlgmr.msra.gmra.mxu1 %vm1401_vm15, %v3959_v55  ;;  %v4066_v55 = vpack.c.bf16 %v7687_v63, %v7687_v63 }
0x131f   : > { %4320 = vmatpush.bf16.xpose.msra.mxu1 %v4311_v3 }
0x1320   : > { %v4134_v22 = vpack.c.b16 %v4133_v53, %v4133_v53  ;;  %v4092_v31 = vunpack.c.l.b16 %v4066_v55 }
0x1321   : > { %v3882_v4 = vpop.f32.mrf.mxu3 }
0x1322   : > { %v3883_v48 = vadd.f32 %v5785_v13, %v3882_v4  ;;  %4300 = vrot.lane.b32.xlu1 %v4134_v22, %s6408_s14  ;;  %4135 = vrot.lane.b32.xlu0 %v4134_v22, %s6410_s12 }
0x1324   : > { %v3960_v47 = vpack.c.bf16 %v3883_v48, %v3883_v48 }
0x1326   : > { %v4162_v54 = vunpack.c.l.b16 %v3960_v47  ;;  %5469 = vmatmul.msk.bf16.vlgmr.msra.gmra.mxu2 %vm1401_vm15, %v3960_v47 }
0x1328   : > { %v4163_v51 = vpack.c.b16 %v4162_v54, %v4162_v54  ;;  %v4093_v54 = vpack.c.b16 %v4092_v31, %v4092_v31 }
0x132a   : > { %4326 = vrot.lane.b32.xlu2 %v4163_v51, %s6408_s14  ;;  %4164 = vrot.lane.b32.xlu1 %v4163_v51, %s6410_s12 }
0x132b   : > { %4331 = vrot.lane.b32.xlu0 %v4330_v56, %s6408_s14  ;;  %v4065_v56 = vpack.c.bf16 %v7682_v26, %v7682_v26 }
0x1332   : > { %4462 = vrot.lane.b32.xlu2 %v4134_v22, %s6411_s5  ;;  %4493 = vrot.lane.b32.xlu1 %v4492_v9, %s6411_s5  ;;  %v4068_v9 = vunpack.c.l.b16 %v4065_v56 }
0x1333   : > { %4467 = vrot.lane.b32.xlu0 %v4466_v17, %s6411_s5  ;;  %v4237_v17 = vpack.c.b16 %v4236_v18, %v4236_v18 }
0x133b   : > { %4488 = vrot.lane.b32.xlu0 %v4163_v51, %s6411_s5 }
0x1384   : > { %v4327_v59 = vpop.permute.xlu2 %4326 }
0x138c   : > { %v4463_v50 = vpop.permute.xlu2 %4462 }
0x1394   : > { %v4301_v42 = vpop.permute.xlu1 %4300  ;;  %v4136_v41 = vpop.permute.xlu0 %4135 }
0x1395   : > { %5472 = vmatmul.msk.bf16.vlgmr.msrb.gmra.mxu1 %vm1401_vm15, %v4136_v41 }
0x139b   : > { %v3993_v14 = vpop.f32.mrf.mxu1 }
0x139c   : > { %v4016_v35 = vmul.f32 0.35355338, %v3993_v14  ;;  %v4165_v16 = vpop.permute.xlu1 %4164 }
0x139d   : > { %v4332_v61 = vpop.permute.xlu0 %4331  ;;  %5473 = vmatmul.msk.bf16.vlgmr.msrb.gmra.mxu2 %vm1401_vm15, %v4165_v16 }
0x139e   : > { %v4337_v19 = vsel %vm1401_vm15, %v4332_v61, 0  ;;  %v4024_v2 = vadd.f32 %v7814_v1, %v4016_v35 }
0x139f   : > { %4346 = vmatpush.bf16.xpose.msra.mxu2 %v4337_v19 }
0x13a0   : > { %v4026_v21 = vsel %vm2198_vm4, %v4024_v2, -inf }
0x13a1   : > { %4027 = vmax.xlane.f32.xlu1 %v4026_v21 }
0x13a3   : > { %v3995_v11 = vpop.f32.mrf.mxu1 }
0x13a4   : > { %v4494_v7 = vpop.permute.xlu1 %4493 }
0x13a5   : > { %v4499_v15 = vsel %vm1401_vm15, %v4494_v7, 0  ;;  %v4468_v6 = vpop.permute.xlu0 %4467  ;;  %5476 = vmatmul.msk.bf16.vlgmr.msra.gmra.mxu1 %vm1401_vm15, %v4301_v42  ;;  %v4069_v42 = vpack.c.b16 %v4068_v9, %v4068_v9 }
0x13a6   : > { %v4473_v0 = vsel %vm1401_vm15, %v4468_v6, 0 }
0x13a7   : > { %4508 = vmatpush.bf16.xpose.msrb.mxu2 %v4499_v15  ;;  %4482 = vmatpush.bf16.xpose.msrb.mxu1 %v4473_v0  ;;  %v4234_v0 = vpack.c.bf16 %v7707_v37, %v7707_v37 }
0x13a9   : > { %v4012_v23 = vpop.f32.mrf.mxu2 }
0x13aa   : > { %v4017_v24 = vmul.f32 0.35355338, %v4012_v23 }
0x13ac   : > { %v4025_v28 = vadd.f32 %v7823_v62, %v4017_v24 }
0x13ad   : > { %5477 = vmatmul.msk.bf16.vlgmr.msra.gmra.mxu2 %vm1401_vm15, %v4327_v59  ;;  %v4489_v29 = vpop.permute.xlu0 %4488 }
0x13ae   : > { %v4029_v27 = vsel %vm2198_vm4, %v4025_v28, -inf }
0x13af   : > { %4030 = vmax.xlane.f32.xlu2 %v4029_v27 }
0x13b1   : > { %v4014_v32 = vpop.f32.mrf.mxu2 }
0x13b5   : > { %5480 = vmatmul.msk.bf16.vlgmr.msrb.gmra.mxu1 %vm1401_vm15, %v4463_v50 }
0x13bd   : > { %5481 = vmatmul.msk.bf16.vlgmr.msrb.gmra.mxu2 %vm1401_vm15, %v4489_v29 }
0x1412   : > { %v4157_v33 = vpop.f32.mrf.mxu1 }
0x1413   : > { %v4190_v52 = vmul.f32 0.35355338, %v4157_v33 }
0x1414   : > { %v4028_v30 = vpop.xlane.xlu1 %4027 }
0x1415   : > { %v7831_v20 = vadd.f32 %v7814_v1, %v4190_v52  ;;  %v4032_v25 = vsub.f32 %v4024_v2, %v4028_v30 }
0x1417   : > { %v4034_v43 = vmul.f32 1.442695, %v4032_v25  ;;  %v4194_v44 = vsel %vm2198_vm4, %v7831_v20, -inf }
0x1418   : > { %4195 = vmax.xlane.f32.xlu0 %v4194_v44 }
0x1419   : > { %5921 = vpow2.f32 %v4034_v43 }
0x141a   : > { %v4159_v57 = vpop.f32.mrf.mxu1 }
0x141f   : > { %v7835_v40 = vpop.eup %5921 }
0x1420   : > { %v4186_v13 = vpop.f32.mrf.mxu2  ;;  %v4038_v49 = vsel %vm2198_vm4, %v7835_v40, 0.0 }
0x1421   : > { %v4191_v45 = vmul.f32 0.35355338, %v4186_v13  ;;  %4039 = vadd.xlane.f32.xlu2 %v4038_v49 }
0x1422   : > { %v4322_v46 = vpop.f32.mrf.mxu1  ;;  %v4031_v36 = vpop.xlane.xlu2 %4030 }
0x1423   : > { %v4352_v3 = vmul.f32 0.35355338, %v4322_v46  ;;  %v7842_v53 = vadd.f32 %v7823_v62, %v4191_v45  ;;  %v4033_v19 = vsub.f32 %v4025_v28, %v4031_v36  ;;  %v4395_v28 = vpack.c.bf16 %v7722_v38, %v7722_v38 }
0x1425   : > { %v4354_v22 = vadd.f32 %v7814_v1, %v4352_v3  ;;  %v4197_v4 = vsel %vm2198_vm4, %v7842_v53, -inf  ;;  %v4036_v21 = vmul.f32 1.442695, %v4033_v19  ;;  %v4398_v27 = vunpack.c.l.b16 %v4395_v28 }
0x1426   : > { %4198 = vmax.xlane.f32.xlu1 %v4197_v4 }
0x1427   : > { %v4356_v48 = vsel %vm2198_vm4, %v4354_v22, -inf  ;;  %5923 = vpow2.f32 %v4036_v21  ;;  %v4399_v32 = vpack.c.b16 %v4398_v27, %v4398_v27  ;;  %v4554_v21 = vld.sshfl [vmem:[#allocation1 + $0x20] sm:$0xff pattern:$0x73625140] }
0x1428   : > { %v4188_v47 = vpop.f32.mrf.mxu2 }
0x1429   : > { %4357 = vmax.xlane.f32.xlu2 %v4356_v48 }
0x142a   : > { %v4324_v8 = vpop.f32.mrf.mxu1 }
0x142c   : > { %4094 = vrot.lane.b32.xlu0 %v4093_v54, %s6406_s20 }
0x142d   : > { %v7865_v7 = vpop.eup %5923 }
0x142e   : > { %v4041_v6 = vsel %vm2198_vm4, %v7865_v7, 0.0 }
0x1430   : > { %v4348_v63 = vpop.f32.mrf.mxu2 }
0x1431   : > { %v4353_v35 = vmul.f32 0.35355338, %v4348_v63 }
0x1432   : > { %v4484_v51 = vpop.f32.mrf.mxu1 }
0x1433   : > { %v7856_v16 = vadd.f32 %v7823_v62, %v4353_v35  ;;  %v4514_v15 = vmul.f32 0.35355338, %v4484_v51 }
0x1435   : > { %v4359_v26 = vsel %vm2198_vm4, %v7856_v16, -inf  ;;  %v7872_v23 = vadd.f32 %v7814_v1, %v4514_v15  ;;  %v4558_v15 = vpack.c.bf16 %v4554_v21, %v4554_v21  ;;  %v5548_v21 = vld [vmem:[%s8154_s23 + $0x20] sm:$0xff] }
0x1437   : > { %v4518_v59 = vsel %vm2198_vm4, %v7872_v23, -inf }
0x1438   : > { %v4350_v58 = vpop.f32.mrf.mxu2 }
0x143a   : > { %v4486_v60 = vpop.f32.mrf.mxu1 }
0x143f   : > { %4238 = vrot.lane.b32.xlu1 %v4237_v17, %s6405_s19 }
0x1440   : > { %v4510_v41 = vpop.f32.mrf.mxu2 }
0x1441   : > { %4070 = vrot.lane.b32.xlu2 %v4069_v42, %s6406_s20  ;;  %v4515_v61 = vmul.f32 0.35355338, %v4510_v41  ;;  %v4547_v41 = vld.sshfl [vmem:[#allocation1] sm:$0xff pattern:$0x73625140]  ;;  %s8160_s20 = sld [smem:[#allocation60_spill]] (!%p5519_p3) }
0x1443   : > { %v7861_v2 = vadd.f32 %v7823_v62, %v4515_v61  ;;  %v4260_v62 = vunpack.c.l.b16 %v4234_v0  ;;  %v4584_v0 = vunpack.c.l.b16 %v4558_v15 }
0x1445   : > { %v4521_v11 = vsel %vm2198_vm4, %v7861_v2, -inf  ;;  %v4261_v24 = vpack.c.b16 %v4260_v62, %v4260_v62 }
0x1448   : > { %v4512_v14 = vpop.f32.mrf.mxu2 }
0x1449   : > { %v4557_v14 = vpack.c.bf16 %v4547_v41, %v4547_v41 }
0x144b   : > { %v4560_v61 = vunpack.c.l.b16 %v4557_v14 }
0x1456   : > { %4360 = vmax.xlane.f32.xlu0 %v4359_v26 }
0x145e   : > { %4522 = vmax.xlane.f32.xlu0 %v4521_v11 }
0x1469   : > { %4042 = vadd.xlane.f32.xlu1 %v4041_v6 }
0x1471   : > { %4519 = vmax.xlane.f32.xlu1 %v4518_v59  ;;  %v4585_v59 = vpack.c.b16 %v4584_v0, %v4584_v0 }
0x1472   : > { %4262 = vrot.lane.b32.xlu0 %v4261_v24, %s6405_s19 }
0x148a   : > { %4400 = vrot.lane.b32.xlu1 %v4399_v32, %s6407_s3 }
0x148b   : > { %v4196_v50 = vpop.xlane.xlu0 %4195 }
0x148c   : > { %v4200_v43 = vsub.f32 %v7831_v20, %v4196_v50 }
0x148e   : > { %v4202_v13 = vmul.f32 1.442695, %v4200_v43 }
0x1494   : > { %v4040_v37 = vpop.xlane.xlu2 %4039 }
0x1495   : > { %5925 = vrcp.f32 %v4040_v37 }
0x1499   : > { %v4199_v46 = vpop.xlane.xlu1 %4198 }
0x149a   : > { %v4201_v20 = vsub.f32 %v7842_v53, %v4199_v46  ;;  %v4396_v53 = vpack.c.bf16 %v7727_v39, %v7727_v39 }
0x149b   : > { %v5926_v25 = vpop.eup %5925 }
0x149c   : > { %v4358_v1 = vpop.xlane.xlu2 %4357  ;;  %v4046_v38 = vmul.f32 %v5926_v25, %v7835_v40  ;;  %v4204_v3 = vmul.f32 1.442695, %v4201_v20  ;;  %v4422_v51 = vunpack.c.l.b16 %v4396_v53 }
0x149d   : > { %v4362_v29 = vsub.f32 %v4354_v22, %v4358_v1 }
0x149e   : > { %v4095_v33 = vpop.permute.xlu0 %4094  ;;  %v4048_v45 = vpack.c.bf16 %v4046_v38, %v4046_v38  ;;  %v4423_v58 = vpack.c.b16 %v4422_v51, %v4422_v51 }
0x149f   : > { %v4364_v52 = vmul.f32 1.442695, %v4362_v29  ;;  %v4100_v30 = vsel %vm2248_vm5, %v4095_v33, 0 }
0x14a0   : > { %4109 = vmatpush.bf16.msrb.mxu0 %v4100_v30 }
0x14a1   : > { %5927 = vpow2.f32 %v4364_v52 }
0x14a2   : > { %5929 = vpow2.f32 %v4202_v13 }
0x14a3   : > { %5931 = vpow2.f32 %v4204_v3 }
0x14a4   : > { %v4071_v44 = vpop.permute.xlu2 %4070 }
0x14a5   : > { %v4076_v57 = vsel %vm2248_vm5, %v4071_v44, 0 }
0x14a6   : > { %4085 = vmatpush.bf16.msrb.mxu3 %v4076_v57 }
0x14a7   : > { %v7884_v49 = vpop.eup %5927 }
0x14a8   : > { %v4368_v55 = vsel %vm2198_vm4, %v7884_v49, 0.0  ;;  %v5930_v40 = vpop.eup %5929 }
0x14a9   : > { %4369 = vadd.xlane.f32.xlu2 %v4368_v55  ;;  %5470 = vmatmul.msk.bf16.vlgmr.msrb.gmra.mxu3 %vm2198_vm4, %v4048_v45  ;;  %v4206_v31 = vsel %vm2198_vm4, %v5930_v40, 0.0  ;;  %v7892_v48 = vpop.eup %5931 }
0x14aa   : > { %v4209_v47 = vsel %vm2198_vm4, %v7892_v48, 0.0 }
0x14b1   : > { %v4239_v22 = vpop.permute.xlu1 %4238 }
0x14b2   : > { %v4244_v4 = vsel %vm2248_vm5, %v4239_v22, 0 }
0x14b3   : > { %4253 = vmatpush.bf16.msra.mxu3 %v4244_v4 }
0x14b4   : > { %4207 = vadd.xlane.f32.xlu1 %v4206_v31 }
0x14bc   : > { %4210 = vadd.xlane.f32.xlu1 %v4209_v47 }
0x14c9   : > { %v4361_v8 = vpop.xlane.xlu0 %4360 }
0x14ca   : > { %v4363_v54 = vsub.f32 %v7856_v16, %v4361_v8 }
0x14cc   : > { %v4366_v63 = vmul.f32 1.442695, %v4363_v54 }
0x14ce   : > { %5933 = vpow2.f32 %v4366_v63 }
0x14d1   : > { %v4523_v34 = vpop.xlane.xlu0 %4522 }
0x14d2   : > { %v4525_v56 = vsub.f32 %v7861_v2, %v4523_v34  ;;  %v4561_v2 = vpack.c.b16 %v4560_v61, %v4560_v61 }
0x14d4   : > { %v7900_v18 = vpop.eup %5933  ;;  %v4528_v60 = vmul.f32 1.442695, %v4525_v56 }
0x14d5   : > { %4424 = vrot.lane.b32.xlu1 %v4423_v58, %s6407_s3  ;;  %v4371_v9 = vsel %vm2198_vm4, %v7900_v18, 0.0 }
0x14d6   : > { %5935 = vpow2.f32 %v4528_v60  ;;  %4372 = vadd.xlane.f32.xlu0 %v4371_v9 }
0x14dc   : > { %v7905_v17 = vpop.eup %5935  ;;  %v4043_v39 = vpop.xlane.xlu1 %4042 }
0x14dd   : > { %5937 = vrcp.f32 %v4043_v39  ;;  %v4533_v42 = vsel %vm2198_vm4, %v7905_v17, 0.0 }
0x14de   : > { %4534 = vadd.xlane.f32.xlu2 %v4533_v42 }
0x14e3   : > { %v5938_v35 = vpop.eup %5937 }
0x14e4   : > { %v4047_v16 = vmul.f32 %v5938_v35, %v7865_v7  ;;  %v4263_v36 = vpop.permute.xlu0 %4262  ;;  %v4520_v11 = vpop.xlane.xlu1 %4519 }
0x14e5   : > { %v4268_v26 = vsel %vm2248_vm5, %v4263_v36, 0  ;;  %v4524_v6 = vsub.f32 %v7872_v23, %v4520_v11 }
0x14e6   : > { %v4049_v19 = vpack.c.bf16 %v4047_v16, %v4047_v16  ;;  %4277 = vmatpush.bf16.msra.mxu0 %v4268_v26 }
0x14e7   : > { %v4526_v62 = vmul.f32 1.442695, %v4524_v6 }
0x14e8   : > { %5471 = vmatmul.msk.bf16.vlgmr.msrb.gmra.mxu0 %vm2198_vm4, %v4049_v19 }
0x14e9   : > { %5939 = vpow2.f32 %v4526_v62 }
0x14ea   : > { %4562 = vrot.lane.b32.xlu0 %v4561_v2, %s6409_s10  ;;  %v5549_v2 = vld [vmem:[%s8154_s23 + $0x28] sm:$0xff] }
0x14eb   : > { %4662 = vmatpush.bf16.msra.mxu1 %v5549_v2 }
0x14ef   : > { %v5940_v7 = vpop.eup %5939  ;;  %4663 = vmatpush.bf16.msra.mxu1 %v5548_v21 }
0x14f0   : > { %v4530_v27 = vsel %vm2198_vm4, %v5940_v7, 0.0 }
0x14f6   : > { %4586 = vrot.lane.b32.xlu2 %v4585_v59, %s6409_s10 }
0x14fc   : > { %v4401_v24 = vpop.permute.xlu1 %4400 }
0x14fd   : > { %v4406_v28 = vsel %vm2248_vm5, %v4401_v24, 0 }
0x14fe   : > { %4415 = vmatpush.bf16.msrb.mxu3 %v4406_v28 }
0x14ff   : > { %4531 = vadd.xlane.f32.xlu1 %v4530_v27 }
0x151c   : > { %v4370_v29 = vpop.xlane.xlu2 %4369 }
0x1527   : > { %v4208_v32 = vpop.xlane.xlu1 %4207 }
0x1528   : > { %5941 = vrcp.f32 %v4208_v32 }
0x152c   : > { %v7917_v37 = vpop.f32.mrf.mxu3 }
0x152e   : > { %v5942_v50 = vpop.eup %5941 }
0x152f   : > { %v4214_v23 = vmul.f32 %v5942_v50, %v5930_v40  ;;  %v4211_v1 = vpop.xlane.xlu1 %4210 }
0x1530   : > { %5943 = vrcp.f32 %v4211_v1 }
0x1531   : > { %v4216_v33 = vpack.c.bf16 %v4214_v23, %v4214_v23  ;;  %5945 = vrcp.f32 %v4370_v29 }
0x1533   : > { %5474 = vmatmul.msk.bf16.vlgmr.msra.gmra.mxu3 %vm2198_vm4, %v4216_v33 }
0x1534   : > { %v4089_v52 = vpop.f32.mrf.mxu3 }
0x1535   : > { %v5788_v52 = vld [vmem:[%s6893_s6 + $0x2] ss:$0 sm:$0xff] }
0x1536   : > { %v5944_v30 = vpop.eup %5943 }
0x1537   : > { %v4215_v25 = vmul.f32 %v5944_v30, %v7892_v48  ;;  %v5946_v38 = vpop.eup %5945 }
0x1538   : > { %v4376_v44 = vmul.f32 %v5946_v38, %v7884_v49 }
0x1539   : > { %v4217_v43 = vpack.c.bf16 %v4215_v25, %v4215_v25 }
0x153a   : > { %v4378_v57 = vpack.c.bf16 %v4376_v44, %v4376_v44 }
0x153b   : > { %5475 = vmatmul.msk.bf16.vlgmr.msra.gmra.mxu0 %vm2198_vm4, %v4217_v43 }
0x1543   : > { %5478 = vmatmul.msk.bf16.vlgmr.msrb.gmra.mxu3 %vm2198_vm4, %v4378_v57 }
0x1547   : > { %v4425_v13 = vpop.permute.xlu1 %4424 }
0x1548   : > { %v4430_v45 = vsel %vm2248_vm5, %v4425_v13, 0 }
0x1549   : > { %v4373_v46 = vpop.xlane.xlu0 %4372  ;;  %4439 = vmatpush.bf16.msrb.mxu0 %v4430_v45 }
0x154a   : > { %5947 = vrcp.f32 %v4373_v46 }
0x1550   : > { %v5948_v55 = vpop.eup %5947 }
0x1551   : > { %v4377_v20 = vmul.f32 %v5948_v55, %v7900_v18  ;;  %v4535_v3 = vpop.xlane.xlu2 %4534 }
0x1552   : > { %5949 = vrcp.f32 %v4535_v3 }
0x1553   : > { %v4379_v40 = vpack.c.bf16 %v4377_v20, %v4377_v20 }
0x1555   : > { %5479 = vmatmul.msk.bf16.vlgmr.msrb.gmra.mxu0 %vm2198_vm4, %v4379_v40 }
0x1558   : > { %v5950_v4 = vpop.eup %5949 }
0x1559   : > { %v4587_v22 = vpop.permute.xlu2 %4586  ;;  %v4539_v47 = vmul.f32 %v5950_v4, %v7905_v17 }
0x155a   : > { %v4592_v49 = vsel %vm2248_vm5, %v4587_v22, 0 }
0x155b   : > { %4601 = vmatpush.bf16.msra.mxu0 %v4592_v49  ;;  %v4541_v8 = vpack.c.bf16 %v4539_v47, %v4539_v47  ;;  %v5550_v47 = vld [vmem:[%s8156_s22] sm:$0xff] }
0x155c   : > { %v4563_v31 = vpop.permute.xlu0 %4562 }
0x155d   : > { %v4568_v48 = vsel %vm2248_vm5, %v4563_v31, 0 }
0x155e   : > { %4577 = vmatpush.bf16.msra.mxu3 %v4568_v48  ;;  %v5551_v48 = vld [vmem:[%s8156_s22 + $0x8] sm:$0xff] }
0x155f   : > { %4784 = vmatpush.bf16.msra.mxu2 %v5551_v48  ;;  %v5552_v48 = vld [vmem:[%s6891_s15] sm:$0xff] }
0x1563   : > { %4785 = vmatpush.bf16.msra.mxu2 %v5550_v47 }
0x1565   : > { %v4111_v54 = vpop.f32.mrf.mxu0  ;;  %5483 = vmatmul.msk.bf16.vlgmr.msra.gmra.mxu0 %vm2198_vm4, %v4541_v8 }
0x156d   : > { %v4113_v53 = vpop.f32.mrf.mxu0 }
0x1572   : > { %v4532_v63 = vpop.xlane.xlu1 %4531 }
0x1573   : > { %5951 = vrcp.f32 %v4532_v63 }
0x1579   : > { %v5952_v51 = vpop.eup %5951 }
0x157a   : > { %v4538_v34 = vmul.f32 %v5952_v51, %v5940_v7 }
0x157c   : > { %v4540_v56 = vpack.c.bf16 %v4538_v34, %v4538_v34 }
0x157e   : > { %5482 = vmatmul.msk.bf16.vlgmr.msra.gmra.mxu3 %vm2198_vm4, %v4540_v56 }
0x15b6   : > { %v4255_v58 = vpop.f32.mrf.mxu3 }
0x15b8   : > { %v4279_v18 = vpop.f32.mrf.mxu0 }
0x15b9   : > { %v5755_v60 = vpack.i.bf16 %v4279_v18, %v4255_v58 }
0x15bb   : > { %5756 = vrot.lane.b32.xlu0 %v5755_v60, %s6416_s17 }
0x15be   : > { %v4257_v9 = vpop.f32.mrf.mxu3 }
0x15c0   : > { %v4281_v17 = vpop.f32.mrf.mxu0 }
0x15c6   : > { %v4417_v39 = vpop.f32.mrf.mxu3 }
0x15ce   : > { %v4419_v42 = vpop.f32.mrf.mxu3 }
0x15d2   : > { %v4441_v41 = vpop.f32.mrf.mxu0 }
0x15d3   : > { %v5760_v14 = vpack.i.bf16 %v4441_v41, %v4417_v39 }
0x15d5   : > { %5761 = vrot.lane.b32.xlu2 %v5760_v14, %s6417_s7 }
0x15da   : > { %v4443_v35 = vpop.f32.mrf.mxu0 }
0x15e2   : > { %v4603_v16 = vpop.f32.mrf.mxu0 }
0x15ea   : > { %v4605_v36 = vpop.f32.mrf.mxu0 }
0x15eb   : > { %v5555_v36 = vld [vmem:[%s6891_s15 + $0x18] sm:$0xff] }
0x15ec   : > { %4839 = vmatpush.bf16.msrb.mxu3 %v5555_v36 }
0x1601   : > { %v4579_v61 = vpop.f32.mrf.mxu3 }
0x1602   : > { %v5765_v26 = vpack.i.bf16 %v4603_v16, %v4579_v61 }
0x1604   : > { %5766 = vrot.lane.b32.xlu0 %v5765_v26, %s6418_s4 }
0x1609   : > { %v4581_v19 = vpop.f32.mrf.mxu3 }
0x162d   : > { %v5757_v11 = vpop.permute.xlu0 %5756 }
0x162e   : > { %v5759_v15 = vunpack.i.h.bf16 %v5757_v11  ;;  %v5758_v6 = vunpack.i.l.bf16 %v5757_v11 }
0x162f   : > { %v5762_v0 = vpop.permute.xlu2 %5761 }
0x1630   : > { %v5764_v62 = vunpack.i.h.bf16 %v5762_v0  ;;  %v5763_v59 = vunpack.i.l.bf16 %v5762_v0  ;;  %v4632_v7 = vsel %vm1401_vm15, %v4111_v54, %v5759_v15  ;;  %v4631_v24 = vsel %vm1401_vm15, %v7917_v37, %v5758_v6 }
0x1632   : > { %v4634_v50 = vsel %vm1896_vm2, %v4632_v7, %v5764_v62  ;;  %v4633_v23 = vsel %vm1896_vm2, %v4631_v24, %v5763_v59 }
0x1676   : > { %v5767_v28 = vpop.permute.xlu0 %5766 }
0x1677   : > { %v5769_v27 = vunpack.i.h.bf16 %v5767_v28  ;;  %v5768_v32 = vunpack.i.l.bf16 %v5767_v28 }
0x1679   : > { %v4635_v1 = vsel %vm1899_vm3, %v4633_v23, %v5768_v32  ;;  %v4636_v29 = vsel %vm1899_vm3, %v4634_v50, %v5769_v27  ;;  %v5963_v32 = vld [vmem:[%s6845_s24] sm:$0x1f] }
0x167a   : > { %v4637_v33 = vpack.c.bf16 %v4636_v29, %v4635_v1  ;;  %v4746_v50 = vperm.slane %v5963_v32, 4 }
0x167c   : > { %5492 = vmatmul.msk.bf16.vlgmr.msra.gmra.mxu1 %vm1261_vm1, %v4637_v33 }
0x16f9   : > { %v4665_v30 = vpop.f32.mrf.mxu1 }
0x16fa   : > { %v4666_v25 = vadd.f32 %v5788_v52, %v4665_v30 }
0x16fc   : > { %v7947_v43 = vadd.f32 %v4666_v25, %v7753_v5 }
0x16fe   : > { %v4672_v37 = vsel %vm1261_vm1, %v7947_v43, 0.0 }
0x16ff   : > { %4673 = vadd.xlane.f32.xlu1 %v4672_v37 }
0x1701   : > { %v4667_v38 = vpop.f32.mrf.mxu1 }
0x1702   : > { %v4668_v44 = vadd.f32 %v5788_v52, %v4667_v38 }
0x1704   : > { %v7952_v57 = vadd.f32 %v4668_v44, %v7758_v10  ;;  %v5964_v44 = vld [vmem:[%s6850_s8] sm:$0x1f] }
0x1706   : > { %v4675_v13 = vsel %vm1261_vm1, %v7952_v57, 0.0 }
0x1707   : > { %4676 = vadd.xlane.f32.xlu2 %v4675_v13  ;;  %v4751_v13 = vperm.slane %v5964_v44, 4 }
0x1772   : > { %v4674_v45 = vpop.xlane.xlu1 %4673 }
0x1773   : > { %v4678_v46 = vmul.f32 %v4674_v45, %v6905_v12 }
0x1775   : > { %v7958_v5 = vsub.f32 %v7947_v43, %v4678_v46 }
0x1777   : > { %v4682_v55 = vmul.f32 %v7958_v5, %v7958_v5  ;;  %v4747_v37 = vmul.f32 %v4746_v50, %v7958_v5 }
0x1779   : > { %v4684_v20 = vsel %vm1261_vm1, %v4682_v55, 0.0 }
0x177a   : > { %v4677_v3 = vpop.xlane.xlu2 %4676  ;;  %4685 = vadd.xlane.f32.xlu0 %v4684_v20 }
0x177b   : > { %v4679_v10 = vmul.f32 %v4677_v3, %v6905_v12 }
0x177d   : > { %v7965_v40 = vsub.f32 %v7952_v57, %v4679_v10 }
0x177f   : > { %v4683_v22 = vmul.f32 %v7965_v40, %v7965_v40  ;;  %v4748_v46 = vmul.f32 %v4746_v50, %v7965_v40  ;;  %v5789_v40 = vld [vmem:[%s1236_s28] ss:$0 sm:$0xff] }
0x1781   : > { %v4687_v49 = vsel %vm1261_vm1, %v4683_v22, 0.0 }
0x1782   : > { %4688 = vadd.xlane.f32.xlu1 %v4687_v49 }
0x17ed   : > { %v4686_v4 = vpop.xlane.xlu0 %4685 }
0x17ee   : > { %v4690_v31 = vmul.f32 0.032258064, %v4686_v4  ;;  %v5554_v4 = vld [vmem:[%s6891_s15 + $0x10] sm:$0xff] }
0x17ef   : > { %4840 = vmatpush.bf16.msrb.mxu3 %v5554_v4 }
0x17f0   : > { %5953 = vrsqrt.f32 %v4690_v31  ;;  %vm4699_vm15 = vcmp.eq.f32.partialorder %v4690_v31, inf  ;;  %v4702_v39 = vand.u32 2147483648, %v4690_v31  ;;  %vm4701_vm2 = vcmp.eq.f32.partialorder %v4690_v31, 0.0 }
0x17f5   : > { %v4689_v8 = vpop.xlane.xlu1 %4688 }
0x17f6   : > { %v5954_v54 = vpop.eup %5953  ;;  %v4691_v53 = vmul.f32 0.032258064, %v4689_v8 }
0x17f7   : > { %v4693_v63 = vmul.f32 %v5954_v54, %v4690_v31 }
0x17f8   : > { %5955 = vrsqrt.f32 %v4691_v53  ;;  %vm4711_vm3 = vcmp.eq.f32.partialorder %v4691_v53, inf  ;;  %v4714_v19 = vand.u32 2147483648, %v4691_v53  ;;  %vm4713_vm4 = vcmp.eq.f32.partialorder %v4691_v53, 0.0 }
0x17f9   : > { %v4694_v51 = vmul.f32 %v5954_v54, %v4693_v63 }
0x17fb   : > { %v4695_v34 = vmul.f32 0.5, %v4694_v51 }
0x17fd   : > { %v4696_v56 = vsub.f32 1.5, %v4695_v34 }
0x17fe   : > { %v5956_v58 = vpop.eup %5955 }
0x17ff   : > { %v4697_v18 = vmul.f32 %v5954_v54, %v4696_v56  ;;  %v4705_v60 = vmul.f32 %v5956_v58, %v4691_v53  ;;  %v5790_v56 = vld [vmem:[%s1244_s1] ss:$0 sm:$0xff]  ;;  %s8159_s1 = sld [smem:[#allocation59_spill]] (!%p5519_p3) }
0x1801   : > { %v4698_v9 = vmul.f32 %v4697_v18, %v4690_v31  ;;  %v4706_v17 = vmul.f32 %v5956_v58, %v4705_v60 }
0x1803   : > { %v4700_v42 = vsel %vm4699_vm15, %v4690_v31, %v4698_v9  ;;  %v4707_v41 = vmul.f32 0.5, %v4706_v17  ;;  %v5553_v31 = vld [vmem:[%s6891_s15 + $0x8] sm:$0xff] }
0x1804   : > { %v4703_v14 = vsel %vm4701_vm2, %v4702_v39, %v4700_v42  ;;  %4841 = vmatpush.bf16.msrb.mxu3 %v5553_v31 }
0x1805   : > { %v4716_v35 = vadd.f32 1e-06, %v4703_v14  ;;  %v4708_v16 = vsub.f32 1.5, %v4707_v41 }
0x1807   : > { %5957 = vrcp.f32 %v4716_v35  ;;  %v4709_v61 = vmul.f32 %v5956_v58, %v4708_v16  ;;  %v4729_v24 = vand.u32 2147483648, %v4716_v35  ;;  %vm4723_vm10 = vweird.f32 %v4716_v35 }
0x1808   : > { %v4727_v28 = vand.u32 2147483647, %v4716_v35  ;;  %4842 = vmatpush.bf16.msrb.mxu3 %v5552_v48 }
0x1809   : > { %v4710_v26 = vmul.f32 %v4709_v61, %v4691_v53  ;;  %v4730_v29 = vor.u32 1.1754944e-38, %v4729_v24 }
0x180a   : > { %vm4728_vm12 = vcmp.eq.f32.partialorder %v4727_v28, 8.507059e+37 }
0x180b   : > { %v4712_v2 = vsel %vm4711_vm3, %v4691_v53, %v4710_v26 }
0x180c   : > { %v4715_v21 = vsel %vm4713_vm4, %v4714_v19, %v4712_v2 }
0x180d   : > { %v5958_v11 = vpop.eup %5957  ;;  %v4717_v15 = vadd.f32 1e-06, %v4715_v21 }
0x180e   : > { %v4719_v6 = vmul.f32 %v5958_v11, %v4716_v35  ;;  %vm4724_vm5 = vweird.f32 %v5958_v11 }
0x180f   : > { %5959 = vrcp.f32 %v4717_v15  ;;  %vm4725_vm11 = vmor %vm4723_vm10, %vm4724_vm5  ;;  %v4743_v33 = vand.u32 2147483648, %v4717_v15  ;;  %v4741_v30 = vand.u32 2147483647, %v4717_v15  ;;  %vm4737_vm14 = vweird.f32 %v4717_v15 }
0x1810   : > { %v4720_v0 = vsub.f32 1.0, %v4719_v6 }
0x1811   : > { %v4744_v45 = vor.u32 1.1754944e-38, %v4743_v33  ;;  %vm4742_vm6 = vcmp.eq.f32.partialorder %v4741_v30, 8.507059e+37 }
0x1812   : > { %v4721_v62 = vmul.f32 %v5958_v11, %v4720_v0 }
0x1814   : > { %v4722_v59 = vadd.f32 %v5958_v11, %v4721_v62 }
0x1815   : > { %v5960_v7 = vpop.eup %5959 }
0x1816   : > { %v4733_v27 = vmul.f32 %v5960_v7, %v4717_v15  ;;  %v4726_v23 = vsel %vm4725_vm11, %v5958_v11, %v4722_v59  ;;  %vm4738_vm13 = vweird.f32 %v5960_v7 }
0x1817   : > { %v4731_v25 = vsel %vm4728_vm12, %v4730_v29, %v4726_v23  ;;  %vm4739_vm0 = vmor %vm4737_vm14, %vm4738_vm13 }
0x1818   : > { %v4734_v1 = vsub.f32 1.0, %v4733_v27  ;;  %v4749_v20 = vmul.f32 %v4747_v37, %v4731_v25 }
0x181a   : > { %v4735_v52 = vmul.f32 %v5960_v7, %v4734_v1  ;;  %v4752_v22 = vadd.f32 %v4751_v13, %v4749_v20 }
0x181c   : > { %v4736_v38 = vadd.f32 %v5960_v7, %v4735_v52 }
0x181e   : > { %v4740_v55 = vsel %vm4739_vm0, %v5960_v7, %v4736_v38 }
0x181f   : > { %v4745_v3 = vsel %vm4742_vm6, %v4744_v45, %v4740_v55 }
0x1820   : > { %v4750_v10 = vmul.f32 %v4748_v46, %v4745_v3 }
0x1822   : > { %v4753_v49 = vadd.f32 %v4751_v13, %v4750_v10 }
0x1824   : > { %v4754_v5 = vpack.c.bf16 %v4753_v49, %v4752_v22 }
0x1826   : > { %5501 = vmatmul.msk.bf16.vlgmr.msra.gmra.mxu2 %vm1261_vm1, %v4754_v5 }
0x18a9   : > { %v4787_v47 = vpop.f32.mrf.mxu2 }
0x18aa   : > { %v4788_v8 = vadd.f32 %v5789_v40, %v4787_v47 }
0x18ac   : > { %v4792_v63 = vmax.f32 %v4788_v8, 0.0 }
0x18b1   : > { %v4789_v54 = vpop.f32.mrf.mxu2 }
0x18b2   : > { %v4790_v53 = vadd.f32 %v5789_v40, %v4789_v54 }
0x18b4   : > { %v4793_v51 = vmax.f32 %v4790_v53, 0.0 }
0x18b6   : > { %v4794_v34 = vpack.c.bf16 %v4793_v51, %v4792_v63 }
0x18b8   : > { %5518 = vmatmul.msk.bf16.vlgmr.msrb.gmra.mxu3 %vm4831_vm7, %v4794_v34 }
0x193b   : > { %v4844_v58 = vpop.f32.mrf.mxu3 }
0x193c   : > { %v4845_v18 = vadd.f32 %v5790_v56, %v4844_v58 }
0x193e   : > { %v4849_v60 = vadd.f32 %v4845_v18, %v7947_v43 }
0x1940   : > { %4851 = vst.msk [vmem:[#allocation2] sm:$0xff] %vm1261_vm1, %v4849_v60 }
0x1943   : > { %v4846_v9 = vpop.f32.mrf.mxu3 }
0x1944   : > { %v4847_v17 = vadd.f32 %v5790_v56, %v4846_v9  ;;  %4856 = sbr.rel (%p5519_p3) target bundleno = 6768 (0x1a70), region = 176 }
0x1946   : > { %v4850_v39 = vadd.f32 %v4847_v17, %v7952_v57 }
0x1948   : > { %4852 = vst.msk [vmem:[#allocation2 + $0x8] sm:$0xff] %vm1261_vm1, %v4850_v39 }
0x1949   : > { %v4859_v42 = vsel %vm1261_vm1, %v4849_v60, 0.0  ;;  %v4862_v41 = vsel %vm1261_vm1, %v4850_v39, 0.0  ;;  %v5965_v10 = vld [vmem:[%s8159_s1] ss:$0 sm:$0xff] }
0x194a   : > { %4860 = vadd.xlane.f32.xlu0 %v4859_v42  ;;  %v5966_v40 = vld [vmem:[%s8160_s20] ss:$0 sm:$0xff] }
0x1952   : > { %4863 = vadd.xlane.f32.xlu0 %v4862_v41 }
0x19bd   : > { %v4861_v14 = vpop.xlane.xlu0 %4860 }
0x19be   : > { %v4865_v43 = vmul.f32 %v4861_v14, %v6905_v12 }
0x19c0   : > { %v4867_v35 = vsub.f32 %v4849_v60, %v4865_v43 }
0x19c2   : > { %v4869_v16 = vmul.f32 %v4867_v35, %v4867_v35  ;;  %v4936_v48 = vmul.f32 %v5965_v10, %v4867_v35 }
0x19c4   : > { %v4871_v36 = vsel %vm1261_vm1, %v4869_v16, 0.0 }
0x19c5   : > { %4872 = vadd.xlane.f32.xlu1 %v4871_v36  ;;  %v4864_v57 = vpop.xlane.xlu0 %4863 }
0x19c6   : > { %v4866_v61 = vmul.f32 %v4864_v57, %v6905_v12 }
0x19c8   : > { %v8001_v26 = vsub.f32 %v4850_v39, %v4866_v61 }
0x19ca   : > { %v4870_v19 = vmul.f32 %v8001_v26, %v8001_v26  ;;  %v4937_v9 = vmul.f32 %v5965_v10, %v8001_v26 }
0x19cc   : > { %v4874_v2 = vsel %vm1261_vm1, %v4870_v19, 0.0 }
0x19cd   : > { %4875 = vadd.xlane.f32.xlu1 %v4874_v2 }
0x1a38   : > { %v4873_v21 = vpop.xlane.xlu1 %4872 }
0x1a39   : > { %v4877_v11 = vmul.f32 0.032258064, %v4873_v21 }
0x1a3b   : > { %5967 = vrsqrt.f32 %v4877_v11  ;;  %vm4886_vm8 = vcmp.eq.f32.partialorder %v4877_v11, inf  ;;  %v4889_v23 = vand.u32 2147483648, %v4877_v11  ;;  %vm4888_vm9 = vcmp.eq.f32.partialorder %v4877_v11, 0.0 }
0x1a40   : > { %v4876_v15 = vpop.xlane.xlu1 %4875 }
0x1a41   : > { %v5968_v6 = vpop.eup %5967  ;;  %v4878_v0 = vmul.f32 0.032258064, %v4876_v15 }
0x1a42   : > { %v4880_v62 = vmul.f32 %v5968_v6, %v4877_v11 }
0x1a43   : > { %5969 = vrsqrt.f32 %v4878_v0  ;;  %vm4898_vm15 = vcmp.eq.f32.partialorder %v4878_v0, inf  ;;  %v4901_v38 = vand.u32 2147483648, %v4878_v0  ;;  %vm4900_vm2 = vcmp.eq.f32.partialorder %v4878_v0, 0.0 }
0x1a44   : > { %v4881_v59 = vmul.f32 %v5968_v6, %v4880_v62 }
0x1a46   : > { %v4882_v7 = vmul.f32 0.5, %v4881_v59 }
0x1a48   : > { %v4883_v24 = vsub.f32 1.5, %v4882_v7 }
0x1a49   : > { %v5970_v12 = vpop.eup %5969 }
0x1a4a   : > { %v4884_v28 = vmul.f32 %v5968_v6, %v4883_v24  ;;  %v4892_v27 = vmul.f32 %v5970_v12, %v4878_v0 }
0x1a4c   : > { %v4885_v32 = vmul.f32 %v4884_v28, %v4877_v11  ;;  %v4893_v50 = vmul.f32 %v5970_v12, %v4892_v27 }
0x1a4e   : > { %v4887_v1 = vsel %vm4886_vm8, %v4877_v11, %v4885_v32  ;;  %v4894_v29 = vmul.f32 0.5, %v4893_v50 }
0x1a4f   : > { %v4890_v33 = vsel %vm4888_vm9, %v4889_v23, %v4887_v1 }
0x1a50   : > { %v4903_v52 = vadd.f32 1e-06, %v4890_v33  ;;  %v4895_v30 = vsub.f32 1.5, %v4894_v29 }
0x1a52   : > { %5971 = vrcp.f32 %v4903_v52  ;;  %v4896_v25 = vmul.f32 %v5970_v12, %v4895_v30  ;;  %v4916_v3 = vand.u32 2147483648, %v4903_v52  ;;  %v4914_v49 = vand.u32 2147483647, %v4903_v52 }
0x1a53   : > { %vm4910_vm4 = vweird.f32 %v4903_v52 }
0x1a54   : > { %v4897_v37 = vmul.f32 %v4896_v25, %v4878_v0  ;;  %v4917_v4 = vor.u32 1.1754944e-38, %v4916_v3  ;;  %vm4915_vm10 = vcmp.eq.f32.partialorder %v4914_v49, 8.507059e+37 }
0x1a56   : > { %v4899_v44 = vsel %vm4898_vm15, %v4878_v0, %v4897_v37 }
0x1a57   : > { %v4902_v45 = vsel %vm4900_vm2, %v4901_v38, %v4899_v44 }
0x1a58   : > { %v5972_v13 = vpop.eup %5971  ;;  %v4904_v55 = vadd.f32 1e-06, %v4902_v45 }
0x1a59   : > { %v4906_v46 = vmul.f32 %v5972_v13, %v4903_v52  ;;  %vm4911_vm3 = vweird.f32 %v5972_v13 }
0x1a5a   : > { %5973 = vrcp.f32 %v4904_v55  ;;  %vm4912_vm5 = vmor %vm4910_vm4, %vm4911_vm3  ;;  %v4930_v34 = vand.u32 2147483648, %v4904_v55  ;;  %v4928_v58 = vand.u32 2147483647, %v4904_v55  ;;  %vm4924_vm12 = vweird.f32 %v4904_v55 }
0x1a5b   : > { %v4907_v20 = vsub.f32 1.0, %v4906_v46 }
0x1a5c   : > { %v4931_v60 = vor.u32 1.1754944e-38, %v4930_v34  ;;  %vm4929_vm14 = vcmp.eq.f32.partialorder %v4928_v58, 8.507059e+37 }
0x1a5d   : > { %v4908_v22 = vmul.f32 %v5972_v13, %v4907_v20 }
0x1a5f   : > { %v4909_v5 = vadd.f32 %v5972_v13, %v4908_v22 }
0x1a60   : > { %v5974_v31 = vpop.eup %5973 }
0x1a61   : > { %v4913_v47 = vsel %vm4912_vm5, %v5972_v13, %v4909_v5  ;;  %v4920_v54 = vmul.f32 %v5974_v31, %v4904_v55  ;;  %vm4925_vm11 = vweird.f32 %v5974_v31 }
0x1a62   : > { %v4918_v8 = vsel %vm4915_vm10, %v4917_v4, %v4913_v47  ;;  %vm4926_vm13 = vmor %vm4924_vm12, %vm4925_vm11 }
0x1a63   : > { %v4938_v53 = vmul.f32 %v4936_v48, %v4918_v8  ;;  %v4921_v63 = vsub.f32 1.0, %v4920_v54 }
0x1a65   : > { %v4943_v51 = vadd.f32 %v5966_v40, %v4938_v53  ;;  %v4922_v56 = vmul.f32 %v5974_v31, %v4921_v63 }
0x1a67   : > { %4945 = vst.msk [vmem:[#allocation21] sm:$0xff] %vm1261_vm1, %v4943_v51  ;;  %v4923_v18 = vadd.f32 %v5974_v31, %v4922_v56 }
0x1a69   : > { %v4927_v17 = vsel %vm4926_vm13, %v5974_v31, %v4923_v18 }
0x1a6a   : > { %v4932_v39 = vsel %vm4929_vm14, %v4931_v60, %v4927_v17 }
0x1a6b   : > { %v4939_v42 = vmul.f32 %v4937_v9, %v4932_v39 }
0x1a6d   : > { %v4944_v41 = vadd.f32 %v5966_v40, %v4939_v42 }
0x1a6f   : > { %4946 = vst.msk [vmem:[#allocation21 + $0x8] sm:$0xff] %vm1261_vm1, %v4944_v41 }
0x1a70 PF: > { %p5648_p4 = scmp.eq.s32.totalorder %s6580_s9, 1  ;;  %s6419_s3 = smov [#allocation21]  }
0x1a71   : > { %s4952_s14 = sshll.u32 %s6419_s3, 4  ;;  %s8161_s5 = sld [smem:[#allocation61_spill]]  ;;  %s4953_s14 = int_to_ptr.vmem [resolvable:$true] %s4952_s14 }
0x1a72   : > { %s6420_s4 = smov 128  }
0x1a77   : > { %s4954_s7 = sshll.u32 %s8161_s5, 4  ;;  %s4955_s7 = int_to_ptr.hbm [resolvable:$true] %s4954_s7 }
0x1a78   : > { %5599 = dma.vmem_to_hbm [thread:$0]  (%p5648_p4), %s4953_s14, 256, %s4955_s7, [#allocation5], %s6420_s4, %s6420_s4, %s6416_s17  }
0x1a79   : > { %6374 = dma.done.wait (%p5648_p4), [#allocation5], 256  }
0x1a7a   : > { %6376 = vsyncadd (%p5648_p4), [#allocation5], 4294967040 }
0x1a7b PF: > { %s8162_s28 = sld [smem:[#allocation31_spill]] }
0x1a7c   : > { %s8163_s27 = sld [smem:[#allocation29_spill]] }
0x1a7d   : > { %s8164_s3 = sld [smem:[#allocation30_spill]] }
0x1a7e   : > { %s8165_s7 = sld [smem:[#allocation32_spill]] }
0x1a81   : > { %p46_p13 = scmp.ge.s32.totalorder %s8162_s28, 4  }
0x1a83   :  { %48 = sbr.rel (!%p46_p13) target bundleno = 39 (0x27), region = 426 }
0x1a88   :  { %4971 = vsyncpa [#allocation4], 1 }
0x1a89   :  { %4973 = vsyncpa [#allocation4 + $0x1], 1 }
0x1a8a   :  { %4974 = vsyncpa [#allocation7], 1 }
0x1a8b   :  { %4975 = vsyncpa [#allocation10], 1 }
0x1a8c   :  { %4976 = vsyncpa [#allocation13], 1 }
0x1a8d   :  { %4978 = vsyncpa [#allocation13 + $0x1], 1 }
0x1a8e   :  { %4979 = vsyncpa [#allocation16], 1 }
0x1a8f   :  { %4981 = vsyncpa [#allocation16 + $0x1], 1 }
0x1a90   :  { %4982 = vsyncpa [#allocation19], 1 }
0x1a91   :  { %4984 = vsyncpa [#allocation19 + $0x1], 1 }
0x1a92   :  { %4985 = vsyncpa [#allocation5], 1 }
0x1a93   :  { %4987 = vsyncpa [#allocation5 + $0x1], 1 }

</bundles_post_ra>
